<compile_context>
chip_gen: v7x
topology: tpu7x:2x2x1
jax: 0.10.0
libtpu: 0.0.40
codegen_flags: <defaults>
</compile_context>

<pallas_src>
import math
import functools

import jax
import jax.numpy as jnp
from jax.experimental import pallas as pl
from jax.experimental.pallas import tpu as pltpu

_CPARAMS_1D = pltpu.CompilerParams(dimension_semantics=("parallel",))


# ----------------------------- in-kernel helpers -----------------------------

def _erf(x):
    # Abramowitz & Stegun 7.1.26 rational approximation (|err| <= 1.5e-7).
    # Uses only mul/add/where/exp/div so it lowers cleanly in Mosaic.
    a1, a2, a3, a4, a5 = (0.254829592, -0.284496736, 1.421413741,
                          -1.453152027, 1.061405429)
    pp = 0.3275911
    sgn = jnp.where(x >= 0.0, 1.0, -1.0)
    ax = x * sgn
    t = 1.0 / (1.0 + pp * ax)
    poly = ((((a5 * t + a4) * t + a3) * t + a2) * t + a1) * t
    return sgn * (1.0 - poly * jnp.exp(-ax * ax))


def _gelu(x):
    # exact erf-GELU (HF "gelu"), via the polynomial erf above
    return 0.5 * x * (1.0 + _erf(x * 0.7071067811865476))


def _layernorm(x, g, b, eps):
    mu = jnp.mean(x, axis=-1, keepdims=True)
    var = jnp.mean(jnp.square(x - mu), axis=-1, keepdims=True)
    return (x - mu) * jax.lax.rsqrt(var + eps) * g + b


# ------------------------------- Pallas kernels -------------------------------

def _ln_kernel(x_ref, g_ref, b_ref, o_ref, *, eps):
    o_ref[...] = _layernorm(x_ref[...], g_ref[...], b_ref[...], eps)


def _attn_block_kernel(hq_ref, hkv_ref, wqkv_ref, bqkv_ref, wo_ref, bo_ref,
                       g_ref, beta_ref, o_ref, *, heads, dh, scale, causal,
                       is_self, eps):
    """Fused: QKV proj + multi-head attention + out proj + residual + LN.

    One grid step == one batch element; heads handled in-kernel so the
    head split/merge never round-trips through HBM.
    """
    D = heads * dh
    hq = hq_ref[0]                                # (Sq, D) f32
    hq_b = hq.astype(jnp.bfloat16)

    if is_self:
        # single fused (D, 3D) matmul for Q|K|V
        qkv = jnp.dot(hq_b, wqkv_ref[...],
                      preferred_element_type=jnp.float32) + bqkv_ref[...]
        q, k, v = qkv[:, :D], qkv[:, D:2 * D], qkv[:, 2 * D:]
    else:
        hkv_b = hkv_ref[0].astype(jnp.bfloat16)
        q = jnp.dot(hq_b, wqkv_ref[:, :D],
                    preferred_element_type=jnp.float32) + bqkv_ref[:, :D]
        kv = jnp.dot(hkv_b, wqkv_ref[:, D:],
                     preferred_element_type=jnp.float32) + bqkv_ref[:, D:]
        k, v = kv[:, :D], kv[:, D:]

    Sq, Sk = q.shape[0], k.shape[0]
    if causal:
        rows = jax.lax.broadcasted_iota(jnp.int32, (Sq, Sk), 0)
        cols = jax.lax.broadcasted_iota(jnp.int32, (Sq, Sk), 1)
        keep = cols <= rows                        # built in-kernel, no HBM mask

    ctx_heads = []
    for h in range(heads):                         # static unroll over heads
        sl = slice(h * dh, (h + 1) * dh)
        qh = q[:, sl].astype(jnp.bfloat16)
        kh = k[:, sl].astype(jnp.bfloat16)
        vh = v[:, sl].astype(jnp.bfloat16)
        # q @ k^T via transposed contracting dims (no explicit transpose)
        s = jax.lax.dot_general(qh, kh, (((1,), (1,)), ((), ())),
                                preferred_element_type=jnp.float32) * scale
        if causal:
            s = jnp.where(keep, s, -1e30)          # finite fill (no inf/NaN risk)
        s = s - jnp.max(s, axis=-1, keepdims=True)
        p = jnp.exp(s)
        p = p * pl.reciprocal(jnp.sum(p, axis=-1, keepdims=True), approx=True)
        ctx_heads.append(jnp.dot(p.astype(jnp.bfloat16), vh,
                                 preferred_element_type=jnp.float32))
    ctx = jnp.concatenate(ctx_heads, axis=-1)      # (Sq, D)

    out = jnp.dot(ctx.astype(jnp.bfloat16), wo_ref[...],
                  preferred_element_type=jnp.float32) + bo_ref[...]
    o_ref[0] = _layernorm(out + hq, g_ref[...], beta_ref[...], eps)


def _ffn_kernel(x_ref, w1_ref, b1_ref, w2_ref, b2_ref, g_ref, beta_ref, o_ref,
                *, eps):
    """Fused: intermediate matmul + GELU + output matmul + residual + LN."""
    x = x_ref[...]
    h = jnp.dot(x.astype(jnp.bfloat16), w1_ref[...],
                preferred_element_type=jnp.float32) + b1_ref[...]
    h = _gelu(h)
    y = jnp.dot(h.astype(jnp.bfloat16), w2_ref[...],
                preferred_element_type=jnp.float32) + b2_ref[...]
    o_ref[...] = _layernorm(y + x, g_ref[...], beta_ref[...], eps)


def _lm_head_kernel(x_ref, wd_ref, bd_ref, g_ref, beta_ref, we_ref, bias_ref,
                    o_ref, *, eps):
    """Fused RobertaLMHead: dense + GELU + LN + tied-embedding logits."""
    x = x_ref[...]
    h = jnp.dot(x.astype(jnp.bfloat16), wd_ref[...],
                preferred_element_type=jnp.float32) + bd_ref[...]
    h = _gelu(h)
    h = _layernorm(h, g_ref[...], beta_ref[...], eps)
    # logits = h @ word_emb^T  -- transposed contraction, no HBM transpose
    logits = jax.lax.dot_general(h.astype(jnp.bfloat16),
                                 we_ref[...].astype(jnp.bfloat16),
                                 (((1,), (1,)), ((), ())),
                                 preferred_element_type=jnp.float32)
    o_ref[...] = logits + bias_ref[...]


# ------------------------------- kernel wrappers -------------------------------

def _row_block(m, max_block=128):
    # pick an 8-aligned row tile giving >=2 grid steps when possible (so the
    # "parallel" grid axis can be sharded across TensorCores on v7x)
    for bm in (max_block, 64, 32, 16, 8):
        if bm <= m and m % bm == 0 and m // bm >= 2:
            return bm
    return m


def layernorm(x2d, g, b, eps):
    M, D = x2d.shape
    bm = _row_block(M)
    return pl.pallas_call(
        functools.partial(_ln_kernel, eps=eps),
        out_shape=jax.ShapeDtypeStruct((M, D), jnp.float32),
        grid=(M // bm,),
        in_specs=[pl.BlockSpec((bm, D), lambda i: (i, 0)),
                  pl.BlockSpec((1, D), lambda i: (0, 0)),
                  pl.BlockSpec((1, D), lambda i: (0, 0))],
        out_specs=pl.BlockSpec((bm, D), lambda i: (i, 0)),
        compiler_params=_CPARAMS_1D,
    )(x2d, g.reshape(1, D), b.reshape(1, D))


def attention_block(hq, hkv, p, cfg, *, causal, is_self):
    B, Sq, D = hq.shape
    Sk = hkv.shape[1]
    kern = functools.partial(
        _attn_block_kernel, heads=cfg['heads'], dh=cfg['dh'],
        scale=1.0 / math.sqrt(cfg['dh']), causal=causal, is_self=is_self,
        eps=cfg['eps'])
    return pl.pallas_call(
        kern,
        out_shape=jax.ShapeDtypeStruct((B, Sq, D), jnp.float32),
        grid=(B,),
        in_specs=[pl.BlockSpec((1, Sq, D), lambda b: (b, 0, 0)),
                  pl.BlockSpec((1, Sk, D), lambda b: (b, 0, 0)),
                  pl.BlockSpec((D, 3 * D), lambda b: (0, 0)),
                  pl.BlockSpec((1, 3 * D), lambda b: (0, 0)),
                  pl.BlockSpec((D, D), lambda b: (0, 0)),
                  pl.BlockSpec((1, D), lambda b: (0, 0)),
                  pl.BlockSpec((1, D), lambda b: (0, 0)),
                  pl.BlockSpec((1, D), lambda b: (0, 0))],
        out_specs=pl.BlockSpec((1, Sq, D), lambda b: (b, 0, 0)),
        compiler_params=_CPARAMS_1D,
    )(hq, hkv, p['wqkv'], p['bqkv'].reshape(1, 3 * D),
      p['wo'], p['bo'].reshape(1, D),
      p['g'].reshape(1, D), p['b'].reshape(1, D))


def ffn_block(h, p, cfg):
    B, S, D = h.shape
    M = B * S
    F = p['w1'].shape[1]
    x = h.reshape(M, D)
    bm = _row_block(M)
    y = pl.pallas_call(
        functools.partial(_ffn_kernel, eps=cfg['eps']),
        out_shape=jax.ShapeDtypeStruct((M, D), jnp.float32),
        grid=(M // bm,),
        in_specs=[pl.BlockSpec((bm, D), lambda i: (i, 0)),
                  pl.BlockSpec((D, F), lambda i: (0, 0)),
                  pl.BlockSpec((1, F), lambda i: (0, 0)),
                  pl.BlockSpec((F, D), lambda i: (0, 0)),
                  pl.BlockSpec((1, D), lambda i: (0, 0)),
                  pl.BlockSpec((1, D), lambda i: (0, 0)),
                  pl.BlockSpec((1, D), lambda i: (0, 0))],
        out_specs=pl.BlockSpec((bm, D), lambda i: (i, 0)),
        compiler_params=_CPARAMS_1D,
    )(x, p['w1'], p['b1'].reshape(1, F), p['w2'], p['b2'].reshape(1, D),
      p['g'].reshape(1, D), p['b'].reshape(1, D))
    return y.reshape(B, S, D)


def lm_head(h, word_emb, p, cfg):
    B, S, D = h.shape
    V = cfg['vocab']
    M = B * S
    x = h.reshape(M, D)
    bm = _row_block(M)
    logits = pl.pallas_call(
        functools.partial(_lm_head_kernel, eps=cfg['eps']),
        out_shape=jax.ShapeDtypeStruct((M, V), jnp.float32),
        grid=(M // bm,),
        in_specs=[pl.BlockSpec((bm, D), lambda i: (i, 0)),
                  pl.BlockSpec((D, D), lambda i: (0, 0)),
                  pl.BlockSpec((1, D), lambda i: (0, 0)),
                  pl.BlockSpec((1, D), lambda i: (0, 0)),
                  pl.BlockSpec((1, D), lambda i: (0, 0)),
                  pl.BlockSpec((V, D), lambda i: (0, 0)),
                  pl.BlockSpec((1, V), lambda i: (0, 0))],
        out_specs=pl.BlockSpec((bm, V), lambda i: (i, 0)),
        compiler_params=_CPARAMS_1D,
    )(x, p['wd'], p['bd'].reshape(1, D), p['g'].reshape(1, D),
      p['b'].reshape(1, D), word_emb, p['bias'].reshape(1, V))
    return logits.reshape(B, S, V)


# --------------------------- parameter construction ---------------------------

def _init_w(key, fi, fo):
    # matmul weights stored bf16 (halves HBM/VMEM traffic, native MXU dtype)
    return (0.02 * jax.random.normal(key, (fi, fo), jnp.float32)).astype(jnp.bfloat16)


def _init_attn(key, D):
    kq, kk, kv, ko = jax.random.split(key, 4)
    wqkv = jnp.concatenate([_init_w(kq, D, D), _init_w(kk, D, D),
                            _init_w(kv, D, D)], axis=1)         # fused Q|K|V
    return {'wqkv': wqkv, 'bqkv': jnp.zeros((3 * D,), jnp.float32),
            'wo': _init_w(ko, D, D), 'bo': jnp.zeros((D,), jnp.float32),
            'g': jnp.ones((D,), jnp.float32), 'b': jnp.zeros((D,), jnp.float32)}


def _init_ffn(key, D, F):
    k1, k2 = jax.random.split(key)
    return {'w1': _init_w(k1, D, F), 'b1': jnp.zeros((F,), jnp.float32),
            'w2': _init_w(k2, F, D), 'b2': jnp.zeros((D,), jnp.float32),
            'g': jnp.ones((D,), jnp.float32), 'b': jnp.zeros((D,), jnp.float32)}


def _init_layer(key, cfg, cross):
    ks = jax.random.split(key, 3)
    p = {'self': _init_attn(ks[0], cfg['hidden']),
         'ffn': _init_ffn(ks[1], cfg['hidden'], cfg['inter'])}
    if cross:
        p['cross'] = _init_attn(ks[2], cfg['hidden'])
    return p


def _init_emb(key, cfg):
    k1, k2, k3 = jax.random.split(key, 3)
    D = cfg['hidden']
    return {'word': 0.02 * jax.random.normal(k1, (cfg['vocab'], D), jnp.float32),
            'pos': 0.02 * jax.random.normal(k2, (cfg['max_pos'], D), jnp.float32),
            'type': 0.02 * jax.random.normal(k3, (1, D), jnp.float32),
            'g': jnp.ones((D,), jnp.float32), 'b': jnp.zeros((D,), jnp.float32)}


def init_params(key, cfg):
    k_enc, k_dec, k_ee, k_de, k_lm = jax.random.split(key, 5)
    D = cfg['hidden']
    return {
        'enc': {'emb': _init_emb(k_ee, cfg),
                'layers': [_init_layer(k, cfg, False)
                           for k in jax.random.split(k_enc, cfg['enc_layers'])]},
        'dec': {'emb': _init_emb(k_de, cfg),
                'layers': [_init_layer(k, cfg, True)
                           for k in jax.random.split(k_dec, cfg['dec_layers'])],
                'lm_head': {'wd': _init_w(k_lm, D, D),
                            'bd': jnp.zeros((D,), jnp.float32),
                            'g': jnp.ones((D,), jnp.float32),
                            'b': jnp.zeros((D,), jnp.float32),
                            'bias': jnp.zeros((cfg['vocab'],), jnp.float32)}},
    }


# -------------------------------- model forward --------------------------------

def roberta_embeddings(emb, ids, cfg):
    pad = cfg['pad_id']
    mask = (ids != pad).astype(jnp.int32)
    pos_ids = jnp.cumsum(mask, axis=1) * mask + pad      # Roberta position ids
    # TODO(synk): gather left to XLA (data-dependent indexing)
    h = emb['word'][ids] + emb['pos'][pos_ids] + emb['type'][0]
    B, S, D = h.shape
    h = layernorm(h.reshape(B * S, D), emb['g'], emb['b'], cfg['eps'])
    return h.reshape(B, S, D)


def encoder_layer(p, h, cfg):
    h = attention_block(h, h, p['self'], cfg, causal=False, is_self=True)
    return ffn_block(h, p['ffn'], cfg)


def decoder_layer(p, h, enc_h, cfg):
    h = attention_block(h, h, p['self'], cfg, causal=True, is_self=True)
    h = attention_block(h, enc_h, p['cross'], cfg, causal=False, is_self=False)
    return ffn_block(h, p['ffn'], cfg)


def seq2seq_forward(params, input_ids, decoder_input_ids, cfg):
    # encoder (RobertaModel): last_hidden_state
    enc_h = roberta_embeddings(params['enc']['emb'], input_ids, cfg)
    for lp in params['enc']['layers']:
        enc_h = encoder_layer(lp, enc_h, cfg)

    # decoder (RobertaForCausalLM with cross-attention)
    dec_h = roberta_embeddings(params['dec']['emb'], decoder_input_ids, cfg)
    for lp in params['dec']['layers']:
        dec_h = decoder_layer(lp, dec_h, enc_h, cfg)

    # LM head -> logits (the CausalLMOutput of the PyTorch module)
    return lm_head(dec_h, params['dec']['emb']['word'],
                   params['dec']['lm_head'], cfg)


# -------------------------------------- main --------------------------------------

if __name__ == "__main__":
    # lane-dense small config: hidden/inter/vocab multiples of 128
    cfg = dict(vocab=256, hidden=128, heads=2, dh=64, inter=256,
               enc_layers=2, dec_layers=2, max_pos=64, pad_id=1, eps=1e-5)

    key = jax.random.PRNGKey(0)
    k_params, k_in, k_dec = jax.random.split(key, 3)
    params = init_params(k_params, cfg)

    B, Se, Sd = 2, 8, 8
    input_ids = jax.random.randint(k_in, (B, Se), 3, cfg['vocab'], dtype=jnp.int32)
    decoder_input_ids = jax.random.randint(k_dec, (B, Sd), 3, cfg['vocab'],
                                           dtype=jnp.int32)

    forward = jax.jit(lambda prm, a, b: seq2seq_forward(prm, a, b, cfg))
    logits = forward(params, input_ids, decoder_input_ids)
    logits = jax.block_until_ready(logits)

    assert logits.shape == (B, Sd, cfg['vocab']), logits.shape
    assert bool(jnp.all(jnp.isfinite(logits)))
    print("KERNEL_OK")
</pallas_src>

<mosaic_0001>
module attributes {stable_mosaic.version = 11 : i64} {
  func.func @_ln_kernel(%arg0: i32, %arg1: memref<8x128xf32, #tpu.memory_space<vmem>>, %arg2: memref<1x128xf32, #tpu.memory_space<vmem>>, %arg3: memref<1x128xf32, #tpu.memory_space<vmem>>, %arg4: memref<8x128xf32, #tpu.memory_space<vmem>>) attributes {dimension_semantics = [#tpu.dimension_semantics<parallel>], iteration_bounds = array<i64: 2>, scalar_prefetch = 0 : i64, scratch_operands = 0 : i64, tpu.core_type = #tpu.core_type<tc>, window_params = [{transform_indices = @transform_0, window_bounds = array<i64: 8, 128>}, {pipeline_mode = #tpu.pipeline_mode<synchronous>, transform_indices = @transform_1, window_bounds = array<i64: 1, 128>}, {pipeline_mode = #tpu.pipeline_mode<synchronous>, transform_indices = @transform_2, window_bounds = array<i64: 1, 128>}, {transform_indices = @transform_3, window_bounds = array<i64: 8, 128>}]} {
    %c0 = arith.constant 0 : index
    %c0_0 = arith.constant 0 : index
    %0 = vector.load %arg1[%c0, %c0_0] : memref<8x128xf32, #tpu.memory_space<vmem>>, vector<8x128xf32>
    %c0_1 = arith.constant 0 : index
    %c0_2 = arith.constant 0 : index
    %1 = vector.load %arg2[%c0_1, %c0_2] : memref<1x128xf32, #tpu.memory_space<vmem>>, vector<1x128xf32>
    %c0_3 = arith.constant 0 : index
    %c0_4 = arith.constant 0 : index
    %2 = vector.load %arg3[%c0_3, %c0_4] : memref<1x128xf32, #tpu.memory_space<vmem>>, vector<1x128xf32>
    %cst = arith.constant dense<0.000000e+00> : vector<8xf32>
    %3 = vector.multi_reduction <add>, %0, %cst [1] : vector<8x128xf32> to vector<8xf32>
    %4 = vector.shape_cast %3 : vector<8xf32> to vector<8x1xf32>
    %cst_5 = arith.constant 1.280000e+02 : f32
    %5 = vector.broadcast %cst_5 : f32 to vector<8x1xf32>
    %6 = arith.divf %4, %5 : vector<8x1xf32>
    %7 = vector.broadcast %6 : vector<8x1xf32> to vector<8x128xf32>
    %8 = arith.subf %0, %7 : vector<8x128xf32>
    %9 = arith.mulf %8, %8 : vector<8x128xf32>
    %cst_6 = arith.constant dense<0.000000e+00> : vector<8xf32>
    %10 = vector.multi_reduction <add>, %9, %cst_6 [1] : vector<8x128xf32> to vector<8xf32>
    %11 = vector.shape_cast %10 : vector<8xf32> to vector<8x1xf32>
    %cst_7 = arith.constant 1.280000e+02 : f32
    %12 = vector.broadcast %cst_7 : f32 to vector<8x1xf32>
    %13 = arith.divf %11, %12 : vector<8x1xf32>
    %14 = vector.broadcast %6 : vector<8x1xf32> to vector<8x128xf32>
    %15 = arith.subf %0, %14 : vector<8x128xf32>
    %cst_8 = arith.constant 9.99999974E-6 : f32
    %16 = vector.broadcast %cst_8 : f32 to vector<8x1xf32>
    %17 = arith.addf %13, %16 : vector<8x1xf32>
    %18 = math.rsqrt %17 : vector<8x1xf32>
    %19 = vector.broadcast %18 : vector<8x1xf32> to vector<8x128xf32>
    %20 = arith.mulf %15, %19 : vector<8x128xf32>
    %21 = vector.broadcast %1 : vector<1x128xf32> to vector<8x128xf32>
    %22 = arith.mulf %20, %21 : vector<8x128xf32>
    %23 = vector.broadcast %2 : vector<1x128xf32> to vector<8x128xf32>
    %24 = arith.addf %22, %23 : vector<8x128xf32>
    %c0_9 = arith.constant 0 : index
    %c0_10 = arith.constant 0 : index
    %25 = vector.load %arg4[%c0_9, %c0_10] : memref<8x128xf32, #tpu.memory_space<vmem>>, vector<8x128xf32>
    tpu.vector_store %arg4[%c0_9, %c0_10], %24 {strides = array<i32>} : memref<8x128xf32, #tpu.memory_space<vmem>>, vector<8x128xf32>,
    return
  }
  func.func @transform_0(%arg0: i32) -> (i32, i32) {
    %c0_i32 = arith.constant 0 : i32
    %c0_i32_0 = arith.constant 0 : i32
    return %arg0, %c0_i32 : i32, i32
  }
  func.func @transform_1(%arg0: i32) -> (i32, i32) {
    %c0_i32 = arith.constant 0 : i32
    %c0_i32_0 = arith.constant 0 : i32
    %c0_i32_1 = arith.constant 0 : i32
    return %c0_i32, %c0_i32_0 : i32, i32
  }
  func.func @transform_2(%arg0: i32) -> (i32, i32) {
    %c0_i32 = arith.constant 0 : i32
    %c0_i32_0 = arith.constant 0 : i32
    %c0_i32_1 = arith.constant 0 : i32
    return %c0_i32, %c0_i32_0 : i32, i32
  }
  func.func @transform_3(%arg0: i32) -> (i32, i32) {
    %c0_i32 = arith.constant 0 : i32
    %c0_i32_0 = arith.constant 0 : i32
    return %arg0, %c0_i32 : i32, i32
  }
}

module attributes {stable_mosaic.version = 11 : i64} {
  func.func @_attn_block_kernel(%arg0: i32, %arg1: memref<1x8x128xf32, #tpu.memory_space<vmem>>, %arg2: memref<1x8x128xf32, #tpu.memory_space<vmem>>, %arg3: memref<128x384xbf16, #tpu.memory_space<vmem>>, %arg4: memref<1x384xf32, #tpu.memory_space<vmem>>, %arg5: memref<128x128xbf16, #tpu.memory_space<vmem>>, %arg6: memref<1x128xf32, #tpu.memory_space<vmem>>, %arg7: memref<1x128xf32, #tpu.memory_space<vmem>>, %arg8: memref<1x128xf32, #tpu.memory_space<vmem>>, %arg9: memref<1x8x128xf32, #tpu.memory_space<vmem>>) attributes {dimension_semantics = [#tpu.dimension_semantics<parallel>], iteration_bounds = array<i64: 2>, scalar_prefetch = 0 : i64, scratch_operands = 0 : i64, tpu.core_type = #tpu.core_type<tc>, window_params = [{transform_indices = @transform_0, window_bounds = array<i64: 1, 8, 128>}, {transform_indices = @transform_1, window_bounds = array<i64: 1, 8, 128>}, {pipeline_mode = #tpu.pipeline_mode<synchronous>, transform_indices = @transform_2, window_bounds = array<i64: 128, 384>}, {pipeline_mode = #tpu.pipeline_mode<synchronous>, transform_indices = @transform_3, window_bounds = array<i64: 1, 384>}, {pipeline_mode = #tpu.pipeline_mode<synchronous>, transform_indices = @transform_4, window_bounds = array<i64: 128, 128>}, {pipeline_mode = #tpu.pipeline_mode<synchronous>, transform_indices = @transform_5, window_bounds = array<i64: 1, 128>}, {pipeline_mode = #tpu.pipeline_mode<synchronous>, transform_indices = @transform_6, window_bounds = array<i64: 1, 128>}, {pipeline_mode = #tpu.pipeline_mode<synchronous>, transform_indices = @transform_7, window_bounds = array<i64: 1, 128>}, {transform_indices = @transform_8, window_bounds = array<i64: 1, 8, 128>}]} {
    %c0 = arith.constant 0 : index
    %c0_0 = arith.constant 0 : index
    %c0_1 = arith.constant 0 : index
    %0 = vector.load %arg1[%c0, %c0_0, %c0_1] : memref<1x8x128xf32, #tpu.memory_space<vmem>>, vector<1x8x128xf32>
    %1 = vector.shape_cast %0 : vector<1x8x128xf32> to vector<8x128xf32>
    %2 = arith.truncf %1 : vector<8x128xf32> to vector<8x128xbf16>
    %c0_2 = arith.constant 0 : index
    %c0_3 = arith.constant 0 : index
    %3 = vector.load %arg3[%c0_2, %c0_3] : memref<128x384xbf16, #tpu.memory_space<vmem>>, vector<128x384xbf16>
    %cst = arith.constant dense<0.000000e+00> : vector<8x384xf32>
    %4 = tpu.matmul %2, %3, %cst {dimension_numbers = #tpu.dot_dimension_numbers<[1], [0], [0], [1], [0, 0, 1, 1], [], []>} : vector<8x128xbf16>, vector<128x384xbf16>, vector<8x384xf32> -> vector<8x384xf32>
    %c0_4 = arith.constant 0 : index
    %c0_5 = arith.constant 0 : index
    %5 = vector.load %arg4[%c0_4, %c0_5] : memref<1x384xf32, #tpu.memory_space<vmem>>, vector<1x384xf32>
    %6 = vector.broadcast %5 : vector<1x384xf32> to vector<8x384xf32>
    %7 = arith.addf %4, %6 : vector<8x384xf32>
    %8 = vector.extract_strided_slice %7 {offsets = [0, 0], sizes = [8, 128], strides = [1, 1]} : vector<8x384xf32> to vector<8x128xf32>
    %9 = vector.extract_strided_slice %7 {offsets = [0, 128], sizes = [8, 128], strides = [1, 1]} : vector<8x384xf32> to vector<8x128xf32>
    %10 = vector.extract_strided_slice %7 {offsets = [0, 256], sizes = [8, 128], strides = [1, 1]} : vector<8x384xf32> to vector<8x128xf32>
    %11 = vector.extract_strided_slice %8 {offsets = [0, 0], sizes = [8, 64], strides = [1, 1]} : vector<8x128xf32> to vector<8x64xf32>
    %12 = arith.truncf %11 : vector<8x64xf32> to vector<8x64xbf16>
    %13 = vector.extract_strided_slice %9 {offsets = [0, 0], sizes = [8, 64], strides = [1, 1]} : vector<8x128xf32> to vector<8x64xf32>
    %14 = arith.truncf %13 : vector<8x64xf32> to vector<8x64xbf16>
    %15 = vector.extract_strided_slice %10 {offsets = [0, 0], sizes = [8, 64], strides = [1, 1]} : vector<8x128xf32> to vector<8x64xf32>
    %16 = arith.truncf %15 : vector<8x64xf32> to vector<8x64xbf16>
    %cst_6 = arith.constant dense<0.000000e+00> : vector<8x8xf32>
    %17 = tpu.matmul %12, %14, %cst_6 {dimension_numbers = #tpu.dot_dimension_numbers<[1], [1], [0], [0], [0, 0, 1, 0], [], []>} : vector<8x64xbf16>, vector<8x64xbf16>, vector<8x8xf32> -> vector<8x8xf32>
    %cst_7 = arith.constant 1.250000e-01 : f32
    %18 = vector.broadcast %cst_7 : f32 to vector<8x8xf32>
    %19 = arith.mulf %17, %18 : vector<8x8xf32>
    %cst_8 = arith.constant dense<0xFF800000> : vector<8xf32>
    %20 = vector.multi_reduction <maximumf>, %19, %cst_8 [1] : vector<8x8xf32> to vector<8xf32>
    %21 = vector.shape_cast %20 : vector<8xf32> to vector<8x1xf32>
    %22 = vector.broadcast %21 : vector<8x1xf32> to vector<8x8xf32>
    %23 = arith.subf %19, %22 : vector<8x8xf32>
    %24 = math.exp %23 : vector<8x8xf32>
    %cst_9 = arith.constant dense<0.000000e+00> : vector<8xf32>
    %25 = vector.multi_reduction <add>, %24, %cst_9 [1] : vector<8x8xf32> to vector<8xf32>
    %26 = vector.shape_cast %25 : vector<8xf32> to vector<8x1xf32>
    %27 = tpu.reciprocal %26 {approx = true} : vector<8x1xf32> -> vector<8x1xf32>
    %28 = vector.broadcast %27 : vector<8x1xf32> to vector<8x8xf32>
    %29 = arith.mulf %24, %28 : vector<8x8xf32>
    %30 = arith.truncf %29 : vector<8x8xf32> to vector<8x8xbf16>
    %cst_10 = arith.constant dense<0.000000e+00> : vector<8x64xf32>
    %31 = tpu.matmul %30, %16, %cst_10 {dimension_numbers = #tpu.dot_dimension_numbers<[1], [0], [0], [1], [0, 0, 1, 1], [], []>} : vector<8x8xbf16>, vector<8x64xbf16>, vector<8x64xf32> -> vector<8x64xf32>
    %32 = vector.extract_strided_slice %8 {offsets = [0, 64], sizes = [8, 64], strides = [1, 1]} : vector<8x128xf32> to vector<8x64xf32>
    %33 = arith.truncf %32 : vector<8x64xf32> to vector<8x64xbf16>
    %34 = vector.extract_strided_slice %9 {offsets = [0, 64], sizes = [8, 64], strides = [1, 1]} : vector<8x128xf32> to vector<8x64xf32>
    %35 = arith.truncf %34 : vector<8x64xf32> to vector<8x64xbf16>
    %36 = vector.extract_strided_slice %10 {offsets = [0, 64], sizes = [8, 64], strides = [1, 1]} : vector<8x128xf32> to vector<8x64xf32>
    %37 = arith.truncf %36 : vector<8x64xf32> to vector<8x64xbf16>
    %cst_11 = arith.constant dense<0.000000e+00> : vector<8x8xf32>
    %38 = tpu.matmul %33, %35, %cst_11 {dimension_numbers = #tpu.dot_dimension_numbers<[1], [1], [0], [0], [0, 0, 1, 0], [], []>} : vector<8x64xbf16>, vector<8x64xbf16>, vector<8x8xf32> -> vector<8x8xf32>
    %cst_12 = arith.constant 1.250000e-01 : f32
    %39 = vector.broadcast %cst_12 : f32 to vector<8x8xf32>
    %40 = arith.mulf %38, %39 : vector<8x8xf32>
    %cst_13 = arith.constant dense<0xFF800000> : vector<8xf32>
    %41 = vector.multi_reduction <maximumf>, %40, %cst_13 [1] : vector<8x8xf32> to vector<8xf32>
    %42 = vector.shape_cast %41 : vector<8xf32> to vector<8x1xf32>
    %43 = vector.broadcast %42 : vector<8x1xf32> to vector<8x8xf32>
    %44 = arith.subf %40, %43 : vector<8x8xf32>
    %45 = math.exp %44 : vector<8x8xf32>
    %cst_14 = arith.constant dense<0.000000e+00> : vector<8xf32>
    %46 = vector.multi_reduction <add>, %45, %cst_14 [1] : vector<8x8xf32> to vector<8xf32>
    %47 = vector.shape_cast %46 : vector<8xf32> to vector<8x1xf32>
    %48 = tpu.reciprocal %47 {approx = true} : vector<8x1xf32> -> vector<8x1xf32>
    %49 = vector.broadcast %48 : vector<8x1xf32> to vector<8x8xf32>
    %50 = arith.mulf %45, %49 : vector<8x8xf32>
    %51 = arith.truncf %50 : vector<8x8xf32> to vector<8x8xbf16>
    %cst_15 = arith.constant dense<0.000000e+00> : vector<8x64xf32>
    %52 = tpu.matmul %51, %37, %cst_15 {dimension_numbers = #tpu.dot_dimension_numbers<[1], [0], [0], [1], [0, 0, 1, 1], [], []>} : vector<8x8xbf16>, vector<8x64xbf16>, vector<8x64xf32> -> vector<8x64xf32>
    %53 = tpu.concatenate %31, %52 in 1 : vector<8x64xf32>, vector<8x64xf32> -> vector<8x128xf32>
    %54 = arith.truncf %53 : vector<8x128xf32> to vector<8x128xbf16>
    %c0_16 = arith.constant 0 : index
    %c0_17 = arith.constant 0 : index
    %55 = vector.load %arg5[%c0_16, %c0_17] : memref<128x128xbf16, #tpu.memory_space<vmem>>, vector<128x128xbf16>
    %cst_18 = arith.constant dense<0.000000e+00> : vector<8x128xf32>
    %56 = tpu.matmul %54, %55, %cst_18 {dimension_numbers = #tpu.dot_dimension_numbers<[1], [0], [0], [1], [0, 0, 1, 1], [], []>} : vector<8x128xbf16>, vector<128x128xbf16>, vector<8x128xf32> -> vector<8x128xf32>
    %c0_19 = arith.constant 0 : index
    %c0_20 = arith.constant 0 : index
    %57 = vector.load %arg6[%c0_19, %c0_20] : memref<1x128xf32, #tpu.memory_space<vmem>>, vector<1x128xf32>
    %58 = vector.broadcast %57 : vector<1x128xf32> to vector<8x128xf32>
    %59 = arith.addf %56, %58 : vector<8x128xf32>
    %60 = arith.addf %59, %1 : vector<8x128xf32>
    %c0_21 = arith.constant 0 : index
    %c0_22 = arith.constant 0 : index
    %61 = vector.load %arg7[%c0_21, %c0_22] : memref<1x128xf32, #tpu.memory_space<vmem>>, vector<1x128xf32>
    %c0_23 = arith.constant 0 : index
    %c0_24 = arith.constant 0 : index
    %62 = vector.load %arg8[%c0_23, %c0_24] : memref<1x128xf32, #tpu.memory_space<vmem>>, vector<1x128xf32>
    %cst_25 = arith.constant dense<0.000000e+00> : vector<8xf32>
    %63 = vector.multi_reduction <add>, %60, %cst_25 [1] : vector<8x128xf32> to vector<8xf32>
    %64 = vector.shape_cast %63 : vector<8xf32> to vector<8x1xf32>
    %cst_26 = arith.constant 1.280000e+02 : f32
    %65 = vector.broadcast %cst_26 : f32 to vector<8x1xf32>
    %66 = arith.divf %64, %65 : vector<8x1xf32>
    %67 = vector.broadcast %66 : vector<8x1xf32> to vector<8x128xf32>
    %68 = arith.subf %60, %67 : vector<8x128xf32>
    %69 = arith.mulf %68, %68 : vector<8x128xf32>
    %cst_27 = arith.constant dense<0.000000e+00> : vector<8xf32>
    %70 = vector.multi_reduction <add>, %69, %cst_27 [1] : vector<8x128xf32> to vector<8xf32>
    %71 = vector.shape_cast %70 : vector<8xf32> to vector<8x1xf32>
    %cst_28 = arith.constant 1.280000e+02 : f32
    %72 = vector.broadcast %cst_28 : f32 to vector<8x1xf32>
    %73 = arith.divf %71, %72 : vector<8x1xf32>
    %74 = vector.broadcast %66 : vector<8x1xf32> to vector<8x128xf32>
    %75 = arith.subf %60, %74 : vector<8x128xf32>
    %cst_29 = arith.constant 9.99999974E-6 : f32
    %76 = vector.broadcast %cst_29 : f32 to vector<8x1xf32>
    %77 = arith.addf %73, %76 : vector<8x1xf32>
    %78 = math.rsqrt %77 : vector<8x1xf32>
    %79 = vector.broadcast %78 : vector<8x1xf32> to vector<8x128xf32>
    %80 = arith.mulf %75, %79 : vector<8x128xf32>
    %81 = vector.broadcast %61 : vector<1x128xf32> to vector<8x128xf32>
    %82 = arith.mulf %80, %81 : vector<8x128xf32>
    %83 = vector.broadcast %62 : vector<1x128xf32> to vector<8x128xf32>
    %84 = arith.addf %82, %83 : vector<8x128xf32>
    %c0_30 = arith.constant 0 : index
    %c0_31 = arith.constant 0 : index
    %c0_32 = arith.constant 0 : index
    %85 = vector.load %arg9[%c0_30, %c0_31, %c0_32] : memref<1x8x128xf32, #tpu.memory_space<vmem>>, vector<1x8x128xf32>
    %86 = vector.shape_cast %85 : vector<1x8x128xf32> to vector<8x128xf32>
    %87 = vector.shape_cast %84 : vector<8x128xf32> to vector<1x8x128xf32>
    tpu.vector_store %arg9[%c0_30, %c0_31, %c0_32], %87 {strides = array<i32>} : memref<1x8x128xf32, #tpu.memory_space<vmem>>, vector<1x8x128xf32>,
    return
  }
  func.func @transform_0(%arg0: i32) -> (i32, i32, i32) {
    %c0_i32 = arith.constant 0 : i32
    %c0_i32_0 = arith.constant 0 : i32
    %c0_i32_1 = arith.constant 0 : i32
    return %arg0, %c0_i32, %c0_i32_0 : i32, i32, i32
  }
  func.func @transform_1(%arg0: i32) -> (i32, i32, i32) {
    %c0_i32 = arith.constant 0 : i32
    %c0_i32_0 = arith.constant 0 : i32
    %c0_i32_1 = arith.constant 0 : i32
    return %arg0, %c0_i32, %c0_i32_0 : i32, i32, i32
  }
  func.func @transform_2(%arg0: i32) -> (i32, i32) {
    %c0_i32 = arith.constant 0 : i32
    %c0_i32_0 = arith.constant 0 : i32
    %c0_i32_1 = arith.constant 0 : i32
    return %c0_i32, %c0_i32_0 : i32, i32
  }
  func.func @transform_3(%arg0: i32) -> (i32, i32) {
    %c0_i32 = arith.constant 0 : i32
    %c0_i32_0 = arith.constant 0 : i32
    %c0_i32_1 = arith.constant 0 : i32
    return %c0_i32, %c0_i32_0 : i32, i32
  }
  func.func @transform_4(%arg0: i32) -> (i32, i32) {
    %c0_i32 = arith.constant 0 : i32
    %c0_i32_0 = arith.constant 0 : i32
    %c0_i32_1 = arith.constant 0 : i32
    return %c0_i32, %c0_i32_0 : i32, i32
  }
  func.func @transform_5(%arg0: i32) -> (i32, i32) {
    %c0_i32 = arith.constant 0 : i32
    %c0_i32_0 = arith.constant 0 : i32
    %c0_i32_1 = arith.constant 0 : i32
    return %c0_i32, %c0_i32_0 : i32, i32
  }
  func.func @transform_6(%arg0: i32) -> (i32, i32) {
    %c0_i32 = arith.constant 0 : i32
    %c0_i32_0 = arith.constant 0 : i32
    %c0_i32_1 = arith.constant 0 : i32
    return %c0_i32, %c0_i32_0 : i32, i32
  }
  func.func @transform_7(%arg0: i32) -> (i32, i32) {
    %c0_i32 = arith.constant 0 : i32
    %c0_i32_0 = arith.constant 0 : i32
    %c0_i32_1 = arith.constant 0 : i32
    return %c0_i32, %c0_i32_0 : i32, i32
  }
  func.func @transform_8(%arg0: i32) -> (i32, i32, i32) {
    %c0_i32 = arith.constant 0 : i32
    %c0_i32_0 = arith.constant 0 : i32
    %c0_i32_1 = arith.constant 0 : i32
    return %arg0, %c0_i32, %c0_i32_0 : i32, i32, i32
  }
}

module attributes {stable_mosaic.version = 11 : i64} {
  func.func @_ffn_kernel(%arg0: i32, %arg1: memref<8x128xf32, #tpu.memory_space<vmem>>, %arg2: memref<128x256xbf16, #tpu.memory_space<vmem>>, %arg3: memref<1x256xf32, #tpu.memory_space<vmem>>, %arg4: memref<256x128xbf16, #tpu.memory_space<vmem>>, %arg5: memref<1x128xf32, #tpu.memory_space<vmem>>, %arg6: memref<1x128xf32, #tpu.memory_space<vmem>>, %arg7: memref<1x128xf32, #tpu.memory_space<vmem>>, %arg8: memref<8x128xf32, #tpu.memory_space<vmem>>) attributes {dimension_semantics = [#tpu.dimension_semantics<parallel>], iteration_bounds = array<i64: 2>, scalar_prefetch = 0 : i64, scratch_operands = 0 : i64, tpu.core_type = #tpu.core_type<tc>, window_params = [{transform_indices = @transform_0, window_bounds = array<i64: 8, 128>}, {pipeline_mode = #tpu.pipeline_mode<synchronous>, transform_indices = @transform_1, window_bounds = array<i64: 128, 256>}, {pipeline_mode = #tpu.pipeline_mode<synchronous>, transform_indices = @transform_2, window_bounds = array<i64: 1, 256>}, {pipeline_mode = #tpu.pipeline_mode<synchronous>, transform_indices = @transform_3, window_bounds = array<i64: 256, 128>}, {pipeline_mode = #tpu.pipeline_mode<synchronous>, transform_indices = @transform_4, window_bounds = array<i64: 1, 128>}, {pipeline_mode = #tpu.pipeline_mode<synchronous>, transform_indices = @transform_5, window_bounds = array<i64: 1, 128>}, {pipeline_mode = #tpu.pipeline_mode<synchronous>, transform_indices = @transform_6, window_bounds = array<i64: 1, 128>}, {transform_indices = @transform_7, window_bounds = array<i64: 8, 128>}]} {
    %c0 = arith.constant 0 : index
    %c0_0 = arith.constant 0 : index
    %0 = vector.load %arg1[%c0, %c0_0] : memref<8x128xf32, #tpu.memory_space<vmem>>, vector<8x128xf32>
    %1 = arith.truncf %0 : vector<8x128xf32> to vector<8x128xbf16>
    %c0_1 = arith.constant 0 : index
    %c0_2 = arith.constant 0 : index
    %2 = vector.load %arg2[%c0_1, %c0_2] : memref<128x256xbf16, #tpu.memory_space<vmem>>, vector<128x256xbf16>
    %cst = arith.constant dense<0.000000e+00> : vector<8x256xf32>
    %3 = tpu.matmul %1, %2, %cst {dimension_numbers = #tpu.dot_dimension_numbers<[1], [0], [0], [1], [0, 0, 1, 1], [], []>} : vector<8x128xbf16>, vector<128x256xbf16>, vector<8x256xf32> -> vector<8x256xf32>
    %c0_3 = arith.constant 0 : index
    %c0_4 = arith.constant 0 : index
    %4 = vector.load %arg3[%c0_3, %c0_4] : memref<1x256xf32, #tpu.memory_space<vmem>>, vector<1x256xf32>
    %5 = vector.broadcast %4 : vector<1x256xf32> to vector<8x256xf32>
    %6 = arith.addf %3, %5 : vector<8x256xf32>
    %cst_5 = arith.constant 5.000000e-01 : f32
    %7 = vector.broadcast %cst_5 : f32 to vector<8x256xf32>
    %8 = arith.mulf %7, %6 : vector<8x256xf32>
    %cst_6 = arith.constant 0.707106769 : f32
    %9 = vector.broadcast %cst_6 : f32 to vector<8x256xf32>
    %10 = arith.mulf %6, %9 : vector<8x256xf32>
    %cst_7 = arith.constant 0.000000e+00 : f32
    %11 = vector.broadcast %cst_7 : f32 to vector<8x256xf32>
    %12 = arith.cmpf oge, %10, %11 : vector<8x256xf32>
    %cst_8 = arith.constant 1.000000e+00 : f32
    %cst_9 = arith.constant -1.000000e+00 : f32
    %13 = vector.broadcast %cst_8 : f32 to vector<8x256xf32>
    %14 = vector.broadcast %cst_9 : f32 to vector<8x256xf32>
    %15 = arith.select %12, %13, %14 : vector<8x256xi1>, vector<8x256xf32>
    %16 = arith.mulf %10, %15 : vector<8x256xf32>
    %cst_10 = arith.constant 0.327591091 : f32
    %17 = vector.broadcast %cst_10 : f32 to vector<8x256xf32>
    %18 = arith.mulf %17, %16 : vector<8x256xf32>
    %cst_11 = arith.constant 1.000000e+00 : f32
    %19 = vector.broadcast %cst_11 : f32 to vector<8x256xf32>
    %20 = arith.addf %19, %18 : vector<8x256xf32>
    %cst_12 = arith.constant 1.000000e+00 : f32
    %21 = vector.broadcast %cst_12 : f32 to vector<8x256xf32>
    %22 = arith.divf %21, %20 : vector<8x256xf32>
    %cst_13 = arith.constant 1.06140542 : f32
    %23 = vector.broadcast %cst_13 : f32 to vector<8x256xf32>
    %24 = arith.mulf %23, %22 : vector<8x256xf32>
    %cst_14 = arith.constant -1.45315206 : f32
    %25 = vector.broadcast %cst_14 : f32 to vector<8x256xf32>
    %26 = arith.addf %24, %25 : vector<8x256xf32>
    %27 = arith.mulf %26, %22 : vector<8x256xf32>
    %cst_15 = arith.constant 1.42141378 : f32
    %28 = vector.broadcast %cst_15 : f32 to vector<8x256xf32>
    %29 = arith.addf %27, %28 : vector<8x256xf32>
    %30 = arith.mulf %29, %22 : vector<8x256xf32>
    %cst_16 = arith.constant -0.284496725 : f32
    %31 = vector.broadcast %cst_16 : f32 to vector<8x256xf32>
    %32 = arith.addf %30, %31 : vector<8x256xf32>
    %33 = arith.mulf %32, %22 : vector<8x256xf32>
    %cst_17 = arith.constant 0.254829586 : f32
    %34 = vector.broadcast %cst_17 : f32 to vector<8x256xf32>
    %35 = arith.addf %33, %34 : vector<8x256xf32>
    %36 = arith.mulf %35, %22 : vector<8x256xf32>
    %cst_18 = arith.constant 0.000000e+00 : f32
    %37 = vector.broadcast %cst_18 : f32 to vector<8x256xf32>
    %38 = arith.subf %37, %16 : vector<8x256xf32>
    %39 = arith.mulf %38, %16 : vector<8x256xf32>
    %40 = math.exp %39 : vector<8x256xf32>
    %41 = arith.mulf %36, %40 : vector<8x256xf32>
    %cst_19 = arith.constant 1.000000e+00 : f32
    %42 = vector.broadcast %cst_19 : f32 to vector<8x256xf32>
    %43 = arith.subf %42, %41 : vector<8x256xf32>
    %44 = arith.mulf %15, %43 : vector<8x256xf32>
    %cst_20 = arith.constant 1.000000e+00 : f32
    %45 = vector.broadcast %cst_20 : f32 to vector<8x256xf32>
    %46 = arith.addf %45, %44 : vector<8x256xf32>
    %47 = arith.mulf %8, %46 : vector<8x256xf32>
    %48 = arith.truncf %47 : vector<8x256xf32> to vector<8x256xbf16>
    %c0_21 = arith.constant 0 : index
    %c0_22 = arith.constant 0 : index
    %49 = vector.load %arg4[%c0_21, %c0_22] : memref<256x128xbf16, #tpu.memory_space<vmem>>, vector<256x128xbf16>
    %cst_23 = arith.constant dense<0.000000e+00> : vector<8x128xf32>
    %50 = tpu.matmul %48, %49, %cst_23 {dimension_numbers = #tpu.dot_dimension_numbers<[1], [0], [0], [1], [0, 0, 1, 1], [], []>} : vector<8x256xbf16>, vector<256x128xbf16>, vector<8x128xf32> -> vector<8x128xf32>
    %c0_24 = arith.constant 0 : index
    %c0_25 = arith.constant 0 : index
    %51 = vector.load %arg5[%c0_24, %c0_25] : memref<1x128xf32, #tpu.memory_space<vmem>>, vector<1x128xf32>
    %52 = vector.broadcast %51 : vector<1x128xf32> to vector<8x128xf32>
    %53 = arith.addf %50, %52 : vector<8x128xf32>
    %54 = arith.addf %53, %0 : vector<8x128xf32>
    %c0_26 = arith.constant 0 : index
    %c0_27 = arith.constant 0 : index
    %55 = vector.load %arg6[%c0_26, %c0_27] : memref<1x128xf32, #tpu.memory_space<vmem>>, vector<1x128xf32>
    %c0_28 = arith.constant 0 : index
    %c0_29 = arith.constant 0 : index
    %56 = vector.load %arg7[%c0_28, %c0_29] : memref<1x128xf32, #tpu.memory_space<vmem>>, vector<1x128xf32>
    %cst_30 = arith.constant dense<0.000000e+00> : vector<8xf32>
    %57 = vector.multi_reduction <add>, %54, %cst_30 [1] : vector<8x128xf32> to vector<8xf32>
    %58 = vector.shape_cast %57 : vector<8xf32> to vector<8x1xf32>
    %cst_31 = arith.constant 1.280000e+02 : f32
    %59 = vector.broadcast %cst_31 : f32 to vector<8x1xf32>
    %60 = arith.divf %58, %59 : vector<8x1xf32>
    %61 = vector.broadcast %60 : vector<8x1xf32> to vector<8x128xf32>
    %62 = arith.subf %54, %61 : vector<8x128xf32>
    %63 = arith.mulf %62, %62 : vector<8x128xf32>
    %cst_32 = arith.constant dense<0.000000e+00> : vector<8xf32>
    %64 = vector.multi_reduction <add>, %63, %cst_32 [1] : vector<8x128xf32> to vector<8xf32>
    %65 = vector.shape_cast %64 : vector<8xf32> to vector<8x1xf32>
    %cst_33 = arith.constant 1.280000e+02 : f32
    %66 = vector.broadcast %cst_33 : f32 to vector<8x1xf32>
    %67 = arith.divf %65, %66 : vector<8x1xf32>
    %68 = vector.broadcast %60 : vector<8x1xf32> to vector<8x128xf32>
    %69 = arith.subf %54, %68 : vector<8x128xf32>
    %cst_34 = arith.constant 9.99999974E-6 : f32
    %70 = vector.broadcast %cst_34 : f32 to vector<8x1xf32>
    %71 = arith.addf %67, %70 : vector<8x1xf32>
    %72 = math.rsqrt %71 : vector<8x1xf32>
    %73 = vector.broadcast %72 : vector<8x1xf32> to vector<8x128xf32>
    %74 = arith.mulf %69, %73 : vector<8x128xf32>
    %75 = vector.broadcast %55 : vector<1x128xf32> to vector<8x128xf32>
    %76 = arith.mulf %74, %75 : vector<8x128xf32>
    %77 = vector.broadcast %56 : vector<1x128xf32> to vector<8x128xf32>
    %78 = arith.addf %76, %77 : vector<8x128xf32>
    %c0_35 = arith.constant 0 : index
    %c0_36 = arith.constant 0 : index
    %79 = vector.load %arg8[%c0_35, %c0_36] : memref<8x128xf32, #tpu.memory_space<vmem>>, vector<8x128xf32>
    tpu.vector_store %arg8[%c0_35, %c0_36], %78 {strides = array<i32>} : memref<8x128xf32, #tpu.memory_space<vmem>>, vector<8x128xf32>,
    return
  }
  func.func @transform_0(%arg0: i32) -> (i32, i32) {
    %c0_i32 = arith.constant 0 : i32
    %c0_i32_0 = arith.constant 0 : i32
    return %arg0, %c0_i32 : i32, i32
  }
  func.func @transform_1(%arg0: i32) -> (i32, i32) {
    %c0_i32 = arith.constant 0 : i32
    %c0_i32_0 = arith.constant 0 : i32
    %c0_i32_1 = arith.constant 0 : i32
    return %c0_i32, %c0_i32_0 : i32, i32
  }
  func.func @transform_2(%arg0: i32) -> (i32, i32) {
    %c0_i32 = arith.constant 0 : i32
    %c0_i32_0 = arith.constant 0 : i32
    %c0_i32_1 = arith.constant 0 : i32
    return %c0_i32, %c0_i32_0 : i32, i32
  }
  func.func @transform_3(%arg0: i32) -> (i32, i32) {
    %c0_i32 = arith.constant 0 : i32
    %c0_i32_0 = arith.constant 0 : i32
    %c0_i32_1 = arith.constant 0 : i32
    return %c0_i32, %c0_i32_0 : i32, i32
  }
  func.func @transform_4(%arg0: i32) -> (i32, i32) {
    %c0_i32 = arith.constant 0 : i32
    %c0_i32_0 = arith.constant 0 : i32
    %c0_i32_1 = arith.constant 0 : i32
    return %c0_i32, %c0_i32_0 : i32, i32
  }
  func.func @transform_5(%arg0: i32) -> (i32, i32) {
    %c0_i32 = arith.constant 0 : i32
    %c0_i32_0 = arith.constant 0 : i32
    %c0_i32_1 = arith.constant 0 : i32
    return %c0_i32, %c0_i32_0 : i32, i32
  }
  func.func @transform_6(%arg0: i32) -> (i32, i32) {
    %c0_i32 = arith.constant 0 : i32
    %c0_i32_0 = arith.constant 0 : i32
    %c0_i32_1 = arith.constant 0 : i32
    return %c0_i32, %c0_i32_0 : i32, i32
  }
  func.func @transform_7(%arg0: i32) -> (i32, i32) {
    %c0_i32 = arith.constant 0 : i32
    %c0_i32_0 = arith.constant 0 : i32
    return %arg0, %c0_i32 : i32, i32
  }
}

module attributes {stable_mosaic.version = 11 : i64} {
  func.func @_attn_block_kernel(%arg0: i32, %arg1: memref<1x8x128xf32, #tpu.memory_space<vmem>>, %arg2: memref<1x8x128xf32, #tpu.memory_space<vmem>>, %arg3: memref<128x384xbf16, #tpu.memory_space<vmem>>, %arg4: memref<1x384xf32, #tpu.memory_space<vmem>>, %arg5: memref<128x128xbf16, #tpu.memory_space<vmem>>, %arg6: memref<1x128xf32, #tpu.memory_space<vmem>>, %arg7: memref<1x128xf32, #tpu.memory_space<vmem>>, %arg8: memref<1x128xf32, #tpu.memory_space<vmem>>, %arg9: memref<1x8x128xf32, #tpu.memory_space<vmem>>) attributes {dimension_semantics = [#tpu.dimension_semantics<parallel>], iteration_bounds = array<i64: 2>, scalar_prefetch = 0 : i64, scratch_operands = 0 : i64, tpu.core_type = #tpu.core_type<tc>, window_params = [{transform_indices = @transform_0, window_bounds = array<i64: 1, 8, 128>}, {transform_indices = @transform_1, window_bounds = array<i64: 1, 8, 128>}, {pipeline_mode = #tpu.pipeline_mode<synchronous>, transform_indices = @transform_2, window_bounds = array<i64: 128, 384>}, {pipeline_mode = #tpu.pipeline_mode<synchronous>, transform_indices = @transform_3, window_bounds = array<i64: 1, 384>}, {pipeline_mode = #tpu.pipeline_mode<synchronous>, transform_indices = @transform_4, window_bounds = array<i64: 128, 128>}, {pipeline_mode = #tpu.pipeline_mode<synchronous>, transform_indices = @transform_5, window_bounds = array<i64: 1, 128>}, {pipeline_mode = #tpu.pipeline_mode<synchronous>, transform_indices = @transform_6, window_bounds = array<i64: 1, 128>}, {pipeline_mode = #tpu.pipeline_mode<synchronous>, transform_indices = @transform_7, window_bounds = array<i64: 1, 128>}, {transform_indices = @transform_8, window_bounds = array<i64: 1, 8, 128>}]} {
    %c0 = arith.constant 0 : index
    %c0_0 = arith.constant 0 : index
    %c0_1 = arith.constant 0 : index
    %0 = vector.load %arg1[%c0, %c0_0, %c0_1] : memref<1x8x128xf32, #tpu.memory_space<vmem>>, vector<1x8x128xf32>
    %1 = vector.shape_cast %0 : vector<1x8x128xf32> to vector<8x128xf32>
    %2 = arith.truncf %1 : vector<8x128xf32> to vector<8x128xbf16>
    %c0_2 = arith.constant 0 : index
    %c0_3 = arith.constant 0 : index
    %3 = vector.load %arg3[%c0_2, %c0_3] : memref<128x384xbf16, #tpu.memory_space<vmem>>, vector<128x384xbf16>
    %cst = arith.constant dense<0.000000e+00> : vector<8x384xf32>
    %4 = tpu.matmul %2, %3, %cst {dimension_numbers = #tpu.dot_dimension_numbers<[1], [0], [0], [1], [0, 0, 1, 1], [], []>} : vector<8x128xbf16>, vector<128x384xbf16>, vector<8x384xf32> -> vector<8x384xf32>
    %c0_4 = arith.constant 0 : index
    %c0_5 = arith.constant 0 : index
    %5 = vector.load %arg4[%c0_4, %c0_5] : memref<1x384xf32, #tpu.memory_space<vmem>>, vector<1x384xf32>
    %6 = vector.broadcast %5 : vector<1x384xf32> to vector<8x384xf32>
    %7 = arith.addf %4, %6 : vector<8x384xf32>
    %8 = vector.extract_strided_slice %7 {offsets = [0, 0], sizes = [8, 128], strides = [1, 1]} : vector<8x384xf32> to vector<8x128xf32>
    %9 = vector.extract_strided_slice %7 {offsets = [0, 128], sizes = [8, 128], strides = [1, 1]} : vector<8x384xf32> to vector<8x128xf32>
    %10 = vector.extract_strided_slice %7 {offsets = [0, 256], sizes = [8, 128], strides = [1, 1]} : vector<8x384xf32> to vector<8x128xf32>
    %11 = tpu.iota {dimensions = array<i32: 0>} : vector<8x8xi32>
    %12 = tpu.iota {dimensions = array<i32: 1>} : vector<8x8xi32>
    %13 = arith.cmpi sle, %12, %11 : vector<8x8xi32>
    %14 = vector.extract_strided_slice %8 {offsets = [0, 0], sizes = [8, 64], strides = [1, 1]} : vector<8x128xf32> to vector<8x64xf32>
    %15 = arith.truncf %14 : vector<8x64xf32> to vector<8x64xbf16>
    %16 = vector.extract_strided_slice %9 {offsets = [0, 0], sizes = [8, 64], strides = [1, 1]} : vector<8x128xf32> to vector<8x64xf32>
    %17 = arith.truncf %16 : vector<8x64xf32> to vector<8x64xbf16>
    %18 = vector.extract_strided_slice %10 {offsets = [0, 0], sizes = [8, 64], strides = [1, 1]} : vector<8x128xf32> to vector<8x64xf32>
    %19 = arith.truncf %18 : vector<8x64xf32> to vector<8x64xbf16>
    %cst_6 = arith.constant dense<0.000000e+00> : vector<8x8xf32>
    %20 = tpu.matmul %15, %17, %cst_6 {dimension_numbers = #tpu.dot_dimension_numbers<[1], [1], [0], [0], [0, 0, 1, 0], [], []>} : vector<8x64xbf16>, vector<8x64xbf16>, vector<8x8xf32> -> vector<8x8xf32>
    %cst_7 = arith.constant 1.250000e-01 : f32
    %21 = vector.broadcast %cst_7 : f32 to vector<8x8xf32>
    %22 = arith.mulf %20, %21 : vector<8x8xf32>
    %cst_8 = arith.constant -1.000000e+30 : f32
    %23 = vector.broadcast %cst_8 : f32 to vector<8x8xf32>
    %24 = arith.select %13, %22, %23 : vector<8x8xi1>, vector<8x8xf32>
    %cst_9 = arith.constant dense<0xFF800000> : vector<8xf32>
    %25 = vector.multi_reduction <maximumf>, %24, %cst_9 [1] : vector<8x8xf32> to vector<8xf32>
    %26 = vector.shape_cast %25 : vector<8xf32> to vector<8x1xf32>
    %27 = vector.broadcast %26 : vector<8x1xf32> to vector<8x8xf32>
    %28 = arith.subf %24, %27 : vector<8x8xf32>
    %29 = math.exp %28 : vector<8x8xf32>
    %cst_10 = arith.constant dense<0.000000e+00> : vector<8xf32>
    %30 = vector.multi_reduction <add>, %29, %cst_10 [1] : vector<8x8xf32> to vector<8xf32>
    %31 = vector.shape_cast %30 : vector<8xf32> to vector<8x1xf32>
    %32 = tpu.reciprocal %31 {approx = true} : vector<8x1xf32> -> vector<8x1xf32>
    %33 = vector.broadcast %32 : vector<8x1xf32> to vector<8x8xf32>
    %34 = arith.mulf %29, %33 : vector<8x8xf32>
    %35 = arith.truncf %34 : vector<8x8xf32> to vector<8x8xbf16>
    %cst_11 = arith.constant dense<0.000000e+00> : vector<8x64xf32>
    %36 = tpu.matmul %35, %19, %cst_11 {dimension_numbers = #tpu.dot_dimension_numbers<[1], [0], [0], [1], [0, 0, 1, 1], [], []>} : vector<8x8xbf16>, vector<8x64xbf16>, vector<8x64xf32> -> vector<8x64xf32>
    %37 = vector.extract_strided_slice %8 {offsets = [0, 64], sizes = [8, 64], strides = [1, 1]} : vector<8x128xf32> to vector<8x64xf32>
    %38 = arith.truncf %37 : vector<8x64xf32> to vector<8x64xbf16>
    %39 = vector.extract_strided_slice %9 {offsets = [0, 64], sizes = [8, 64], strides = [1, 1]} : vector<8x128xf32> to vector<8x64xf32>
    %40 = arith.truncf %39 : vector<8x64xf32> to vector<8x64xbf16>
    %41 = vector.extract_strided_slice %10 {offsets = [0, 64], sizes = [8, 64], strides = [1, 1]} : vector<8x128xf32> to vector<8x64xf32>
    %42 = arith.truncf %41 : vector<8x64xf32> to vector<8x64xbf16>
    %cst_12 = arith.constant dense<0.000000e+00> : vector<8x8xf32>
    %43 = tpu.matmul %38, %40, %cst_12 {dimension_numbers = #tpu.dot_dimension_numbers<[1], [1], [0], [0], [0, 0, 1, 0], [], []>} : vector<8x64xbf16>, vector<8x64xbf16>, vector<8x8xf32> -> vector<8x8xf32>
    %cst_13 = arith.constant 1.250000e-01 : f32
    %44 = vector.broadcast %cst_13 : f32 to vector<8x8xf32>
    %45 = arith.mulf %43, %44 : vector<8x8xf32>
    %cst_14 = arith.constant -1.000000e+30 : f32
    %46 = vector.broadcast %cst_14 : f32 to vector<8x8xf32>
    %47 = arith.select %13, %45, %46 : vector<8x8xi1>, vector<8x8xf32>
    %cst_15 = arith.constant dense<0xFF800000> : vector<8xf32>
    %48 = vector.multi_reduction <maximumf>, %47, %cst_15 [1] : vector<8x8xf32> to vector<8xf32>
    %49 = vector.shape_cast %48 : vector<8xf32> to vector<8x1xf32>
    %50 = vector.broadcast %49 : vector<8x1xf32> to vector<8x8xf32>
    %51 = arith.subf %47, %50 : vector<8x8xf32>
    %52 = math.exp %51 : vector<8x8xf32>
    %cst_16 = arith.constant dense<0.000000e+00> : vector<8xf32>
    %53 = vector.multi_reduction <add>, %52, %cst_16 [1] : vector<8x8xf32> to vector<8xf32>
    %54 = vector.shape_cast %53 : vector<8xf32> to vector<8x1xf32>
    %55 = tpu.reciprocal %54 {approx = true} : vector<8x1xf32> -> vector<8x1xf32>
    %56 = vector.broadcast %55 : vector<8x1xf32> to vector<8x8xf32>
    %57 = arith.mulf %52, %56 : vector<8x8xf32>
    %58 = arith.truncf %57 : vector<8x8xf32> to vector<8x8xbf16>
    %cst_17 = arith.constant dense<0.000000e+00> : vector<8x64xf32>
    %59 = tpu.matmul %58, %42, %cst_17 {dimension_numbers = #tpu.dot_dimension_numbers<[1], [0], [0], [1], [0, 0, 1, 1], [], []>} : vector<8x8xbf16>, vector<8x64xbf16>, vector<8x64xf32> -> vector<8x64xf32>
    %60 = tpu.concatenate %36, %59 in 1 : vector<8x64xf32>, vector<8x64xf32> -> vector<8x128xf32>
    %61 = arith.truncf %60 : vector<8x128xf32> to vector<8x128xbf16>
    %c0_18 = arith.constant 0 : index
    %c0_19 = arith.constant 0 : index
    %62 = vector.load %arg5[%c0_18, %c0_19] : memref<128x128xbf16, #tpu.memory_space<vmem>>, vector<128x128xbf16>
    %cst_20 = arith.constant dense<0.000000e+00> : vector<8x128xf32>
    %63 = tpu.matmul %61, %62, %cst_20 {dimension_numbers = #tpu.dot_dimension_numbers<[1], [0], [0], [1], [0, 0, 1, 1], [], []>} : vector<8x128xbf16>, vector<128x128xbf16>, vector<8x128xf32> -> vector<8x128xf32>
    %c0_21 = arith.constant 0 : index
    %c0_22 = arith.constant 0 : index
    %64 = vector.load %arg6[%c0_21, %c0_22] : memref<1x128xf32, #tpu.memory_space<vmem>>, vector<1x128xf32>
    %65 = vector.broadcast %64 : vector<1x128xf32> to vector<8x128xf32>
    %66 = arith.addf %63, %65 : vector<8x128xf32>
    %67 = arith.addf %66, %1 : vector<8x128xf32>
    %c0_23 = arith.constant 0 : index
    %c0_24 = arith.constant 0 : index
    %68 = vector.load %arg7[%c0_23, %c0_24] : memref<1x128xf32, #tpu.memory_space<vmem>>, vector<1x128xf32>
    %c0_25 = arith.constant 0 : index
    %c0_26 = arith.constant 0 : index
    %69 = vector.load %arg8[%c0_25, %c0_26] : memref<1x128xf32, #tpu.memory_space<vmem>>, vector<1x128xf32>
    %cst_27 = arith.constant dense<0.000000e+00> : vector<8xf32>
    %70 = vector.multi_reduction <add>, %67, %cst_27 [1] : vector<8x128xf32> to vector<8xf32>
    %71 = vector.shape_cast %70 : vector<8xf32> to vector<8x1xf32>
    %cst_28 = arith.constant 1.280000e+02 : f32
    %72 = vector.broadcast %cst_28 : f32 to vector<8x1xf32>
    %73 = arith.divf %71, %72 : vector<8x1xf32>
    %74 = vector.broadcast %73 : vector<8x1xf32> to vector<8x128xf32>
    %75 = arith.subf %67, %74 : vector<8x128xf32>
    %76 = arith.mulf %75, %75 : vector<8x128xf32>
    %cst_29 = arith.constant dense<0.000000e+00> : vector<8xf32>
    %77 = vector.multi_reduction <add>, %76, %cst_29 [1] : vector<8x128xf32> to vector<8xf32>
    %78 = vector.shape_cast %77 : vector<8xf32> to vector<8x1xf32>
    %cst_30 = arith.constant 1.280000e+02 : f32
    %79 = vector.broadcast %cst_30 : f32 to vector<8x1xf32>
    %80 = arith.divf %78, %79 : vector<8x1xf32>
    %81 = vector.broadcast %73 : vector<8x1xf32> to vector<8x128xf32>
    %82 = arith.subf %67, %81 : vector<8x128xf32>
    %cst_31 = arith.constant 9.99999974E-6 : f32
    %83 = vector.broadcast %cst_31 : f32 to vector<8x1xf32>
    %84 = arith.addf %80, %83 : vector<8x1xf32>
    %85 = math.rsqrt %84 : vector<8x1xf32>
    %86 = vector.broadcast %85 : vector<8x1xf32> to vector<8x128xf32>
    %87 = arith.mulf %82, %86 : vector<8x128xf32>
    %88 = vector.broadcast %68 : vector<1x128xf32> to vector<8x128xf32>
    %89 = arith.mulf %87, %88 : vector<8x128xf32>
    %90 = vector.broadcast %69 : vector<1x128xf32> to vector<8x128xf32>
    %91 = arith.addf %89, %90 : vector<8x128xf32>
    %c0_32 = arith.constant 0 : index
    %c0_33 = arith.constant 0 : index
    %c0_34 = arith.constant 0 : index
    %92 = vector.load %arg9[%c0_32, %c0_33, %c0_34] : memref<1x8x128xf32, #tpu.memory_space<vmem>>, vector<1x8x128xf32>
    %93 = vector.shape_cast %92 : vector<1x8x128xf32> to vector<8x128xf32>
    %94 = vector.shape_cast %91 : vector<8x128xf32> to vector<1x8x128xf32>
    tpu.vector_store %arg9[%c0_32, %c0_33, %c0_34], %94 {strides = array<i32>} : memref<1x8x128xf32, #tpu.memory_space<vmem>>, vector<1x8x128xf32>,
    return
  }
  func.func @transform_0(%arg0: i32) -> (i32, i32, i32) {
    %c0_i32 = arith.constant 0 : i32
    %c0_i32_0 = arith.constant 0 : i32
    %c0_i32_1 = arith.constant 0 : i32
    return %arg0, %c0_i32, %c0_i32_0 : i32, i32, i32
  }
  func.func @transform_1(%arg0: i32) -> (i32, i32, i32) {
    %c0_i32 = arith.constant 0 : i32
    %c0_i32_0 = arith.constant 0 : i32
    %c0_i32_1 = arith.constant 0 : i32
    return %arg0, %c0_i32, %c0_i32_0 : i32, i32, i32
  }
  func.func @transform_2(%arg0: i32) -> (i32, i32) {
    %c0_i32 = arith.constant 0 : i32
    %c0_i32_0 = arith.constant 0 : i32
    %c0_i32_1 = arith.constant 0 : i32
    return %c0_i32, %c0_i32_0 : i32, i32
  }
  func.func @transform_3(%arg0: i32) -> (i32, i32) {
    %c0_i32 = arith.constant 0 : i32
    %c0_i32_0 = arith.constant 0 : i32
    %c0_i32_1 = arith.constant 0 : i32
    return %c0_i32, %c0_i32_0 : i32, i32
  }
  func.func @transform_4(%arg0: i32) -> (i32, i32) {
    %c0_i32 = arith.constant 0 : i32
    %c0_i32_0 = arith.constant 0 : i32
    %c0_i32_1 = arith.constant 0 : i32
    return %c0_i32, %c0_i32_0 : i32, i32
  }
  func.func @transform_5(%arg0: i32) -> (i32, i32) {
    %c0_i32 = arith.constant 0 : i32
    %c0_i32_0 = arith.constant 0 : i32
    %c0_i32_1 = arith.constant 0 : i32
    return %c0_i32, %c0_i32_0 : i32, i32
  }
  func.func @transform_6(%arg0: i32) -> (i32, i32) {
    %c0_i32 = arith.constant 0 : i32
    %c0_i32_0 = arith.constant 0 : i32
    %c0_i32_1 = arith.constant 0 : i32
    return %c0_i32, %c0_i32_0 : i32, i32
  }
  func.func @transform_7(%arg0: i32) -> (i32, i32) {
    %c0_i32 = arith.constant 0 : i32
    %c0_i32_0 = arith.constant 0 : i32
    %c0_i32_1 = arith.constant 0 : i32
    return %c0_i32, %c0_i32_0 : i32, i32
  }
  func.func @transform_8(%arg0: i32) -> (i32, i32, i32) {
    %c0_i32 = arith.constant 0 : i32
    %c0_i32_0 = arith.constant 0 : i32
    %c0_i32_1 = arith.constant 0 : i32
    return %arg0, %c0_i32, %c0_i32_0 : i32, i32, i32
  }
}

module attributes {stable_mosaic.version = 11 : i64} {
  func.func @_attn_block_kernel(%arg0: i32, %arg1: memref<1x8x128xf32, #tpu.memory_space<vmem>>, %arg2: memref<1x8x128xf32, #tpu.memory_space<vmem>>, %arg3: memref<128x384xbf16, #tpu.memory_space<vmem>>, %arg4: memref<1x384xf32, #tpu.memory_space<vmem>>, %arg5: memref<128x128xbf16, #tpu.memory_space<vmem>>, %arg6: memref<1x128xf32, #tpu.memory_space<vmem>>, %arg7: memref<1x128xf32, #tpu.memory_space<vmem>>, %arg8: memref<1x128xf32, #tpu.memory_space<vmem>>, %arg9: memref<1x8x128xf32, #tpu.memory_space<vmem>>) attributes {dimension_semantics = [#tpu.dimension_semantics<parallel>], iteration_bounds = array<i64: 2>, scalar_prefetch = 0 : i64, scratch_operands = 0 : i64, tpu.core_type = #tpu.core_type<tc>, window_params = [{transform_indices = @transform_0, window_bounds = array<i64: 1, 8, 128>}, {transform_indices = @transform_1, window_bounds = array<i64: 1, 8, 128>}, {pipeline_mode = #tpu.pipeline_mode<synchronous>, transform_indices = @transform_2, window_bounds = array<i64: 128, 384>}, {pipeline_mode = #tpu.pipeline_mode<synchronous>, transform_indices = @transform_3, window_bounds = array<i64: 1, 384>}, {pipeline_mode = #tpu.pipeline_mode<synchronous>, transform_indices = @transform_4, window_bounds = array<i64: 128, 128>}, {pipeline_mode = #tpu.pipeline_mode<synchronous>, transform_indices = @transform_5, window_bounds = array<i64: 1, 128>}, {pipeline_mode = #tpu.pipeline_mode<synchronous>, transform_indices = @transform_6, window_bounds = array<i64: 1, 128>}, {pipeline_mode = #tpu.pipeline_mode<synchronous>, transform_indices = @transform_7, window_bounds = array<i64: 1, 128>}, {transform_indices = @transform_8, window_bounds = array<i64: 1, 8, 128>}]} {
    %c0 = arith.constant 0 : index
    %c0_0 = arith.constant 0 : index
    %c0_1 = arith.constant 0 : index
    %0 = vector.load %arg1[%c0, %c0_0, %c0_1] : memref<1x8x128xf32, #tpu.memory_space<vmem>>, vector<1x8x128xf32>
    %1 = vector.shape_cast %0 : vector<1x8x128xf32> to vector<8x128xf32>
    %2 = arith.truncf %1 : vector<8x128xf32> to vector<8x128xbf16>
    %c0_2 = arith.constant 0 : index
    %c0_3 = arith.constant 0 : index
    %c0_4 = arith.constant 0 : index
    %3 = vector.load %arg2[%c0_2, %c0_3, %c0_4] : memref<1x8x128xf32, #tpu.memory_space<vmem>>, vector<1x8x128xf32>
    %4 = vector.shape_cast %3 : vector<1x8x128xf32> to vector<8x128xf32>
    %5 = arith.truncf %4 : vector<8x128xf32> to vector<8x128xbf16>
    %c0_5 = arith.constant 0 : index
    %c0_6 = arith.constant 0 : index
    %6 = vector.load %arg3[%c0_5, %c0_6] : memref<128x384xbf16, #tpu.memory_space<vmem>>, vector<128x128xbf16>
    %cst = arith.constant dense<0.000000e+00> : vector<8x128xf32>
    %7 = tpu.matmul %2, %6, %cst {dimension_numbers = #tpu.dot_dimension_numbers<[1], [0], [0], [1], [0, 0, 1, 1], [], []>} : vector<8x128xbf16>, vector<128x128xbf16>, vector<8x128xf32> -> vector<8x128xf32>
    %c0_7 = arith.constant 0 : index
    %c0_8 = arith.constant 0 : index
    %8 = vector.load %arg4[%c0_7, %c0_8] : memref<1x384xf32, #tpu.memory_space<vmem>>, vector<1x128xf32>
    %9 = vector.broadcast %8 : vector<1x128xf32> to vector<8x128xf32>
    %10 = arith.addf %7, %9 : vector<8x128xf32>
    %c0_9 = arith.constant 0 : index
    %c128 = arith.constant 128 : index
    %11 = vector.load %arg3[%c0_9, %c128] : memref<128x384xbf16, #tpu.memory_space<vmem>>, vector<128x256xbf16>
    %cst_10 = arith.constant dense<0.000000e+00> : vector<8x256xf32>
    %12 = tpu.matmul %5, %11, %cst_10 {dimension_numbers = #tpu.dot_dimension_numbers<[1], [0], [0], [1], [0, 0, 1, 1], [], []>} : vector<8x128xbf16>, vector<128x256xbf16>, vector<8x256xf32> -> vector<8x256xf32>
    %c0_11 = arith.constant 0 : index
    %c128_12 = arith.constant 128 : index
    %13 = vector.load %arg4[%c0_11, %c128_12] : memref<1x384xf32, #tpu.memory_space<vmem>>, vector<1x256xf32>
    %14 = vector.broadcast %13 : vector<1x256xf32> to vector<8x256xf32>
    %15 = arith.addf %12, %14 : vector<8x256xf32>
    %16 = vector.extract_strided_slice %15 {offsets = [0, 0], sizes = [8, 128], strides = [1, 1]} : vector<8x256xf32> to vector<8x128xf32>
    %17 = vector.extract_strided_slice %15 {offsets = [0, 128], sizes = [8, 128], strides = [1, 1]} : vector<8x256xf32> to vector<8x128xf32>
    %18 = vector.extract_strided_slice %10 {offsets = [0, 0], sizes = [8, 64], strides = [1, 1]} : vector<8x128xf32> to vector<8x64xf32>
    %19 = arith.truncf %18 : vector<8x64xf32> to vector<8x64xbf16>
    %20 = vector.extract_strided_slice %16 {offsets = [0, 0], sizes = [8, 64], strides = [1, 1]} : vector<8x128xf32> to vector<8x64xf32>
    %21 = arith.truncf %20 : vector<8x64xf32> to vector<8x64xbf16>
    %22 = vector.extract_strided_slice %17 {offsets = [0, 0], sizes = [8, 64], strides = [1, 1]} : vector<8x128xf32> to vector<8x64xf32>
    %23 = arith.truncf %22 : vector<8x64xf32> to vector<8x64xbf16>
    %cst_13 = arith.constant dense<0.000000e+00> : vector<8x8xf32>
    %24 = tpu.matmul %19, %21, %cst_13 {dimension_numbers = #tpu.dot_dimension_numbers<[1], [1], [0], [0], [0, 0, 1, 0], [], []>} : vector<8x64xbf16>, vector<8x64xbf16>, vector<8x8xf32> -> vector<8x8xf32>
    %cst_14 = arith.constant 1.250000e-01 : f32
    %25 = vector.broadcast %cst_14 : f32 to vector<8x8xf32>
    %26 = arith.mulf %24, %25 : vector<8x8xf32>
    %cst_15 = arith.constant dense<0xFF800000> : vector<8xf32>
    %27 = vector.multi_reduction <maximumf>, %26, %cst_15 [1] : vector<8x8xf32> to vector<8xf32>
    %28 = vector.shape_cast %27 : vector<8xf32> to vector<8x1xf32>
    %29 = vector.broadcast %28 : vector<8x1xf32> to vector<8x8xf32>
    %30 = arith.subf %26, %29 : vector<8x8xf32>
    %31 = math.exp %30 : vector<8x8xf32>
    %cst_16 = arith.constant dense<0.000000e+00> : vector<8xf32>
    %32 = vector.multi_reduction <add>, %31, %cst_16 [1] : vector<8x8xf32> to vector<8xf32>
    %33 = vector.shape_cast %32 : vector<8xf32> to vector<8x1xf32>
    %34 = tpu.reciprocal %33 {approx = true} : vector<8x1xf32> -> vector<8x1xf32>
    %35 = vector.broadcast %34 : vector<8x1xf32> to vector<8x8xf32>
    %36 = arith.mulf %31, %35 : vector<8x8xf32>
    %37 = arith.truncf %36 : vector<8x8xf32> to vector<8x8xbf16>
    %cst_17 = arith.constant dense<0.000000e+00> : vector<8x64xf32>
    %38 = tpu.matmul %37, %23, %cst_17 {dimension_numbers = #tpu.dot_dimension_numbers<[1], [0], [0], [1], [0, 0, 1, 1], [], []>} : vector<8x8xbf16>, vector<8x64xbf16>, vector<8x64xf32> -> vector<8x64xf32>
    %39 = vector.extract_strided_slice %10 {offsets = [0, 64], sizes = [8, 64], strides = [1, 1]} : vector<8x128xf32> to vector<8x64xf32>
    %40 = arith.truncf %39 : vector<8x64xf32> to vector<8x64xbf16>
    %41 = vector.extract_strided_slice %16 {offsets = [0, 64], sizes = [8, 64], strides = [1, 1]} : vector<8x128xf32> to vector<8x64xf32>
    %42 = arith.truncf %41 : vector<8x64xf32> to vector<8x64xbf16>
    %43 = vector.extract_strided_slice %17 {offsets = [0, 64], sizes = [8, 64], strides = [1, 1]} : vector<8x128xf32> to vector<8x64xf32>
    %44 = arith.truncf %43 : vector<8x64xf32> to vector<8x64xbf16>
    %cst_18 = arith.constant dense<0.000000e+00> : vector<8x8xf32>
    %45 = tpu.matmul %40, %42, %cst_18 {dimension_numbers = #tpu.dot_dimension_numbers<[1], [1], [0], [0], [0, 0, 1, 0], [], []>} : vector<8x64xbf16>, vector<8x64xbf16>, vector<8x8xf32> -> vector<8x8xf32>
    %cst_19 = arith.constant 1.250000e-01 : f32
    %46 = vector.broadcast %cst_19 : f32 to vector<8x8xf32>
    %47 = arith.mulf %45, %46 : vector<8x8xf32>
    %cst_20 = arith.constant dense<0xFF800000> : vector<8xf32>
    %48 = vector.multi_reduction <maximumf>, %47, %cst_20 [1] : vector<8x8xf32> to vector<8xf32>
    %49 = vector.shape_cast %48 : vector<8xf32> to vector<8x1xf32>
    %50 = vector.broadcast %49 : vector<8x1xf32> to vector<8x8xf32>
    %51 = arith.subf %47, %50 : vector<8x8xf32>
    %52 = math.exp %51 : vector<8x8xf32>
    %cst_21 = arith.constant dense<0.000000e+00> : vector<8xf32>
    %53 = vector.multi_reduction <add>, %52, %cst_21 [1] : vector<8x8xf32> to vector<8xf32>
    %54 = vector.shape_cast %53 : vector<8xf32> to vector<8x1xf32>
    %55 = tpu.reciprocal %54 {approx = true} : vector<8x1xf32> -> vector<8x1xf32>
    %56 = vector.broadcast %55 : vector<8x1xf32> to vector<8x8xf32>
    %57 = arith.mulf %52, %56 : vector<8x8xf32>
    %58 = arith.truncf %57 : vector<8x8xf32> to vector<8x8xbf16>
    %cst_22 = arith.constant dense<0.000000e+00> : vector<8x64xf32>
    %59 = tpu.matmul %58, %44, %cst_22 {dimension_numbers = #tpu.dot_dimension_numbers<[1], [0], [0], [1], [0, 0, 1, 1], [], []>} : vector<8x8xbf16>, vector<8x64xbf16>, vector<8x64xf32> -> vector<8x64xf32>
    %60 = tpu.concatenate %38, %59 in 1 : vector<8x64xf32>, vector<8x64xf32> -> vector<8x128xf32>
    %61 = arith.truncf %60 : vector<8x128xf32> to vector<8x128xbf16>
    %c0_23 = arith.constant 0 : index
    %c0_24 = arith.constant 0 : index
    %62 = vector.load %arg5[%c0_23, %c0_24] : memref<128x128xbf16, #tpu.memory_space<vmem>>, vector<128x128xbf16>
    %cst_25 = arith.constant dense<0.000000e+00> : vector<8x128xf32>
    %63 = tpu.matmul %61, %62, %cst_25 {dimension_numbers = #tpu.dot_dimension_numbers<[1], [0], [0], [1], [0, 0, 1, 1], [], []>} : vector<8x128xbf16>, vector<128x128xbf16>, vector<8x128xf32> -> vector<8x128xf32>
    %c0_26 = arith.constant 0 : index
    %c0_27 = arith.constant 0 : index
    %64 = vector.load %arg6[%c0_26, %c0_27] : memref<1x128xf32, #tpu.memory_space<vmem>>, vector<1x128xf32>
    %65 = vector.broadcast %64 : vector<1x128xf32> to vector<8x128xf32>
    %66 = arith.addf %63, %65 : vector<8x128xf32>
    %67 = arith.addf %66, %1 : vector<8x128xf32>
    %c0_28 = arith.constant 0 : index
    %c0_29 = arith.constant 0 : index
    %68 = vector.load %arg7[%c0_28, %c0_29] : memref<1x128xf32, #tpu.memory_space<vmem>>, vector<1x128xf32>
    %c0_30 = arith.constant 0 : index
    %c0_31 = arith.constant 0 : index
    %69 = vector.load %arg8[%c0_30, %c0_31] : memref<1x128xf32, #tpu.memory_space<vmem>>, vector<1x128xf32>
    %cst_32 = arith.constant dense<0.000000e+00> : vector<8xf32>
    %70 = vector.multi_reduction <add>, %67, %cst_32 [1] : vector<8x128xf32> to vector<8xf32>
    %71 = vector.shape_cast %70 : vector<8xf32> to vector<8x1xf32>
    %cst_33 = arith.constant 1.280000e+02 : f32
    %72 = vector.broadcast %cst_33 : f32 to vector<8x1xf32>
    %73 = arith.divf %71, %72 : vector<8x1xf32>
    %74 = vector.broadcast %73 : vector<8x1xf32> to vector<8x128xf32>
    %75 = arith.subf %67, %74 : vector<8x128xf32>
    %76 = arith.mulf %75, %75 : vector<8x128xf32>
    %cst_34 = arith.constant dense<0.000000e+00> : vector<8xf32>
    %77 = vector.multi_reduction <add>, %76, %cst_34 [1] : vector<8x128xf32> to vector<8xf32>
    %78 = vector.shape_cast %77 : vector<8xf32> to vector<8x1xf32>
    %cst_35 = arith.constant 1.280000e+02 : f32
    %79 = vector.broadcast %cst_35 : f32 to vector<8x1xf32>
    %80 = arith.divf %78, %79 : vector<8x1xf32>
    %81 = vector.broadcast %73 : vector<8x1xf32> to vector<8x128xf32>
    %82 = arith.subf %67, %81 : vector<8x128xf32>
    %cst_36 = arith.constant 9.99999974E-6 : f32
    %83 = vector.broadcast %cst_36 : f32 to vector<8x1xf32>
    %84 = arith.addf %80, %83 : vector<8x1xf32>
    %85 = math.rsqrt %84 : vector<8x1xf32>
    %86 = vector.broadcast %85 : vector<8x1xf32> to vector<8x128xf32>
    %87 = arith.mulf %82, %86 : vector<8x128xf32>
    %88 = vector.broadcast %68 : vector<1x128xf32> to vector<8x128xf32>
    %89 = arith.mulf %87, %88 : vector<8x128xf32>
    %90 = vector.broadcast %69 : vector<1x128xf32> to vector<8x128xf32>
    %91 = arith.addf %89, %90 : vector<8x128xf32>
    %c0_37 = arith.constant 0 : index
    %c0_38 = arith.constant 0 : index
    %c0_39 = arith.constant 0 : index
    %92 = vector.load %arg9[%c0_37, %c0_38, %c0_39] : memref<1x8x128xf32, #tpu.memory_space<vmem>>, vector<1x8x128xf32>
    %93 = vector.shape_cast %92 : vector<1x8x128xf32> to vector<8x128xf32>
    %94 = vector.shape_cast %91 : vector<8x128xf32> to vector<1x8x128xf32>
    tpu.vector_store %arg9[%c0_37, %c0_38, %c0_39], %94 {strides = array<i32>} : memref<1x8x128xf32, #tpu.memory_space<vmem>>, vector<1x8x128xf32>,
    return
  }
  func.func @transform_0(%arg0: i32) -> (i32, i32, i32) {
    %c0_i32 = arith.constant 0 : i32
    %c0_i32_0 = arith.constant 0 : i32
    %c0_i32_1 = arith.constant 0 : i32
    return %arg0, %c0_i32, %c0_i32_0 : i32, i32, i32
  }
  func.func @transform_1(%arg0: i32) -> (i32, i32, i32) {
    %c0_i32 = arith.constant 0 : i32
    %c0_i32_0 = arith.constant 0 : i32
    %c0_i32_1 = arith.constant 0 : i32
    return %arg0, %c0_i32, %c0_i32_0 : i32, i32, i32
  }
  func.func @transform_2(%arg0: i32) -> (i32, i32) {
    %c0_i32 = arith.constant 0 : i32
    %c0_i32_0 = arith.constant 0 : i32
    %c0_i32_1 = arith.constant 0 : i32
    return %c0_i32, %c0_i32_0 : i32, i32
  }
  func.func @transform_3(%arg0: i32) -> (i32, i32) {
    %c0_i32 = arith.constant 0 : i32
    %c0_i32_0 = arith.constant 0 : i32
    %c0_i32_1 = arith.constant 0 : i32
    return %c0_i32, %c0_i32_0 : i32, i32
  }
  func.func @transform_4(%arg0: i32) -> (i32, i32) {
    %c0_i32 = arith.constant 0 : i32
    %c0_i32_0 = arith.constant 0 : i32
    %c0_i32_1 = arith.constant 0 : i32
    return %c0_i32, %c0_i32_0 : i32, i32
  }
  func.func @transform_5(%arg0: i32) -> (i32, i32) {
    %c0_i32 = arith.constant 0 : i32
    %c0_i32_0 = arith.constant 0 : i32
    %c0_i32_1 = arith.constant 0 : i32
    return %c0_i32, %c0_i32_0 : i32, i32
  }
  func.func @transform_6(%arg0: i32) -> (i32, i32) {
    %c0_i32 = arith.constant 0 : i32
    %c0_i32_0 = arith.constant 0 : i32
    %c0_i32_1 = arith.constant 0 : i32
    return %c0_i32, %c0_i32_0 : i32, i32
  }
  func.func @transform_7(%arg0: i32) -> (i32, i32) {
    %c0_i32 = arith.constant 0 : i32
    %c0_i32_0 = arith.constant 0 : i32
    %c0_i32_1 = arith.constant 0 : i32
    return %c0_i32, %c0_i32_0 : i32, i32
  }
  func.func @transform_8(%arg0: i32) -> (i32, i32, i32) {
    %c0_i32 = arith.constant 0 : i32
    %c0_i32_0 = arith.constant 0 : i32
    %c0_i32_1 = arith.constant 0 : i32
    return %arg0, %c0_i32, %c0_i32_0 : i32, i32, i32
  }
}

module attributes {stable_mosaic.version = 11 : i64} {
  func.func @_lm_head_kernel(%arg0: i32, %arg1: memref<8x128xf32, #tpu.memory_space<vmem>>, %arg2: memref<128x128xbf16, #tpu.memory_space<vmem>>, %arg3: memref<1x128xf32, #tpu.memory_space<vmem>>, %arg4: memref<1x128xf32, #tpu.memory_space<vmem>>, %arg5: memref<1x128xf32, #tpu.memory_space<vmem>>, %arg6: memref<256x128xf32, #tpu.memory_space<vmem>>, %arg7: memref<1x256xf32, #tpu.memory_space<vmem>>, %arg8: memref<8x256xf32, #tpu.memory_space<vmem>>) attributes {dimension_semantics = [#tpu.dimension_semantics<parallel>], iteration_bounds = array<i64: 2>, scalar_prefetch = 0 : i64, scratch_operands = 0 : i64, tpu.core_type = #tpu.core_type<tc>, window_params = [{transform_indices = @transform_0, window_bounds = array<i64: 8, 128>}, {pipeline_mode = #tpu.pipeline_mode<synchronous>, transform_indices = @transform_1, window_bounds = array<i64: 128, 128>}, {pipeline_mode = #tpu.pipeline_mode<synchronous>, transform_indices = @transform_2, window_bounds = array<i64: 1, 128>}, {pipeline_mode = #tpu.pipeline_mode<synchronous>, transform_indices = @transform_3, window_bounds = array<i64: 1, 128>}, {pipeline_mode = #tpu.pipeline_mode<synchronous>, transform_indices = @transform_4, window_bounds = array<i64: 1, 128>}, {pipeline_mode = #tpu.pipeline_mode<synchronous>, transform_indices = @transform_5, window_bounds = array<i64: 256, 128>}, {pipeline_mode = #tpu.pipeline_mode<synchronous>, transform_indices = @transform_6, window_bounds = array<i64: 1, 256>}, {transform_indices = @transform_7, window_bounds = array<i64: 8, 256>}]} {
    %c0 = arith.constant 0 : index
    %c0_0 = arith.constant 0 : index
    %0 = vector.load %arg1[%c0, %c0_0] : memref<8x128xf32, #tpu.memory_space<vmem>>, vector<8x128xf32>
    %1 = arith.truncf %0 : vector<8x128xf32> to vector<8x128xbf16>
    %c0_1 = arith.constant 0 : index
    %c0_2 = arith.constant 0 : index
    %2 = vector.load %arg2[%c0_1, %c0_2] : memref<128x128xbf16, #tpu.memory_space<vmem>>, vector<128x128xbf16>
    %cst = arith.constant dense<0.000000e+00> : vector<8x128xf32>
    %3 = tpu.matmul %1, %2, %cst {dimension_numbers = #tpu.dot_dimension_numbers<[1], [0], [0], [1], [0, 0, 1, 1], [], []>} : vector<8x128xbf16>, vector<128x128xbf16>, vector<8x128xf32> -> vector<8x128xf32>
    %c0_3 = arith.constant 0 : index
    %c0_4 = arith.constant 0 : index
    %4 = vector.load %arg3[%c0_3, %c0_4] : memref<1x128xf32, #tpu.memory_space<vmem>>, vector<1x128xf32>
    %5 = vector.broadcast %4 : vector<1x128xf32> to vector<8x128xf32>
    %6 = arith.addf %3, %5 : vector<8x128xf32>
    %cst_5 = arith.constant 5.000000e-01 : f32
    %7 = vector.broadcast %cst_5 : f32 to vector<8x128xf32>
    %8 = arith.mulf %7, %6 : vector<8x128xf32>
    %cst_6 = arith.constant 0.707106769 : f32
    %9 = vector.broadcast %cst_6 : f32 to vector<8x128xf32>
    %10 = arith.mulf %6, %9 : vector<8x128xf32>
    %cst_7 = arith.constant 0.000000e+00 : f32
    %11 = vector.broadcast %cst_7 : f32 to vector<8x128xf32>
    %12 = arith.cmpf oge, %10, %11 : vector<8x128xf32>
    %cst_8 = arith.constant 1.000000e+00 : f32
    %cst_9 = arith.constant -1.000000e+00 : f32
    %13 = vector.broadcast %cst_8 : f32 to vector<8x128xf32>
    %14 = vector.broadcast %cst_9 : f32 to vector<8x128xf32>
    %15 = arith.select %12, %13, %14 : vector<8x128xi1>, vector<8x128xf32>
    %16 = arith.mulf %10, %15 : vector<8x128xf32>
    %cst_10 = arith.constant 0.327591091 : f32
    %17 = vector.broadcast %cst_10 : f32 to vector<8x128xf32>
    %18 = arith.mulf %17, %16 : vector<8x128xf32>
    %cst_11 = arith.constant 1.000000e+00 : f32
    %19 = vector.broadcast %cst_11 : f32 to vector<8x128xf32>
    %20 = arith.addf %19, %18 : vector<8x128xf32>
    %cst_12 = arith.constant 1.000000e+00 : f32
    %21 = vector.broadcast %cst_12 : f32 to vector<8x128xf32>
    %22 = arith.divf %21, %20 : vector<8x128xf32>
    %cst_13 = arith.constant 1.06140542 : f32
    %23 = vector.broadcast %cst_13 : f32 to vector<8x128xf32>
    %24 = arith.mulf %23, %22 : vector<8x128xf32>
    %cst_14 = arith.constant -1.45315206 : f32
    %25 = vector.broadcast %cst_14 : f32 to vector<8x128xf32>
    %26 = arith.addf %24, %25 : vector<8x128xf32>
    %27 = arith.mulf %26, %22 : vector<8x128xf32>
    %cst_15 = arith.constant 1.42141378 : f32
    %28 = vector.broadcast %cst_15 : f32 to vector<8x128xf32>
    %29 = arith.addf %27, %28 : vector<8x128xf32>
    %30 = arith.mulf %29, %22 : vector<8x128xf32>
    %cst_16 = arith.constant -0.284496725 : f32
    %31 = vector.broadcast %cst_16 : f32 to vector<8x128xf32>
    %32 = arith.addf %30, %31 : vector<8x128xf32>
    %33 = arith.mulf %32, %22 : vector<8x128xf32>
    %cst_17 = arith.constant 0.254829586 : f32
    %34 = vector.broadcast %cst_17 : f32 to vector<8x128xf32>
    %35 = arith.addf %33, %34 : vector<8x128xf32>
    %36 = arith.mulf %35, %22 : vector<8x128xf32>
    %cst_18 = arith.constant 0.000000e+00 : f32
    %37 = vector.broadcast %cst_18 : f32 to vector<8x128xf32>
    %38 = arith.subf %37, %16 : vector<8x128xf32>
    %39 = arith.mulf %38, %16 : vector<8x128xf32>
    %40 = math.exp %39 : vector<8x128xf32>
    %41 = arith.mulf %36, %40 : vector<8x128xf32>
    %cst_19 = arith.constant 1.000000e+00 : f32
    %42 = vector.broadcast %cst_19 : f32 to vector<8x128xf32>
    %43 = arith.subf %42, %41 : vector<8x128xf32>
    %44 = arith.mulf %15, %43 : vector<8x128xf32>
    %cst_20 = arith.constant 1.000000e+00 : f32
    %45 = vector.broadcast %cst_20 : f32 to vector<8x128xf32>
    %46 = arith.addf %45, %44 : vector<8x128xf32>
    %47 = arith.mulf %8, %46 : vector<8x128xf32>
    %c0_21 = arith.constant 0 : index
    %c0_22 = arith.constant 0 : index
    %48 = vector.load %arg4[%c0_21, %c0_22] : memref<1x128xf32, #tpu.memory_space<vmem>>, vector<1x128xf32>
    %c0_23 = arith.constant 0 : index
    %c0_24 = arith.constant 0 : index
    %49 = vector.load %arg5[%c0_23, %c0_24] : memref<1x128xf32, #tpu.memory_space<vmem>>, vector<1x128xf32>
    %cst_25 = arith.constant dense<0.000000e+00> : vector<8xf32>
    %50 = vector.multi_reduction <add>, %47, %cst_25 [1] : vector<8x128xf32> to vector<8xf32>
    %51 = vector.shape_cast %50 : vector<8xf32> to vector<8x1xf32>
    %cst_26 = arith.constant 1.280000e+02 : f32
    %52 = vector.broadcast %cst_26 : f32 to vector<8x1xf32>
    %53 = arith.divf %51, %52 : vector<8x1xf32>
    %54 = vector.broadcast %53 : vector<8x1xf32> to vector<8x128xf32>
    %55 = arith.subf %47, %54 : vector<8x128xf32>
    %56 = arith.mulf %55, %55 : vector<8x128xf32>
    %cst_27 = arith.constant dense<0.000000e+00> : vector<8xf32>
    %57 = vector.multi_reduction <add>, %56, %cst_27 [1] : vector<8x128xf32> to vector<8xf32>
    %58 = vector.shape_cast %57 : vector<8xf32> to vector<8x1xf32>
    %cst_28 = arith.constant 1.280000e+02 : f32
    %59 = vector.broadcast %cst_28 : f32 to vector<8x1xf32>
    %60 = arith.divf %58, %59 : vector<8x1xf32>
    %61 = vector.broadcast %53 : vector<8x1xf32> to vector<8x128xf32>
    %62 = arith.subf %47, %61 : vector<8x128xf32>
    %cst_29 = arith.constant 9.99999974E-6 : f32
    %63 = vector.broadcast %cst_29 : f32 to vector<8x1xf32>
    %64 = arith.addf %60, %63 : vector<8x1xf32>
    %65 = math.rsqrt %64 : vector<8x1xf32>
    %66 = vector.broadcast %65 : vector<8x1xf32> to vector<8x128xf32>
    %67 = arith.mulf %62, %66 : vector<8x128xf32>
    %68 = vector.broadcast %48 : vector<1x128xf32> to vector<8x128xf32>
    %69 = arith.mulf %67, %68 : vector<8x128xf32>
    %70 = vector.broadcast %49 : vector<1x128xf32> to vector<8x128xf32>
    %71 = arith.addf %69, %70 : vector<8x128xf32>
    %72 = arith.truncf %71 : vector<8x128xf32> to vector<8x128xbf16>
    %c0_30 = arith.constant 0 : index
    %c0_31 = arith.constant 0 : index
    %73 = vector.load %arg6[%c0_30, %c0_31] : memref<256x128xf32, #tpu.memory_space<vmem>>, vector<256x128xf32>
    %74 = arith.truncf %73 : vector<256x128xf32> to vector<256x128xbf16>
    %cst_32 = arith.constant dense<0.000000e+00> : vector<8x256xf32>
    %75 = tpu.matmul %72, %74, %cst_32 {dimension_numbers = #tpu.dot_dimension_numbers<[1], [1], [0], [0], [0, 0, 1, 0], [], []>} : vector<8x128xbf16>, vector<256x128xbf16>, vector<8x256xf32> -> vector<8x256xf32>
    %c0_33 = arith.constant 0 : index
    %c0_34 = arith.constant 0 : index
    %76 = vector.load %arg7[%c0_33, %c0_34] : memref<1x256xf32, #tpu.memory_space<vmem>>, vector<1x256xf32>
    %77 = vector.broadcast %76 : vector<1x256xf32> to vector<8x256xf32>
    %78 = arith.addf %75, %77 : vector<8x256xf32>
    %c0_35 = arith.constant 0 : index
    %c0_36 = arith.constant 0 : index
    %79 = vector.load %arg8[%c0_35, %c0_36] : memref<8x256xf32, #tpu.memory_space<vmem>>, vector<8x256xf32>
    tpu.vector_store %arg8[%c0_35, %c0_36], %78 {strides = array<i32>} : memref<8x256xf32, #tpu.memory_space<vmem>>, vector<8x256xf32>,
    return
  }
  func.func @transform_0(%arg0: i32) -> (i32, i32) {
    %c0_i32 = arith.constant 0 : i32
    %c0_i32_0 = arith.constant 0 : i32
    return %arg0, %c0_i32 : i32, i32
  }
  func.func @transform_1(%arg0: i32) -> (i32, i32) {
    %c0_i32 = arith.constant 0 : i32
    %c0_i32_0 = arith.constant 0 : i32
    %c0_i32_1 = arith.constant 0 : i32
    return %c0_i32, %c0_i32_0 : i32, i32
  }
  func.func @transform_2(%arg0: i32) -> (i32, i32) {
    %c0_i32 = arith.constant 0 : i32
    %c0_i32_0 = arith.constant 0 : i32
    %c0_i32_1 = arith.constant 0 : i32
    return %c0_i32, %c0_i32_0 : i32, i32
  }
  func.func @transform_3(%arg0: i32) -> (i32, i32) {
    %c0_i32 = arith.constant 0 : i32
    %c0_i32_0 = arith.constant 0 : i32
    %c0_i32_1 = arith.constant 0 : i32
    return %c0_i32, %c0_i32_0 : i32, i32
  }
  func.func @transform_4(%arg0: i32) -> (i32, i32) {
    %c0_i32 = arith.constant 0 : i32
    %c0_i32_0 = arith.constant 0 : i32
    %c0_i32_1 = arith.constant 0 : i32
    return %c0_i32, %c0_i32_0 : i32, i32
  }
  func.func @transform_5(%arg0: i32) -> (i32, i32) {
    %c0_i32 = arith.constant 0 : i32
    %c0_i32_0 = arith.constant 0 : i32
    %c0_i32_1 = arith.constant 0 : i32
    return %c0_i32, %c0_i32_0 : i32, i32
  }
  func.func @transform_6(%arg0: i32) -> (i32, i32) {
    %c0_i32 = arith.constant 0 : i32
    %c0_i32_0 = arith.constant 0 : i32
    %c0_i32_1 = arith.constant 0 : i32
    return %c0_i32, %c0_i32_0 : i32, i32
  }
  func.func @transform_7(%arg0: i32) -> (i32, i32) {
    %c0_i32 = arith.constant 0 : i32
    %c0_i32_0 = arith.constant 0 : i32
    return %arg0, %c0_i32 : i32, i32
  }
}

</mosaic_0001>

<bundles_post_ra>
// kernel: _lambda_.13
= control target key start
LH: loop header
LB: loop body
LE: loop exit
PB: predicated region body
PF: predicated region fallthrough
CT: control target
= control target key end

     0   :  { %s298_s12 = smov 0   ;;  %s321_s0 = inlined_call_operand.vmem [shape: f32[16,128], index: 0, kind: input, shape index: {}]   ;;  %s322_s1 = inlined_call_operand.vmem [shape: f32[1,128], index: 1, kind: input, shape index: {}]   ;;  %s323_s2 = inlined_call_operand.vmem [shape: f32[1,128], index: 2, kind: input, shape index: {}]   ;;  %s324_s3 = inlined_call_operand.vmem [shape: f32[16,128], index: 3, kind: output, shape index: {}]  }
   0x1 LB: > { %s249_s13 = sadd.s32 4294967295, %s276_s12   ;;  %p253_p0 = scmp.ge.s32.totalorder %s276_s12, 1  ;;  %s276_s12 = sphi %s298_s12, %s13_s12  }
   0x2   : > { %p136_p1 = scmp.lt.s32.totalorder %s276_s12, 3 }
   0x4   : > { %p137_p2 = pnand %p253_p0, %p136_p1 }
   0x5   : > { %p158_p3 = scmp.lt.s32.totalorder (!%p137_p2), %s249_s13, 1  ;;  %v256_v9 = vld [vmem:[%s322_s1] ss:$0 sm:$0xff] (!%p137_p2) }
   0x6   : > { %140 = sbr.rel (%p137_p2) target bundleno = 329 (0x149), region = 32  ;;  %v257_v11 = vld [vmem:[%s323_s2] ss:$0 sm:$0xff] (!%p137_p2) }
   0xd   : > { %s326_s13 = smov (!%p158_p3, %s249_s13), 1 }
   0xe   : > { %s254_s14 = sshll.u32 %s326_s13, 3 }
   0xf   : > { %s161_s17 = scalar_lea.vmem %s321_s0, %s254_s14  ;;  %s165_s24 = scalar_lea.vmem %s324_s3, %s254_s14 }
  0x10   : > { %v166_v0 = vld [vmem:[%s161_s17] sm:$0xff] }
  0x11   : > { %169 = vadd.xlane.f32.xlu0 %v166_v0 }
  0x9e   : > { %v170_v1 = vpop.xlane.xlu0 %169 }
  0x9f   : > { %v172_v2 = vmul.f32 0.0078125, %v170_v1 }
  0xa1   : > { %v173_v3 = vsub.f32 %v166_v0, %v172_v2 }
  0xa3   : > { %v174_v4 = vmul.f32 %v173_v3, %v173_v3 }
  0xa5   : > { %175 = vadd.xlane.f32.xlu0 %v174_v4 }
 0x132   : > { %v176_v5 = vpop.xlane.xlu0 %175 }
 0x133   : > { %v177_v6 = vmul.f32 0.0078125, %v176_v5 }
 0x135   : > { %v178_v7 = vadd.f32 1e-05, %v177_v6 }
 0x137   : > { %268 = vrsqrt.f32 %v178_v7 }
 0x141   : > { %v269_v8 = vpop.eup %268 }
 0x142   : > { %v180_v10 = vmul.f32 %v269_v8, %v173_v3 }
 0x144   : > { %v187_v12 = vmul.f32 %v256_v9, %v180_v10 }
 0x146   : > { %v194_v13 = vadd.f32 %v257_v11, %v187_v12 }
 0x148   : > { %195 = vst [vmem:[%s165_s24] sm:$0xff] %v194_v13 }
 0x149 PF: > { %s13_s12 = sadd.s32 1, %s276_s12  }
 0x14a   : > { %p10_p4 = scmp.ge.s32.totalorder %s13_s12, 4  }
 0x14c   :  { %12 = sbr.rel (!%p10_p4) target bundleno = 1 (0x1), region = 62 }

// kernel: _lambda_.15
= control target key start
LH: loop header
LB: loop body
LE: loop exit
PB: predicated region body
PF: predicated region fallthrough
CT: control target
= control target key end

     0   :  { %s916_s24 = smov 0   ;;  %s1053_s0 = inlined_call_operand.vmem [shape: f32[16,128], index: 0, kind: input, shape index: {}]   ;;  %s1054_s1 = inlined_call_operand.vmem [shape: bf16[128,256], index: 1, kind: input, shape index: {}]   ;;  %s1055_s2 = inlined_call_operand.vmem [shape: f32[1,256], index: 2, kind: input, shape index: {}]   ;;  %s1056_s3 = inlined_call_operand.vmem [shape: bf16[256,128], index: 3, kind: input, shape index: {}]   ;;  %s1057_s4 = inlined_call_operand.vmem [shape: f32[1,128], index: 4, kind: input, shape index: {}]   ;;  %s1058_s5 = inlined_call_operand.vmem [shape: f32[1,128], index: 5, kind: input, shape index: {}]   ;;  %s1059_s6 = inlined_call_operand.vmem [shape: f32[1,128], index: 6, kind: input, shape index: {}]   ;;  %s1060_s7 = inlined_call_operand.vmem [shape: f32[16,128], index: 7, kind: output, shape index: {}]  }
   0x1 LB: > { %s740_s25 = sadd.s32 4294967295, %s872_s24   ;;  %p744_p0 = scmp.ge.s32.totalorder %s872_s24, 1  ;;  %s872_s24 = sphi %s916_s24, %s17_s24  }
   0x2   : > { %p236_p1 = scmp.lt.s32.totalorder %s872_s24, 3 }
   0x4   : > { %p237_p2 = pnand %p744_p0, %p236_p1 }
   0x5   : > { %v816_v0 = vld [vmem:[%s1054_s1 + $0x4] ss:$8 sps:$4 sm:$0xff] (!%p237_p2)   ;;  %v818_v1 = vld [vmem:[%s1054_s1] ss:$8 sps:$4 sm:$0xff] (!%p237_p2)   ;;  %v874_v2 = vmov (!%p237_p2), 0   ;;  %p266_p3 = scmp.lt.s32.totalorder (!%p237_p2), %s740_s25, 1  ;;  %v295_v35 = vlaneseq (!%p237_p2) }
   0x6   : > { %240 = sbr.rel (%p237_p2) target bundleno = 836 (0x344), region = 48  ;;  %417 = vmatprep.mubr.bf16.mxu0 (!%p237_p2), %v874_v2  ;;  %385 = vmatprep.subr.bf16.mxu0 (!%p237_p2), %v816_v0  ;;  %v819_v3 = vld [vmem:[%s1054_s1 + $0x14] ss:$8 sps:$4 sm:$0xff] (!%p237_p2)   ;;  %v821_v4 = vld [vmem:[%s1054_s1 + $0x10] ss:$8 sps:$4 sm:$0xff] (!%p237_p2)   ;;  %v840_v19 = vld [vmem:[%s1056_s3 + $0x40] sm:$0xff] (!%p237_p2)  }
   0x7   : > { %386 = vmatpush1.bf16.msra.mxu0 (!%p237_p2), %v818_v1  ;;  %v822_v5 = vld [vmem:[%s1054_s1 + $0x24] ss:$8 sps:$4 sm:$0xff] (!%p237_p2)   ;;  %v824_v6 = vld [vmem:[%s1054_s1 + $0x20] ss:$8 sps:$4 sm:$0xff] (!%p237_p2)   ;;  %v825_v7 = vld [vmem:[%s1054_s1 + $0x34] ss:$8 sps:$4 sm:$0xff] (!%p237_p2)   ;;  %784 = vmatprep.subr.bf16.mxu1 (!%p237_p2), %v840_v19 }
   0x8   : > { %387 = vmatprep.subr.bf16.mxu0 (!%p237_p2), %v819_v3  ;;  %v827_v8 = vld [vmem:[%s1054_s1 + $0x30] ss:$8 sps:$4 sm:$0xff] (!%p237_p2)   ;;  %v828_v9 = vld [vmem:[%s1054_s1 + $0x44] ss:$8 sps:$4 sm:$0xff] (!%p237_p2)   ;;  %v830_v10 = vld [vmem:[%s1054_s1 + $0x40] ss:$8 sps:$4 sm:$0xff] (!%p237_p2)  }
   0x9   : > { %v831_v11 = vld [vmem:[%s1054_s1 + $0x54] ss:$8 sps:$4 sm:$0xff] (!%p237_p2)   ;;  %v833_v12 = vld [vmem:[%s1054_s1 + $0x50] ss:$8 sps:$4 sm:$0xff] (!%p237_p2)   ;;  %v834_v13 = vld [vmem:[%s1054_s1 + $0x64] ss:$8 sps:$4 sm:$0xff] (!%p237_p2)  }
   0xa   : > { %v836_v14 = vld [vmem:[%s1054_s1 + $0x60] ss:$8 sps:$4 sm:$0xff] (!%p237_p2)   ;;  %v837_v15 = vld [vmem:[%s1054_s1 + $0x74] ss:$8 sps:$4 sm:$0xff] (!%p237_p2)   ;;  %v839_v16 = vld [vmem:[%s1054_s1 + $0x70] ss:$8 sps:$4 sm:$0xff] (!%p237_p2)  }
   0xb   : > { %388 = vmatpush1.bf16.msra.mxu0 (!%p237_p2), %v821_v4  ;;  %v841_v20 = vld [vmem:[%s1056_s3] sm:$0xff] (!%p237_p2)   ;;  %v842_v21 = vld [vmem:[%s1056_s3 + $0x48] sm:$0xff] (!%p237_p2)   ;;  %v844_v23 = vld [vmem:[%s1056_s3 + $0x50] sm:$0xff] (!%p237_p2)   ;;  %v296_v36 = vshrl.u32 (!%p237_p2), %v295_v35, 7  ;;  %v875_v50 = vmov (!%p237_p2), -1.0  }
   0xc   : > { %389 = vmatprep.subr.bf16.mxu0 (!%p237_p2), %v822_v5  ;;  %785 = vmatpush3.bf16.msra.mxu1 (!%p237_p2), %v841_v20  ;;  %v843_v22 = vld [vmem:[%s1056_s3 + $0x8] sm:$0xff] (!%p237_p2)   ;;  %v845_v24 = vld [vmem:[%s1056_s3 + $0x10] sm:$0xff] (!%p237_p2)   ;;  %v846_v25 = vld [vmem:[%s1056_s3 + $0x58] sm:$0xff] (!%p237_p2)  }
   0xd   : > { %s1062_s25 = smov (!%p266_p3, %s740_s25), 1  ;;  %786 = vmatprep.subr.bf16.mxu1 %v842_v21  ;;  %v847_v26 = vld [vmem:[%s1056_s3 + $0x18] sm:$0xff]   ;;  %v848_v27 = vld [vmem:[%s1056_s3 + $0x60] sm:$0xff]   ;;  %v850_v29 = vld [vmem:[%s1056_s3 + $0x68] sm:$0xff]   ;;  %v297_v37 = vsub.s32 0, %v296_v36  ;;  %v301_v39 = vsub.s32 1, %v296_v36 }
   0xe   : > { %s745_s19 = sshll.u32 %s1062_s25, 3  ;;  %v849_v28 = vld [vmem:[%s1056_s3 + $0x20] sm:$0xff]   ;;  %v851_v30 = vld [vmem:[%s1056_s3 + $0x28] sm:$0xff]   ;;  %v852_v31 = vld [vmem:[%s1056_s3 + $0x70] sm:$0xff]  }
   0xf   : > { %390 = vmatpush1.bf16.msra.mxu0 %v824_v6  ;;  %s269_s15 = scalar_lea.vmem %s1053_s0, %s745_s19  ;;  %v853_v32 = vld [vmem:[%s1056_s3 + $0x30] sm:$0xff]   ;;  %v854_v33 = vld [vmem:[%s1056_s3 + $0x78] sm:$0xff]   ;;  %v293_v38 = vld [vmem:[%s1055_s2] sm:$0x3]  ;;  %s273_s21 = scalar_lea.vmem %s1060_s7, %s745_s19 }
  0x10   : > { %391 = vmatprep.subr.bf16.mxu0 %v825_v7  ;;  %v980_v17 = vld [vmem:[%s269_s15] sm:$0xff]  ;;  %787 = vmatpush3.bf16.msra.mxu1 %v843_v22  ;;  %v855_v34 = vld [vmem:[%s1056_s3 + $0x38] sm:$0xff]   ;;  %v298_v40 = vrot.slane %v293_v38, %v297_v37  ;;  %v302_v41 = vrot.slane %v293_v38, %v301_v39 }
  0x11   : > { %v276_v18 = vpack.c.bf16 %v980_v17, %v980_v17  ;;  %788 = vmatprep.subr.bf16.mxu1 %v844_v23  ;;  %v763_v39 = vld [vmem:[%s1057_s4] ss:$0 sm:$0xff] }
  0x13   : > { %392 = vmatpush1.bf16.msra.mxu0 %v827_v8 }
  0x14   : > { %393 = vmatprep.subr.bf16.mxu0 %v828_v9  ;;  %789 = vmatpush3.bf16.msra.mxu1 %v845_v24 }
  0x15   : > { %790 = vmatprep.subr.bf16.mxu1 %v846_v25 }
  0x17   : > { %394 = vmatpush1.bf16.msra.mxu0 %v830_v10 }
  0x18   : > { %395 = vmatprep.subr.bf16.mxu0 %v831_v11  ;;  %791 = vmatpush3.bf16.msra.mxu1 %v847_v26 }
  0x19   : > { %792 = vmatprep.subr.bf16.mxu1 %v848_v27 }
  0x1b   : > { %396 = vmatpush1.bf16.msra.mxu0 %v833_v12 }
  0x1c   : > { %397 = vmatprep.subr.bf16.mxu0 %v834_v13  ;;  %793 = vmatpush3.bf16.msra.mxu1 %v849_v28 }
  0x1d   : > { %794 = vmatprep.subr.bf16.mxu1 %v850_v29 }
  0x1f   : > { %398 = vmatpush1.bf16.msra.mxu0 %v836_v14 }
  0x20   : > { %399 = vmatprep.subr.bf16.mxu0 %v837_v15  ;;  %795 = vmatpush3.bf16.msra.mxu1 %v851_v30 }
  0x21   : > { %796 = vmatprep.subr.bf16.mxu1 %v852_v31 }
  0x23   : > { %400 = vmatpush1.bf16.msra.mxu0 %v839_v16 }
  0x24   : > { %797 = vmatpush3.bf16.msra.mxu1 %v853_v32 }
  0x25   : > { %798 = vmatprep.subr.bf16.mxu1 %v854_v33 }
  0x26   : > { %418 = vmatmul.mubr.bf16.vlgmr.msra.gmra.mrb[0].mxu0 %v276_v18 }
  0x28   : > { %799 = vmatpush3.bf16.msra.mxu1 %v855_v34 }
  0xf9   : > { %v419_v42 = vpop.f32.mrb[0].mxu0 }
  0xfa   : > { %v420_v43 = vadd.f32 %v419_v42, %v298_v40  ;;  %v421_v44 = vpop.f32.mrb[1].mxu0 }
  0xfb   : > { %v422_v45 = vadd.f32 %v421_v44, %v302_v41  ;;  %v423_v46 = vpop.f32.mrb[2].mxu0 }
  0xfc   : > { %v428_v47 = vmul.f32 0.70710677, %v420_v43  ;;  %v424_v48 = vpop.f32.mrb[3].mxu0  ;;  %v426_v30 = vmul.f32 0.5, %v420_v43 }
  0xfd   : > { %v429_v49 = vmul.f32 0.70710677, %v422_v45  ;;  %v427_v32 = vmul.f32 0.5, %v422_v45 }
  0xfe   : > { %vm430_vm0 = vcmp.ge.f32.partialorder %v428_v47, 0.0 }
  0xff   : > { %v432_v51 = vsel %vm430_vm0, 1.0, %v875_v50  ;;  %vm431_vm1 = vcmp.ge.f32.partialorder %v429_v49, 0.0 }
 0x100   : > { %v434_v52 = vmul.f32 %v432_v51, %v428_v47  ;;  %v433_v53 = vsel %vm431_vm1, 1.0, %v875_v50 }
 0x101   : > { %v435_v54 = vmul.f32 %v433_v53, %v429_v49 }
 0x102   : > { %v436_v55 = vmul.f32 0.3275911, %v434_v52  ;;  %v462_v59 = vsub.f32 0.0, %v434_v52 }
 0x103   : > { %v437_v56 = vmul.f32 0.3275911, %v435_v54  ;;  %v463_v60 = vsub.f32 0.0, %v435_v54 }
 0x104   : > { %v438_v57 = vadd.f32 1.0, %v436_v55  ;;  %v464_v62 = vmul.f32 %v462_v59, %v434_v52 }
 0x105   : > { %v439_v58 = vadd.f32 1.0, %v437_v56  ;;  %v465_v1 = vmul.f32 %v463_v60, %v435_v54  ;;  %v780_v54 = vld [vmem:[%s1058_s5] ss:$0 sm:$0xff] }
 0x106   : > { %856 = vrcp.f32 %v438_v57  ;;  %v466_v4 = vmul.f32 1.442695, %v464_v62 }
 0x107   : > { %858 = vrcp.f32 %v439_v58  ;;  %v468_v7 = vmul.f32 1.442695, %v465_v1 }
 0x108   : > { %860 = vpow2.f32 %v466_v4 }
 0x109   : > { %862 = vpow2.f32 %v468_v7 }
 0x110   : > { %v857_v61 = vpop.eup %856 }
 0x111   : > { %v859_v63 = vpop.eup %858  ;;  %v444_v0 = vmul.f32 1.0614054, %v857_v61 }
 0x112   : > { %v445_v2 = vmul.f32 1.0614054, %v859_v63  ;;  %v861_v21 = vpop.eup %860 }
 0x113   : > { %v446_v3 = vadd.f32 -1.4531521, %v444_v0  ;;  %v863_v23 = vpop.eup %862 }
 0x114   : > { %v447_v5 = vadd.f32 -1.4531521, %v445_v2 }
 0x115   : > { %v448_v6 = vmul.f32 %v857_v61, %v446_v3 }
 0x116   : > { %v449_v8 = vmul.f32 %v859_v63, %v447_v5 }
 0x117   : > { %v450_v9 = vadd.f32 1.4214138, %v448_v6 }
 0x118   : > { %v451_v10 = vadd.f32 1.4214138, %v449_v8 }
 0x119   : > { %v452_v11 = vmul.f32 %v857_v61, %v450_v9 }
 0x11a   : > { %v453_v12 = vmul.f32 %v859_v63, %v451_v10 }
 0x11b   : > { %v454_v13 = vadd.f32 -0.28449672, %v452_v11 }
 0x11c   : > { %v455_v14 = vadd.f32 -0.28449672, %v453_v12 }
 0x11d   : > { %v456_v15 = vmul.f32 %v857_v61, %v454_v13 }
 0x11e   : > { %v457_v16 = vmul.f32 %v859_v63, %v455_v14 }
 0x11f   : > { %v458_v18 = vadd.f32 0.2548296, %v456_v15 }
 0x120   : > { %v459_v19 = vadd.f32 0.2548296, %v457_v16 }
 0x121   : > { %v460_v20 = vmul.f32 %v857_v61, %v458_v18 }
 0x122   : > { %v461_v22 = vmul.f32 %v859_v63, %v459_v19 }
 0x123   : > { %v470_v24 = vmul.f32 %v861_v21, %v460_v20 }
 0x124   : > { %v471_v25 = vmul.f32 %v863_v23, %v461_v22 }
 0x125   : > { %v472_v26 = vsub.f32 1.0, %v470_v24 }
 0x126   : > { %v473_v27 = vsub.f32 1.0, %v471_v25 }
 0x127   : > { %v474_v28 = vmul.f32 %v472_v26, %v432_v51 }
 0x128   : > { %v475_v29 = vmul.f32 %v473_v27, %v433_v53 }
 0x129   : > { %v476_v31 = vadd.f32 1.0, %v474_v28 }
 0x12a   : > { %v477_v33 = vadd.f32 1.0, %v475_v29 }
 0x12b   : > { %v478_v34 = vmul.f32 %v476_v31, %v426_v30 }
 0x12c   : > { %v479_v35 = vmul.f32 %v477_v33, %v427_v32 }
 0x12d   : > { %v480_v37 = vpack.c.bf16 %v478_v34, %v478_v34 }
 0x12e   : > { %v481_v36 = vpack.c.bf16 %v479_v35, %v479_v35 }
 0x130   : > { %649 = vmatprep.mubr.bf16.mxu1 %v481_v36 }
 0x131   : > { %650 = vmatmul.mubr.bf16.vlgmr.msra.gmra.mrb[0].mxu1 %v480_v37 }
 0x204   : > { %v800_v38 = vpop.f32.mrb[0].mxu1 }
 0x205   : > { %v801_v40 = vpop.f32.mrb[1].mxu1 }
 0x206   : > { %v802_v41 = vadd.f32 %v801_v40, %v800_v38  ;;  %v803_v42 = vpop.f32.mrb[2].mxu1 }
 0x207   : > { %v804_v44 = vpop.f32.mrb[3].mxu1 }
 0x208   : > { %v652_v46 = vadd.f32 %v802_v41, %v763_v39 }
 0x20a   : > { %v657_v43 = vadd.f32 %v652_v46, %v980_v17  ;;  %v781_v17 = vld [vmem:[%s1059_s6] ss:$0 sm:$0xff] }
 0x20c   : > { %660 = vadd.xlane.f32.xlu0 %v657_v43 }
 0x299   : > { %v661_v45 = vpop.xlane.xlu0 %660 }
 0x29a   : > { %v663_v47 = vmul.f32 0.0078125, %v661_v45 }
 0x29c   : > { %v664_v48 = vsub.f32 %v657_v43, %v663_v47 }
 0x29e   : > { %v665_v49 = vmul.f32 %v664_v48, %v664_v48 }
 0x2a0   : > { %666 = vadd.xlane.f32.xlu0 %v665_v49 }
 0x32d   : > { %v667_v50 = vpop.xlane.xlu0 %666 }
 0x32e   : > { %v668_v51 = vmul.f32 0.0078125, %v667_v50 }
 0x330   : > { %v669_v52 = vadd.f32 1e-05, %v668_v51 }
 0x332   : > { %864 = vrsqrt.f32 %v669_v52 }
 0x33c   : > { %v865_v53 = vpop.eup %864 }
 0x33d   : > { %v671_v55 = vmul.f32 %v865_v53, %v664_v48 }
 0x33f   : > { %v678_v56 = vmul.f32 %v780_v54, %v671_v55 }
 0x341   : > { %v685_v57 = vadd.f32 %v781_v17, %v678_v56 }
 0x343   : > { %686 = vst [vmem:[%s273_s21] sm:$0xff] %v685_v57 }
 0x344 PF: > { %s17_s24 = sadd.s32 1, %s872_s24  }
 0x345   : > { %p14_p4 = scmp.ge.s32.totalorder %s17_s24, 4  }
 0x347   :  { %16 = sbr.rel (!%p14_p4) target bundleno = 1 (0x1), region = 78 }

// kernel: _lambda_.14
= control target key start
LH: loop header
LB: loop body
LE: loop exit
PB: predicated region body
PF: predicated region fallthrough
CT: control target
= control target key end

     0   :  { %s1273_s26 = smov 0   ;;  %s1459_s0 = inlined_call_operand.vmem [shape: f32[2,8,128], index: 0, kind: input, shape index: {}, may-alias: {0,1}]   ;;  %s1460_s1 = inlined_call_operand.vmem [shape: f32[2,8,128], index: 1, kind: input, shape index: {}, may-alias: {0,1}]   ;;  %s1461_s2 = inlined_call_operand.vmem [shape: bf16[128,384], index: 2, kind: input, shape index: {}]   ;;  %s1462_s3 = inlined_call_operand.vmem [shape: f32[1,384], index: 3, kind: input, shape index: {}]   ;;  %s1463_s4 = inlined_call_operand.vmem [shape: bf16[128,128], index: 4, kind: input, shape index: {}]   ;;  %s1464_s5 = inlined_call_operand.vmem [shape: f32[1,128], index: 5, kind: input, shape index: {}]   ;;  %s1465_s6 = inlined_call_operand.vmem [shape: f32[1,128], index: 6, kind: input, shape index: {}]   ;;  %s1466_s7 = inlined_call_operand.vmem [shape: f32[1,128], index: 7, kind: input, shape index: {}]   ;;  %s1467_s8 = inlined_call_operand.vmem [shape: f32[2,8,128], index: 8, kind: output, shape index: {}]  }
   0x1 LB: > { %s1016_s27 = sadd.s32 4294967295, %s1222_s26   ;;  %p1020_p0 = scmp.ge.s32.totalorder %s1222_s26, 1  ;;  %s1222_s26 = sphi %s1273_s26, %s18_s26  }
   0x2   : > { %p270_p1 = scmp.lt.s32.totalorder %s1222_s26, 3 }
   0x4   : > { %p271_p2 = pnand %p1020_p0, %p270_p1 }
   0x5   : > { %v1166_v0 = vld [vmem:[%s1461_s2 + $0x4] ss:$12 sps:$4 sm:$0xff] (!%p271_p2)   ;;  %v1168_v1 = vld [vmem:[%s1461_s2] ss:$12 sps:$4 sm:$0xff] (!%p271_p2)   ;;  %v1224_v2 = vmov (!%p271_p2), 0   ;;  %v1225_v4 = vmov (!%p271_p2), 0.0   ;;  %v355_v28 = vlaneseq (!%p271_p2) }
   0x6   : > { %274 = sbr.rel (%p271_p2) target bundleno = 2189 (0x88d), region = 52  ;;  %530 = vmatprep.mubr.bf16.mxu0 (!%p271_p2), %v1224_v2  ;;  %498 = vmatprep.subr.bf16.mxu0 (!%p271_p2), %v1166_v0  ;;  %v1169_v3 = vld [vmem:[%s1461_s2 + $0x1c] ss:$12 sps:$4 sm:$0xff] (!%p271_p2)   ;;  %v1171_v5 = vld [vmem:[%s1461_s2 + $0x18] ss:$12 sps:$4 sm:$0xff] (!%p271_p2)   ;;  %p306_p3 = scmp.lt.s32.totalorder (!%p271_p2), %s1016_s27, 1 }
   0x7   : > { %1090 = vmatprep.subr.bf16.mxu1 (!%p271_p2), %v1225_v4  ;;  %499 = vmatpush1.bf16.msra.mxu0 (!%p271_p2), %v1168_v1  ;;  %v1172_v6 = vld [vmem:[%s1461_s2 + $0x34] ss:$12 sps:$4 sm:$0xff] (!%p271_p2)   ;;  %v1174_v7 = vld [vmem:[%s1461_s2 + $0x30] ss:$12 sps:$4 sm:$0xff] (!%p271_p2)   ;;  %v1175_v8 = vld [vmem:[%s1461_s2 + $0x4c] ss:$12 sps:$4 sm:$0xff] (!%p271_p2)  }
   0x8   : > { %500 = vmatprep.subr.bf16.mxu0 (!%p271_p2), %v1169_v3  ;;  %v1177_v9 = vld [vmem:[%s1461_s2 + $0x48] ss:$12 sps:$4 sm:$0xff] (!%p271_p2)   ;;  %v1178_v11 = vld [vmem:[%s1461_s2 + $0x64] ss:$12 sps:$4 sm:$0xff] (!%p271_p2)   ;;  %v1191_v12 = vld [vmem:[%s1461_s2 + $0x20] ss:$12 sps:$4 sm:$0xff] (!%p271_p2)  }
   0x9   : > { %v1190_v10 = vld [vmem:[%s1461_s2 + $0x8] ss:$12 sps:$4 sm:$0xff] (!%p271_p2)   ;;  %v1180_v13 = vld [vmem:[%s1461_s2 + $0x60] ss:$12 sps:$4 sm:$0xff] (!%p271_p2)   ;;  %v1183_v15 = vld [vmem:[%s1461_s2 + $0x78] ss:$12 sps:$4 sm:$0xff] (!%p271_p2)  }
   0xa   : > { %1091 = vmatpush3.bf16.msra.mxu1 (!%p271_p2), %v1190_v10  ;;  %v1181_v14 = vld [vmem:[%s1461_s2 + $0x7c] ss:$12 sps:$4 sm:$0xff] (!%p271_p2)   ;;  %v1192_v16 = vld [vmem:[%s1461_s2 + $0x38] ss:$12 sps:$4 sm:$0xff] (!%p271_p2)   ;;  %v1184_v17 = vld [vmem:[%s1461_s2 + $0x94] ss:$12 sps:$4 sm:$0xff] (!%p271_p2)  }
   0xb   : > { %501 = vmatpush1.bf16.msra.mxu0 (!%p271_p2), %v1171_v5  ;;  %1092 = vmatprep.subr.bf16.mxu1 (!%p271_p2), %v1225_v4  ;;  %v1193_v18 = vld [vmem:[%s1461_s2 + $0x50] ss:$12 sps:$4 sm:$0xff] (!%p271_p2)   ;;  %v1187_v20 = vld [vmem:[%s1461_s2 + $0xac] ss:$12 sps:$4 sm:$0xff] (!%p271_p2)   ;;  %v1194_v21 = vld [vmem:[%s1461_s2 + $0x68] ss:$12 sps:$4 sm:$0xff] (!%p271_p2)  }
   0xc   : > { %502 = vmatprep.subr.bf16.mxu0 (!%p271_p2), %v1172_v6  ;;  %v1186_v19 = vld [vmem:[%s1461_s2 + $0x90] ss:$12 sps:$4 sm:$0xff] (!%p271_p2)   ;;  %v1189_v22 = vld [vmem:[%s1461_s2 + $0xa8] ss:$12 sps:$4 sm:$0xff] (!%p271_p2)   ;;  %v1195_v24 = vld [vmem:[%s1461_s2 + $0x80] ss:$12 sps:$4 sm:$0xff] (!%p271_p2)  }
   0xd   : > { %s1469_s27 = smov (!%p306_p3, %s1016_s27), 1  ;;  %v1196_v26 = vld [vmem:[%s1461_s2 + $0x98] ss:$12 sps:$4 sm:$0xff]   ;;  %v1197_v27 = vld [vmem:[%s1461_s2 + $0xb0] ss:$12 sps:$4 sm:$0xff]   ;;  %vm1226_vm0 = vmmov 0  }
   0xe   : > { %s1021_s29 = sshll.u32 %s1469_s27, 3  ;;  %1093 = vmatpush3.bf16.msra.mxu1 %v1191_v12  ;;  %1106 = vmatprep.mubr.msk.bf16.mxu1 %vm1226_vm0, %v1225_v4  ;;  %v356_v29 = vshrl.u32 %v355_v28, 7  ;;  %v353_v31 = vld [vmem:[%s1462_s3] sm:$0x7]  ;;  %vm582_vm1 = vcmask 523264   ;;  %s1227_s19 = smov 64  }
   0xf   : > { %503 = vmatpush1.bf16.msra.mxu0 %v1174_v7  ;;  %1094 = vmatprep.subr.bf16.mxu1 %v1225_v4  ;;  %s309_s1 = scalar_lea.vmem %s1459_s0, %s1021_s29  ;;  %vm646_vm2 = vcmask 1043456   ;;  %vm630_vm3 = vcmask 64512   ;;  %s317_s24 = scalar_lea.vmem %s1467_s8, %s1021_s29 }
  0x10   : > { %504 = vmatprep.subr.bf16.mxu0 %v1175_v8  ;;  %v1357_v23 = vld [vmem:[%s309_s1] sm:$0xff]  ;;  %v361_v30 = vsub.s32 1, %v356_v29  ;;  %v357_v32 = vsub.s32 0, %v356_v29  ;;  %v365_v44 = vsub.s32 2, %v356_v29 }
  0x11   : > { %v320_v25 = vpack.c.bf16 %v1357_v23, %v1357_v23 }
  0x12   : > { %1095 = vmatpush3.bf16.msra.mxu1 %v1192_v16  ;;  %v362_v33 = vrot.slane %v353_v31, %v361_v30  ;;  %v358_v34 = vrot.slane %v353_v31, %v357_v32  ;;  %v366_v45 = vrot.slane %v353_v31, %v365_v44  ;;  %v1198_v30 = vld [vmem:[%s1463_s4] sm:$0xff]   ;;  %v1199_v31 = vld [vmem:[%s1463_s4 + $0x8] sm:$0xff]   ;;  %v1200_v32 = vld [vmem:[%s1463_s4 + $0x10] sm:$0xff]  }
  0x13   : > { %505 = vmatpush1.bf16.msra.mxu0 %v1177_v9  ;;  %1096 = vmatprep.subr.bf16.mxu1 %v1225_v4 }
  0x14   : > { %506 = vmatprep.subr.bf16.mxu0 %v1178_v11 }
  0x16   : > { %1097 = vmatpush3.bf16.msra.mxu1 %v1193_v18 }
  0x17   : > { %507 = vmatpush1.bf16.msra.mxu0 %v1180_v13  ;;  %1098 = vmatprep.subr.bf16.mxu1 %v1225_v4 }
  0x18   : > { %508 = vmatprep.subr.bf16.mxu0 %v1181_v14 }
  0x1a   : > { %1099 = vmatpush3.bf16.msra.mxu1 %v1194_v21 }
  0x1b   : > { %509 = vmatpush1.bf16.msra.mxu0 %v1183_v15  ;;  %1100 = vmatprep.subr.bf16.mxu1 %v1225_v4 }
  0x1c   : > { %510 = vmatprep.subr.bf16.mxu0 %v1184_v17 }
  0x1e   : > { %1101 = vmatpush3.bf16.msra.mxu1 %v1195_v24 }
  0x1f   : > { %511 = vmatpush1.bf16.msra.mxu0 %v1186_v19  ;;  %1102 = vmatprep.subr.bf16.mxu1 %v1225_v4 }
  0x20   : > { %512 = vmatprep.subr.bf16.mxu0 %v1187_v20 }
  0x22   : > { %1103 = vmatpush3.bf16.msra.mxu1 %v1196_v26 }
  0x23   : > { %513 = vmatpush1.bf16.msra.mxu0 %v1189_v22  ;;  %1104 = vmatprep.subr.bf16.mxu1 %v1225_v4 }
  0x24   : > { %1134 = vmatprep.subr.bf16.mxu0 %v1225_v4 }
  0x26   : > { %531 = vmatmul.mubr.bf16.vlgmr.msra.gmra.mrb[0].mxu0 %v320_v25  ;;  %1105 = vmatpush3.bf16.msra.mxu1 %v1197_v27 }
  0x27   : > { %1110 = vmatprep.subr.bf16.mxu1 %v1225_v4  ;;  %1150 = vmatprep.mubr.msk.bf16.mxu0 %vm1226_vm0, %v1225_v4 }
  0x28   : > { %1135 = vmatpush3.bf16.msra.mxu0 %v1198_v30 }
  0x29   : > { %1107 = vmatmul.mubr.bf16.vlgmr.msra.gmra.mrb[0].mxu1 %v320_v25  ;;  %1136 = vmatprep.subr.bf16.mxu0 %v1225_v4 }
  0x2a   : > { %1112 = vmatprep.mubr.msk.bf16.mxu1 %vm1226_vm0, %v1225_v4 }
  0x2c   : > { %1137 = vmatpush3.bf16.msra.mxu0 %v1199_v31 }
  0x2d   : > { %1138 = vmatprep.subr.bf16.mxu0 %v1225_v4 }
  0x30   : > { %1139 = vmatpush3.bf16.msra.mxu0 %v1200_v32 }
  0x31   : > { %1140 = vmatprep.subr.bf16.mxu0 %v1225_v4 }
  0xf9   : > { %v532_v35 = vpop.f32.mrb[0].mxu0 }
  0xfa   : > { %v534_v36 = vpop.f32.mrb[1].mxu0  ;;  %v533_v40 = vadd.f32 %v532_v35, %v358_v34  ;;  %v1202_v34 = vld [vmem:[%s1463_s4 + $0x20] sm:$0xff]   ;;  %v1203_v35 = vld [vmem:[%s1463_s4 + $0x28] sm:$0xff]  }
  0xfb   : > { %v535_v37 = vadd.f32 %v534_v36, %v362_v33  ;;  %v536_v38 = vpop.f32.mrb[2].mxu0  ;;  %v1201_v33 = vld [vmem:[%s1463_s4 + $0x18] sm:$0xff]   ;;  %v1204_v36 = vld [vmem:[%s1463_s4 + $0x30] sm:$0xff]  }
  0xfc   : > { %v537_v39 = vpop.f32.mrb[3].mxu0  ;;  %v579_v43 = vpack.c.bf16 %v533_v40, %v533_v40  ;;  %v573_v46 = vpop.f32.mrb[0].mxu1  ;;  %1141 = vmatpush3.bf16.msra.mxu0 %v1201_v33 }
  0xfd   : > { %v580_v41 = vpack.c.bf16 %v535_v37, %v535_v37  ;;  %v574_v47 = vadd.f32 %v573_v46, %v366_v45  ;;  %v1108_v48 = vpop.f32.mrb[1].mxu1  ;;  %1142 = vmatprep.subr.bf16.mxu0 %v1225_v4  ;;  %v1205_v37 = vld [vmem:[%s1463_s4 + $0x38] sm:$0xff]  }
  0xfe   : > { %v576_v49 = vpop.f32.mrb[2].mxu1 }
  0xff   : > { %v587_v42 = vsel %vm582_vm1, %v580_v41, 0  ;;  %694 = vrot.lane.b32.xlu1 %v580_v41, %s1227_s19  ;;  %v581_v50 = vpack.c.bf16 %v574_v47, %v574_v47  ;;  %v1109_v51 = vpop.f32.mrb[3].mxu1 }
 0x100   : > { %1111 = vmatpush3.bf16.xpose.msra.mxu1 %v587_v42  ;;  %1143 = vmatpush3.bf16.msra.mxu0 %v1202_v34 }
 0x101   : > { %1116 = vmatprep.subr.bf16.mxu1 %v1225_v4  ;;  %v648_v52 = vsel %vm646_vm2, %v581_v50, 0  ;;  %1144 = vmatprep.subr.bf16.mxu0 %v1225_v4 }
 0x103   : > { %691 = vrot.lane.b32.xlu1 %v579_v43, %s1227_s19 }
 0x104   : > { %1145 = vmatpush3.bf16.msra.mxu0 %v1203_v35 }
 0x105   : > { %1146 = vmatprep.subr.bf16.mxu0 %v1225_v4 }
 0x107   : > { %1113 = vmatmul.mubr.msk.bf16.vlgmr.msra.gmra.mrb[4].mxu1 %vm582_vm1, %v579_v43 }
 0x108   : > { %1118 = vmatprep.mubr.msk.bf16.mxu1 %vm1226_vm0, %v1225_v4  ;;  %1117 = vmatpush3.bf16.msra.mxu1 %v648_v52 }
 0x109   : > { %1122 = vmatprep.subr.bf16.mxu1 %v1225_v4  ;;  %1147 = vmatpush3.bf16.msra.mxu0 %v1204_v36 }
 0x10a   : > { %1148 = vmatprep.subr.bf16.mxu0 %v1225_v4 }
 0x10d   : > { %1149 = vmatpush3.bf16.msra.mxu0 %v1205_v37 }
 0x171   : > { %v695_v3 = vpop.permute.xlu1 %694 }
 0x172   : > { %v700_v6 = vsel %vm582_vm1, %v695_v3, 0 }
 0x175   : > { %v692_v7 = vpop.permute.xlu1 %691 }
 0x1da   : > { %v623_v53 = vpop.f32.mrb[4].mxu1 }
 0x1db   : > { %v629_v54 = vmul.f32 0.125, %v623_v53  ;;  %v1114_v55 = vpop.f32.mrb[5].mxu1 }
 0x1dc   : > { %v626_v56 = vpop.f32.mrb[6].mxu1 }
 0x1dd   : > { %v1115_v57 = vpop.f32.mrb[7].mxu1  ;;  %v631_v58 = vsel %vm630_vm3, %v629_v54, -inf }
 0x1de   : > { %632 = vmax.xlane.f32.xlu0 %v631_v58 }
 0x26b   : > { %v633_v59 = vpop.xlane.xlu0 %632 }
 0x26c   : > { %v634_v60 = vsub.f32 %v629_v54, %v633_v59  ;;  %v1060_v59 = vld [vmem:[%s1465_s6] ss:$0 sm:$0xff] }
 0x26e   : > { %v635_v61 = vmul.f32 1.442695, %v634_v60 }
 0x270   : > { %1206 = vpow2.f32 %v635_v61 }
 0x27a   : > { %v1207_v62 = vpop.eup %1206 }
 0x27b   : > { %v637_v63 = vsel %vm630_vm3, %v1207_v62, 0.0 }
 0x27c   : > { %638 = vadd.xlane.f32.xlu0 %v637_v63 }
 0x309   : > { %v639_v0 = vpop.xlane.xlu0 %638 }
 0x30a   : > { %1208 = vrcp.f32 %v639_v0 }
 0x314   : > { %v1209_v1 = vpop.eup %1208 }
 0x315   : > { %v641_v2 = vmul.f32 %v1209_v1, %v1207_v62 }
 0x317   : > { %v642_v5 = vpack.c.bf16 %v641_v2, %v641_v2 }
 0x319   : > { %1119 = vmatmul.mubr.msk.bf16.vlgmr.msra.gmra.mrb[8].mxu1 %vm630_vm3, %v642_v5 }
 0x31a   : > { %1123 = vmatpush3.bf16.xpose.msra.mxu1 %v700_v6  ;;  %1124 = vmatprep.mubr.msk.bf16.mxu1 %vm1226_vm0, %v1225_v4 }
 0x31b   : > { %1128 = vmatprep.subr.bf16.mxu1 %v1225_v4 }
 0x321   : > { %1125 = vmatmul.mubr.msk.bf16.vlgmr.msra.gmra.mrb[12].mxu1 %vm582_vm1, %v692_v7 }
 0x322   : > { %1130 = vmatprep.mubr.msk.bf16.mxu1 %vm1226_vm0, %v1225_v4  ;;  %v1051_v4 = vld [vmem:[%s1464_s5] ss:$0 sm:$0xff] }
 0x3ec   : > { %v684_v8 = vpop.f32.mrb[8].mxu1 }
 0x3ed   : > { %v1120_v9 = vpop.f32.mrb[9].mxu1 }
 0x3ee   : > { %v687_v10 = vpop.f32.mrb[10].mxu1 }
 0x3ef   : > { %v1121_v11 = vpop.f32.mrb[11].mxu1 }
 0x3f4   : > { %v736_v12 = vpop.f32.mrb[12].mxu1 }
 0x3f5   : > { %v742_v13 = vmul.f32 0.125, %v736_v12  ;;  %v1126_v14 = vpop.f32.mrb[13].mxu1 }
 0x3f6   : > { %v739_v15 = vpop.f32.mrb[14].mxu1 }
 0x3f7   : > { %v1127_v16 = vpop.f32.mrb[15].mxu1  ;;  %v743_v17 = vsel %vm630_vm3, %v742_v13, -inf }
 0x3f8   : > { %744 = vmax.xlane.f32.xlu0 %v743_v17 }
 0x40e   : > { %756 = vrot.lane.b32.xlu0 %v581_v50, %s1227_s19 }
 0x485   : > { %v745_v18 = vpop.xlane.xlu0 %744 }
 0x486   : > { %v746_v19 = vsub.f32 %v742_v13, %v745_v18 }
 0x488   : > { %v747_v20 = vmul.f32 1.442695, %v746_v19 }
 0x489   : > { %v757_v21 = vpop.permute.xlu0 %756 }
 0x48a   : > { %1210 = vpow2.f32 %v747_v20  ;;  %v762_v22 = vsel %vm646_vm2, %v757_v21, 0 }
 0x48b   : > { %1129 = vmatpush3.bf16.msra.mxu1 %v762_v22 }
 0x494   : > { %v1211_v24 = vpop.eup %1210 }
 0x495   : > { %v749_v25 = vsel %vm630_vm3, %v1211_v24, 0.0 }
 0x496   : > { %750 = vadd.xlane.f32.xlu1 %v749_v25 }
 0x523   : > { %v751_v26 = vpop.xlane.xlu1 %750 }
 0x524   : > { %1212 = vrcp.f32 %v751_v26 }
 0x52e   : > { %v1213_v27 = vpop.eup %1212 }
 0x52f   : > { %v753_v28 = vmul.f32 %v1213_v27, %v1211_v24 }
 0x531   : > { %v754_v29 = vpack.c.bf16 %v753_v28, %v753_v28 }
 0x533   : > { %1131 = vmatmul.mubr.msk.bf16.vlgmr.msra.gmra.mrb[16].mxu1 %vm630_vm3, %v754_v29 }
 0x606   : > { %v798_v38 = vpop.f32.mrb[16].mxu1 }
 0x607   : > { %805 = vrot.lane.b32.xlu0 %v798_v38, %s1227_s19  ;;  %v1132_v39 = vpop.f32.mrb[17].mxu1 }
 0x608   : > { %v801_v40 = vpop.f32.mrb[18].mxu1 }
 0x609   : > { %v1133_v41 = vpop.f32.mrb[19].mxu1 }
 0x679   : > { %v806_v42 = vpop.permute.xlu0 %805 }
 0x67a   : > { %v808_v43 = vsel %vm582_vm1, %v684_v8, %v806_v42 }
 0x67b   : > { %v809_v44 = vpack.c.bf16 %v808_v43, %v808_v43 }
 0x67d   : > { %1151 = vmatmul.mubr.bf16.vlgmr.msra.gmra.mrb[4].mxu0 %v809_v44 }
 0x750   : > { %v915_v45 = vpop.f32.mrb[4].mxu0 }
 0x751   : > { %v916_v46 = vadd.f32 %v1051_v4, %v915_v45  ;;  %v1152_v47 = vpop.f32.mrb[5].mxu0 }
 0x752   : > { %v918_v48 = vpop.f32.mrb[6].mxu0 }
 0x753   : > { %v1153_v49 = vpop.f32.mrb[7].mxu0  ;;  %v921_v50 = vadd.f32 %v916_v46, %v1357_v23  ;;  %v1061_v23 = vld [vmem:[%s1466_s7] ss:$0 sm:$0xff] }
 0x755   : > { %924 = vadd.xlane.f32.xlu0 %v921_v50 }
 0x7e2   : > { %v925_v51 = vpop.xlane.xlu0 %924 }
 0x7e3   : > { %v927_v52 = vmul.f32 0.0078125, %v925_v51 }
 0x7e5   : > { %v928_v53 = vsub.f32 %v921_v50, %v927_v52 }
 0x7e7   : > { %v929_v54 = vmul.f32 %v928_v53, %v928_v53 }
 0x7e9   : > { %930 = vadd.xlane.f32.xlu1 %v929_v54 }
 0x876   : > { %v931_v55 = vpop.xlane.xlu1 %930 }
 0x877   : > { %v932_v56 = vmul.f32 0.0078125, %v931_v55 }
 0x879   : > { %v933_v57 = vadd.f32 1e-05, %v932_v56 }
 0x87b   : > { %1214 = vrsqrt.f32 %v933_v57 }
 0x885   : > { %v1215_v58 = vpop.eup %1214 }
 0x886   : > { %v935_v60 = vmul.f32 %v1215_v58, %v928_v53 }
 0x888   : > { %v942_v61 = vmul.f32 %v1060_v59, %v935_v60 }
 0x88a   : > { %v949_v62 = vadd.f32 %v1061_v23, %v942_v61 }
 0x88c   : > { %950 = vst [vmem:[%s317_s24] sm:$0xff] %v949_v62 }
 0x88d PF: > { %s18_s26 = sadd.s32 1, %s1222_s26  }
 0x88e   : > { %p15_p4 = scmp.ge.s32.totalorder %s18_s26, 4  }
 0x890   :  { %17 = sbr.rel (!%p15_p4) target bundleno = 1 (0x1), region = 85 }

// kernel: _lambda_.19
= control target key start
LH: loop header
LB: loop body
LE: loop exit
PB: predicated region body
PF: predicated region fallthrough
CT: control target
= control target key end

     0   :  { %s1280_s26 = smov 0   ;;  %s1476_s0 = inlined_call_operand.vmem [shape: f32[2,8,128], index: 0, kind: input, shape index: {}, may-alias: {0,1}]   ;;  %s1477_s1 = inlined_call_operand.vmem [shape: f32[2,8,128], index: 1, kind: input, shape index: {}, may-alias: {0,1}]   ;;  %s1478_s2 = inlined_call_operand.vmem [shape: bf16[128,384], index: 2, kind: input, shape index: {}]   ;;  %s1479_s3 = inlined_call_operand.vmem [shape: f32[1,384], index: 3, kind: input, shape index: {}]   ;;  %s1480_s4 = inlined_call_operand.vmem [shape: bf16[128,128], index: 4, kind: input, shape index: {}]   ;;  %s1481_s5 = inlined_call_operand.vmem [shape: f32[1,128], index: 5, kind: input, shape index: {}]   ;;  %s1482_s6 = inlined_call_operand.vmem [shape: f32[1,128], index: 6, kind: input, shape index: {}]   ;;  %s1483_s7 = inlined_call_operand.vmem [shape: f32[1,128], index: 7, kind: input, shape index: {}]   ;;  %s1484_s8 = inlined_call_operand.vmem [shape: f32[2,8,128], index: 8, kind: output, shape index: {}]  }
   0x1 LB: > { %s1023_s27 = sadd.s32 4294967295, %s1229_s26   ;;  %p1027_p0 = scmp.ge.s32.totalorder %s1229_s26, 1  ;;  %s1229_s26 = sphi %s1280_s26, %s18_s26  }
   0x2   : > { %p270_p1 = scmp.lt.s32.totalorder %s1229_s26, 3 }
   0x4   : > { %p271_p2 = pnand %p1027_p0, %p270_p1 }
   0x5   : > { %v1173_v0 = vld [vmem:[%s1478_s2 + $0x4] ss:$12 sps:$4 sm:$0xff] (!%p271_p2)   ;;  %v1175_v1 = vld [vmem:[%s1478_s2] ss:$12 sps:$4 sm:$0xff] (!%p271_p2)   ;;  %v1231_v2 = vmov (!%p271_p2), 0   ;;  %v1232_v4 = vmov (!%p271_p2), 0.0   ;;  %v355_v28 = vlaneseq (!%p271_p2) }
   0x6   : > { %274 = sbr.rel (%p271_p2) target bundleno = 2191 (0x88f), region = 52  ;;  %530 = vmatprep.mubr.bf16.mxu0 (!%p271_p2), %v1231_v2  ;;  %498 = vmatprep.subr.bf16.mxu0 (!%p271_p2), %v1173_v0  ;;  %v1176_v3 = vld [vmem:[%s1478_s2 + $0x1c] ss:$12 sps:$4 sm:$0xff] (!%p271_p2)   ;;  %v1178_v5 = vld [vmem:[%s1478_s2 + $0x18] ss:$12 sps:$4 sm:$0xff] (!%p271_p2)   ;;  %p306_p3 = scmp.lt.s32.totalorder (!%p271_p2), %s1023_s27, 1 }
   0x7   : > { %1097 = vmatprep.subr.bf16.mxu1 (!%p271_p2), %v1232_v4  ;;  %499 = vmatpush1.bf16.msra.mxu0 (!%p271_p2), %v1175_v1  ;;  %v1179_v6 = vld [vmem:[%s1478_s2 + $0x34] ss:$12 sps:$4 sm:$0xff] (!%p271_p2)   ;;  %v1181_v7 = vld [vmem:[%s1478_s2 + $0x30] ss:$12 sps:$4 sm:$0xff] (!%p271_p2)   ;;  %v1182_v8 = vld [vmem:[%s1478_s2 + $0x4c] ss:$12 sps:$4 sm:$0xff] (!%p271_p2)  }
   0x8   : > { %500 = vmatprep.subr.bf16.mxu0 (!%p271_p2), %v1176_v3  ;;  %v1184_v9 = vld [vmem:[%s1478_s2 + $0x48] ss:$12 sps:$4 sm:$0xff] (!%p271_p2)   ;;  %v1185_v11 = vld [vmem:[%s1478_s2 + $0x64] ss:$12 sps:$4 sm:$0xff] (!%p271_p2)   ;;  %v1198_v12 = vld [vmem:[%s1478_s2 + $0x20] ss:$12 sps:$4 sm:$0xff] (!%p271_p2)  }
   0x9   : > { %v1197_v10 = vld [vmem:[%s1478_s2 + $0x8] ss:$12 sps:$4 sm:$0xff] (!%p271_p2)   ;;  %v1187_v13 = vld [vmem:[%s1478_s2 + $0x60] ss:$12 sps:$4 sm:$0xff] (!%p271_p2)   ;;  %v1190_v15 = vld [vmem:[%s1478_s2 + $0x78] ss:$12 sps:$4 sm:$0xff] (!%p271_p2)  }
   0xa   : > { %1098 = vmatpush3.bf16.msra.mxu1 (!%p271_p2), %v1197_v10  ;;  %v1188_v14 = vld [vmem:[%s1478_s2 + $0x7c] ss:$12 sps:$4 sm:$0xff] (!%p271_p2)   ;;  %v1199_v16 = vld [vmem:[%s1478_s2 + $0x38] ss:$12 sps:$4 sm:$0xff] (!%p271_p2)   ;;  %v1191_v17 = vld [vmem:[%s1478_s2 + $0x94] ss:$12 sps:$4 sm:$0xff] (!%p271_p2)  }
   0xb   : > { %501 = vmatpush1.bf16.msra.mxu0 (!%p271_p2), %v1178_v5  ;;  %1099 = vmatprep.subr.bf16.mxu1 (!%p271_p2), %v1232_v4  ;;  %v1200_v18 = vld [vmem:[%s1478_s2 + $0x50] ss:$12 sps:$4 sm:$0xff] (!%p271_p2)   ;;  %v1194_v20 = vld [vmem:[%s1478_s2 + $0xac] ss:$12 sps:$4 sm:$0xff] (!%p271_p2)   ;;  %v1201_v21 = vld [vmem:[%s1478_s2 + $0x68] ss:$12 sps:$4 sm:$0xff] (!%p271_p2)  }
   0xc   : > { %502 = vmatprep.subr.bf16.mxu0 (!%p271_p2), %v1179_v6  ;;  %v1193_v19 = vld [vmem:[%s1478_s2 + $0x90] ss:$12 sps:$4 sm:$0xff] (!%p271_p2)   ;;  %v1196_v22 = vld [vmem:[%s1478_s2 + $0xa8] ss:$12 sps:$4 sm:$0xff] (!%p271_p2)   ;;  %v1202_v24 = vld [vmem:[%s1478_s2 + $0x80] ss:$12 sps:$4 sm:$0xff] (!%p271_p2)  }
   0xd   : > { %s1486_s27 = smov (!%p306_p3, %s1023_s27), 1  ;;  %v1203_v26 = vld [vmem:[%s1478_s2 + $0x98] ss:$12 sps:$4 sm:$0xff]   ;;  %v1204_v27 = vld [vmem:[%s1478_s2 + $0xb0] ss:$12 sps:$4 sm:$0xff]   ;;  %vm1233_vm0 = vmmov 0  }
   0xe   : > { %s1028_s29 = sshll.u32 %s1486_s27, 3  ;;  %1100 = vmatpush3.bf16.msra.mxu1 %v1198_v12  ;;  %1113 = vmatprep.mubr.msk.bf16.mxu1 %vm1233_vm0, %v1232_v4  ;;  %v1388_v29 = vshrl.u32 %v355_v28, 7  ;;  %v353_v31 = vld [vmem:[%s1479_s3] sm:$0x7]  ;;  %vm587_vm1 = vcmask 523264   ;;  %s1234_s19 = smov 64  }
   0xf   : > { %503 = vmatpush1.bf16.msra.mxu0 %v1181_v7  ;;  %1101 = vmatprep.subr.bf16.mxu1 %v1232_v4  ;;  %s309_s1 = scalar_lea.vmem %s1476_s0, %s1028_s29  ;;  %vm652_vm2 = vcmask 1043456   ;;  %v582_v53 = vand.u32 127, %v355_v28  ;;  %vm636_vm4 = vcmask 64512   ;;  %s317_s24 = scalar_lea.vmem %s1484_s8, %s1028_s29 }
  0x10   : > { %504 = vmatprep.subr.bf16.mxu0 %v1182_v8  ;;  %v1364_v23 = vld [vmem:[%s309_s1] sm:$0xff]  ;;  %v361_v30 = vsub.s32 1, %v1388_v29  ;;  %v357_v32 = vsub.s32 0, %v1388_v29  ;;  %v365_v44 = vsub.s32 2, %v1388_v29 }
  0x11   : > { %v320_v25 = vpack.c.bf16 %v1364_v23, %v1364_v23  ;;  %vm583_vm3 = vcmp.le.s32.totalorder %v582_v53, %v1388_v29 }
  0x12   : > { %1102 = vmatpush3.bf16.msra.mxu1 %v1199_v16  ;;  %v362_v33 = vrot.slane %v353_v31, %v361_v30  ;;  %v358_v34 = vrot.slane %v353_v31, %v357_v32  ;;  %v366_v45 = vrot.slane %v353_v31, %v365_v44 }
  0x13   : > { %505 = vmatpush1.bf16.msra.mxu0 %v1184_v9  ;;  %1103 = vmatprep.subr.bf16.mxu1 %v1232_v4 }
  0x14   : > { %506 = vmatprep.subr.bf16.mxu0 %v1185_v11 }
  0x16   : > { %1104 = vmatpush3.bf16.msra.mxu1 %v1200_v18 }
  0x17   : > { %507 = vmatpush1.bf16.msra.mxu0 %v1187_v13  ;;  %1105 = vmatprep.subr.bf16.mxu1 %v1232_v4 }
  0x18   : > { %508 = vmatprep.subr.bf16.mxu0 %v1188_v14 }
  0x1a   : > { %1106 = vmatpush3.bf16.msra.mxu1 %v1201_v21 }
  0x1b   : > { %509 = vmatpush1.bf16.msra.mxu0 %v1190_v15  ;;  %1107 = vmatprep.subr.bf16.mxu1 %v1232_v4 }
  0x1c   : > { %510 = vmatprep.subr.bf16.mxu0 %v1191_v17 }
  0x1e   : > { %1108 = vmatpush3.bf16.msra.mxu1 %v1202_v24 }
  0x1f   : > { %511 = vmatpush1.bf16.msra.mxu0 %v1193_v19  ;;  %1109 = vmatprep.subr.bf16.mxu1 %v1232_v4 }
  0x20   : > { %512 = vmatprep.subr.bf16.mxu0 %v1194_v20 }
  0x22   : > { %1110 = vmatpush3.bf16.msra.mxu1 %v1203_v26 }
  0x23   : > { %513 = vmatpush1.bf16.msra.mxu0 %v1196_v22  ;;  %1111 = vmatprep.subr.bf16.mxu1 %v1232_v4 }
  0x24   : > { %1141 = vmatprep.subr.bf16.mxu0 %v1232_v4 }
  0x26   : > { %531 = vmatmul.mubr.bf16.vlgmr.msra.gmra.mrb[0].mxu0 %v320_v25  ;;  %1112 = vmatpush3.bf16.msra.mxu1 %v1204_v27 }
  0x27   : > { %1117 = vmatprep.subr.bf16.mxu1 %v1232_v4  ;;  %1157 = vmatprep.mubr.msk.bf16.mxu0 %vm1233_vm0, %v1232_v4 }
  0x29   : > { %1114 = vmatmul.mubr.bf16.vlgmr.msra.gmra.mrb[0].mxu1 %v320_v25 }
  0x2a   : > { %1119 = vmatprep.mubr.msk.bf16.mxu1 %vm1233_vm0, %v1232_v4 }
  0xf9   : > { %v532_v35 = vpop.f32.mrb[0].mxu0 }
  0xfa   : > { %v534_v36 = vpop.f32.mrb[1].mxu0  ;;  %v533_v40 = vadd.f32 %v532_v35, %v358_v34  ;;  %v1206_v34 = vld [vmem:[%s1480_s4 + $0x8] sm:$0xff]   ;;  %v1207_v35 = vld [vmem:[%s1480_s4 + $0x10] sm:$0xff]  }
  0xfb   : > { %v535_v37 = vadd.f32 %v534_v36, %v362_v33  ;;  %v536_v38 = vpop.f32.mrb[2].mxu0  ;;  %v1205_v33 = vld [vmem:[%s1480_s4] sm:$0xff]   ;;  %v1208_v36 = vld [vmem:[%s1480_s4 + $0x18] sm:$0xff]  }
  0xfc   : > { %v537_v39 = vpop.f32.mrb[3].mxu0  ;;  %v584_v43 = vpack.c.bf16 %v533_v40, %v533_v40  ;;  %v573_v46 = vpop.f32.mrb[0].mxu1  ;;  %1142 = vmatpush3.bf16.msra.mxu0 %v1205_v33  ;;  %v1210_v38 = vld [vmem:[%s1480_s4 + $0x28] sm:$0xff]   ;;  %v1212_v40 = vld [vmem:[%s1480_s4 + $0x38] sm:$0xff]  }
  0xfd   : > { %v585_v41 = vpack.c.bf16 %v535_v37, %v535_v37  ;;  %v574_v47 = vadd.f32 %v573_v46, %v366_v45  ;;  %v1115_v48 = vpop.f32.mrb[1].mxu1  ;;  %1143 = vmatprep.subr.bf16.mxu0 %v1232_v4  ;;  %v1209_v37 = vld [vmem:[%s1480_s4 + $0x20] sm:$0xff]   ;;  %v1211_v39 = vld [vmem:[%s1480_s4 + $0x30] sm:$0xff]  }
  0xfe   : > { %v576_v49 = vpop.f32.mrb[2].mxu1 }
  0xff   : > { %v592_v42 = vsel %vm587_vm1, %v585_v41, 0  ;;  %700 = vrot.lane.b32.xlu1 %v585_v41, %s1234_s19  ;;  %v586_v50 = vpack.c.bf16 %v574_v47, %v574_v47  ;;  %v1116_v51 = vpop.f32.mrb[3].mxu1 }
 0x100   : > { %1118 = vmatpush3.bf16.xpose.msra.mxu1 %v592_v42  ;;  %1144 = vmatpush3.bf16.msra.mxu0 %v1206_v34 }
 0x101   : > { %1123 = vmatprep.subr.bf16.mxu1 %v1232_v4  ;;  %v654_v52 = vsel %vm652_vm2, %v586_v50, 0  ;;  %1145 = vmatprep.subr.bf16.mxu0 %v1232_v4 }
 0x103   : > { %697 = vrot.lane.b32.xlu1 %v584_v43, %s1234_s19 }
 0x104   : > { %1146 = vmatpush3.bf16.msra.mxu0 %v1207_v35 }
 0x105   : > { %1147 = vmatprep.subr.bf16.mxu0 %v1232_v4 }
 0x107   : > { %1120 = vmatmul.mubr.msk.bf16.vlgmr.msra.gmra.mrb[4].mxu1 %vm587_vm1, %v584_v43 }
 0x108   : > { %1125 = vmatprep.mubr.msk.bf16.mxu1 %vm1233_vm0, %v1232_v4  ;;  %1124 = vmatpush3.bf16.msra.mxu1 %v654_v52 }
 0x109   : > { %1129 = vmatprep.subr.bf16.mxu1 %v1232_v4  ;;  %1148 = vmatpush3.bf16.msra.mxu0 %v1208_v36 }
 0x10a   : > { %1149 = vmatprep.subr.bf16.mxu0 %v1232_v4 }
 0x10d   : > { %1150 = vmatpush3.bf16.msra.mxu0 %v1209_v37 }
 0x10e   : > { %1151 = vmatprep.subr.bf16.mxu0 %v1232_v4 }
 0x111   : > { %1152 = vmatpush3.bf16.msra.mxu0 %v1210_v38 }
 0x112   : > { %1153 = vmatprep.subr.bf16.mxu0 %v1232_v4 }
 0x115   : > { %1154 = vmatpush3.bf16.msra.mxu0 %v1211_v39 }
 0x116   : > { %1155 = vmatprep.subr.bf16.mxu0 %v1232_v4 }
 0x119   : > { %1156 = vmatpush3.bf16.msra.mxu0 %v1212_v40 }
 0x171   : > { %v701_v6 = vpop.permute.xlu1 %700 }
 0x172   : > { %v706_v8 = vsel %vm587_vm1, %v701_v6, 0 }
 0x175   : > { %v698_v9 = vpop.permute.xlu1 %697 }
 0x1da   : > { %v628_v54 = vpop.f32.mrb[4].mxu1 }
 0x1db   : > { %v634_v55 = vmul.f32 0.125, %v628_v54  ;;  %v1121_v56 = vpop.f32.mrb[5].mxu1 }
 0x1dc   : > { %v631_v57 = vpop.f32.mrb[6].mxu1 }
 0x1dd   : > { %v1122_v58 = vpop.f32.mrb[7].mxu1  ;;  %v635_v59 = vsel %vm583_vm3, %v634_v55, -1e+30 }
 0x1de   : > { %v637_v60 = vsel %vm636_vm4, %v635_v59, -inf }
 0x1df   : > { %638 = vmax.xlane.f32.xlu0 %v637_v60 }
 0x26c   : > { %v639_v61 = vpop.xlane.xlu0 %638 }
 0x26d   : > { %v640_v62 = vsub.f32 %v635_v59, %v639_v61 }
 0x26f   : > { %v641_v63 = vmul.f32 1.442695, %v640_v62  ;;  %v1067_v62 = vld [vmem:[%s1482_s6] ss:$0 sm:$0xff] }
 0x271   : > { %1213 = vpow2.f32 %v641_v63 }
 0x27b   : > { %v1214_v0 = vpop.eup %1213 }
 0x27c   : > { %v643_v1 = vsel %vm636_vm4, %v1214_v0, 0.0 }
 0x27d   : > { %644 = vadd.xlane.f32.xlu0 %v643_v1 }
 0x30a   : > { %v645_v2 = vpop.xlane.xlu0 %644 }
 0x30b   : > { %1215 = vrcp.f32 %v645_v2 }
 0x315   : > { %v1216_v3 = vpop.eup %1215 }
 0x316   : > { %v647_v5 = vmul.f32 %v1216_v3, %v1214_v0 }
 0x318   : > { %v648_v7 = vpack.c.bf16 %v647_v5, %v647_v5 }
 0x31a   : > { %1126 = vmatmul.mubr.msk.bf16.vlgmr.msra.gmra.mrb[8].mxu1 %vm636_vm4, %v648_v7 }
 0x31b   : > { %1130 = vmatpush3.bf16.xpose.msra.mxu1 %v706_v8  ;;  %1131 = vmatprep.mubr.msk.bf16.mxu1 %vm1233_vm0, %v1232_v4 }
 0x31c   : > { %1135 = vmatprep.subr.bf16.mxu1 %v1232_v4 }
 0x322   : > { %1132 = vmatmul.mubr.msk.bf16.vlgmr.msra.gmra.mrb[12].mxu1 %vm587_vm1, %v698_v9 }
 0x323   : > { %1137 = vmatprep.mubr.msk.bf16.mxu1 %vm1233_vm0, %v1232_v4  ;;  %v1058_v4 = vld [vmem:[%s1481_s5] ss:$0 sm:$0xff] }
 0x3ed   : > { %v690_v10 = vpop.f32.mrb[8].mxu1 }
 0x3ee   : > { %v1127_v11 = vpop.f32.mrb[9].mxu1 }
 0x3ef   : > { %v693_v12 = vpop.f32.mrb[10].mxu1 }
 0x3f0   : > { %v1128_v13 = vpop.f32.mrb[11].mxu1 }
 0x3f5   : > { %v742_v14 = vpop.f32.mrb[12].mxu1 }
 0x3f6   : > { %v748_v15 = vmul.f32 0.125, %v742_v14  ;;  %v1133_v16 = vpop.f32.mrb[13].mxu1 }
 0x3f7   : > { %v745_v17 = vpop.f32.mrb[14].mxu1 }
 0x3f8   : > { %v1134_v18 = vpop.f32.mrb[15].mxu1  ;;  %v749_v19 = vsel %vm583_vm3, %v748_v15, -1e+30 }
 0x3f9   : > { %v750_v20 = vsel %vm636_vm4, %v749_v19, -inf }
 0x3fa   : > { %751 = vmax.xlane.f32.xlu0 %v750_v20 }
 0x410   : > { %763 = vrot.lane.b32.xlu0 %v586_v50, %s1234_s19 }
 0x487   : > { %v752_v21 = vpop.xlane.xlu0 %751 }
 0x488   : > { %v753_v22 = vsub.f32 %v749_v19, %v752_v21 }
 0x48a   : > { %v754_v24 = vmul.f32 1.442695, %v753_v22 }
 0x48b   : > { %v764_v25 = vpop.permute.xlu0 %763 }
 0x48c   : > { %1217 = vpow2.f32 %v754_v24  ;;  %v769_v26 = vsel %vm652_vm2, %v764_v25, 0 }
 0x48d   : > { %1136 = vmatpush3.bf16.msra.mxu1 %v769_v26 }
 0x496   : > { %v1218_v27 = vpop.eup %1217 }
 0x497   : > { %v756_v28 = vsel %vm636_vm4, %v1218_v27, 0.0 }
 0x498   : > { %757 = vadd.xlane.f32.xlu1 %v756_v28 }
 0x525   : > { %v758_v30 = vpop.xlane.xlu1 %757 }
 0x526   : > { %1219 = vrcp.f32 %v758_v30 }
 0x530   : > { %v1220_v29 = vpop.eup %1219 }
 0x531   : > { %v760_v31 = vmul.f32 %v1220_v29, %v1218_v27 }
 0x533   : > { %v761_v32 = vpack.c.bf16 %v760_v31, %v760_v31 }
 0x535   : > { %1138 = vmatmul.mubr.msk.bf16.vlgmr.msra.gmra.mrb[16].mxu1 %vm636_vm4, %v761_v32 }
 0x608   : > { %v805_v41 = vpop.f32.mrb[16].mxu1 }
 0x609   : > { %812 = vrot.lane.b32.xlu0 %v805_v41, %s1234_s19  ;;  %v1139_v42 = vpop.f32.mrb[17].mxu1 }
 0x60a   : > { %v808_v43 = vpop.f32.mrb[18].mxu1 }
 0x60b   : > { %v1140_v44 = vpop.f32.mrb[19].mxu1 }
 0x67b   : > { %v813_v45 = vpop.permute.xlu0 %812 }
 0x67c   : > { %v815_v46 = vsel %vm587_vm1, %v690_v10, %v813_v45 }
 0x67d   : > { %v816_v47 = vpack.c.bf16 %v815_v46, %v815_v46 }
 0x67f   : > { %1158 = vmatmul.mubr.bf16.vlgmr.msra.gmra.mrb[4].mxu0 %v816_v47 }
 0x752   : > { %v922_v48 = vpop.f32.mrb[4].mxu0 }
 0x753   : > { %v923_v49 = vadd.f32 %v1058_v4, %v922_v48  ;;  %v1159_v50 = vpop.f32.mrb[5].mxu0 }
 0x754   : > { %v925_v51 = vpop.f32.mrb[6].mxu0 }
 0x755   : > { %v1160_v52 = vpop.f32.mrb[7].mxu0  ;;  %v928_v53 = vadd.f32 %v923_v49, %v1364_v23  ;;  %v1068_v23 = vld [vmem:[%s1483_s7] ss:$0 sm:$0xff] }
 0x757   : > { %931 = vadd.xlane.f32.xlu0 %v928_v53 }
 0x7e4   : > { %v932_v54 = vpop.xlane.xlu0 %931 }
 0x7e5   : > { %v934_v55 = vmul.f32 0.0078125, %v932_v54 }
 0x7e7   : > { %v935_v56 = vsub.f32 %v928_v53, %v934_v55 }
 0x7e9   : > { %v936_v57 = vmul.f32 %v935_v56, %v935_v56 }
 0x7eb   : > { %937 = vadd.xlane.f32.xlu1 %v936_v57 }
 0x878   : > { %v938_v58 = vpop.xlane.xlu1 %937 }
 0x879   : > { %v939_v59 = vmul.f32 0.0078125, %v938_v58 }
 0x87b   : > { %v940_v60 = vadd.f32 1e-05, %v939_v59 }
 0x87d   : > { %1221 = vrsqrt.f32 %v940_v60 }
 0x887   : > { %v1222_v61 = vpop.eup %1221 }
 0x888   : > { %v942_v63 = vmul.f32 %v1222_v61, %v935_v56 }
 0x88a   : > { %v949_v0 = vmul.f32 %v1067_v62, %v942_v63 }
 0x88c   : > { %v956_v1 = vadd.f32 %v1068_v23, %v949_v0 }
 0x88e   : > { %957 = vst [vmem:[%s317_s24] sm:$0xff] %v956_v1 }
 0x88f PF: > { %s18_s26 = sadd.s32 1, %s1229_s26  }
 0x890   : > { %p15_p4 = scmp.ge.s32.totalorder %s18_s26, 4  }
 0x892   :  { %17 = sbr.rel (!%p15_p4) target bundleno = 1 (0x1), region = 85 }

// kernel: _lambda_.20
= control target key start
LH: loop header
LB: loop body
LE: loop exit
PB: predicated region body
PF: predicated region fallthrough
CT: control target
= control target key end

     0   :  { %s1279_s27 = smov 0   ;;  %s1473_s0 = inlined_call_operand.vmem [shape: f32[2,8,128], index: 0, kind: input, shape index: {}]   ;;  %s1474_s1 = inlined_call_operand.vmem [shape: f32[2,8,128], index: 1, kind: input, shape index: {}]   ;;  %s1475_s2 = inlined_call_operand.vmem [shape: bf16[128,384], index: 2, kind: input, shape index: {}]   ;;  %s1476_s3 = inlined_call_operand.vmem [shape: f32[1,384], index: 3, kind: input, shape index: {}]   ;;  %s1477_s4 = inlined_call_operand.vmem [shape: bf16[128,128], index: 4, kind: input, shape index: {}]   ;;  %s1478_s5 = inlined_call_operand.vmem [shape: f32[1,128], index: 5, kind: input, shape index: {}]   ;;  %s1479_s6 = inlined_call_operand.vmem [shape: f32[1,128], index: 6, kind: input, shape index: {}]   ;;  %s1480_s7 = inlined_call_operand.vmem [shape: f32[1,128], index: 7, kind: input, shape index: {}]   ;;  %s1481_s8 = inlined_call_operand.vmem [shape: f32[2,8,128], index: 8, kind: output, shape index: {}]  }
   0x1 LB: > { %s1020_s28 = sadd.s32 4294967295, %s1228_s27   ;;  %p1024_p0 = scmp.ge.s32.totalorder %s1228_s27, 1  ;;  %s1228_s27 = sphi %s1279_s27, %s18_s27  }
   0x2   : > { %p270_p1 = scmp.lt.s32.totalorder %s1228_s27, 3 }
   0x4   : > { %p271_p2 = pnand %p1024_p0, %p270_p1 }
   0x5   : > { %v1172_v0 = vld [vmem:[%s1475_s2 + $0x8] ss:$12 sps:$4 sm:$0xff] (!%p271_p2)   ;;  %v1174_v1 = vld [vmem:[%s1475_s2 + $0x4] ss:$12 sps:$4 sm:$0xff] (!%p271_p2)   ;;  %v1230_v2 = vmov (!%p271_p2), 0.0   ;;  %v1231_v3 = vmov (!%p271_p2), 0   ;;  %v452_v30 = vlaneseq (!%p271_p2) }
   0x6   : > { %274 = sbr.rel (%p271_p2) target bundleno = 2189 (0x88d), region = 52  ;;  %1096 = vmatprep.subr.bf16.mxu0 (!%p271_p2), %v1230_v2  ;;  %574 = vmatprep.mubr.bf16.mxu1 (!%p271_p2), %v1231_v3  ;;  %v1175_v4 = vld [vmem:[%s1475_s2 + $0x20] ss:$12 sps:$4 sm:$0xff] (!%p271_p2)   ;;  %v1177_v5 = vld [vmem:[%s1475_s2 + $0x1c] ss:$12 sps:$4 sm:$0xff] (!%p271_p2)   ;;  %vm1232_vm0 = vmmov (!%p271_p2), 0  }
   0x7   : > { %542 = vmatprep.subr.bf16.mxu1 (!%p271_p2), %v1172_v0  ;;  %1112 = vmatprep.mubr.msk.bf16.mxu0 (!%p271_p2), %vm1232_vm0, %v1230_v2  ;;  %v1178_v6 = vld [vmem:[%s1475_s2] ss:$12 sps:$4 sm:$0xff] (!%p271_p2)   ;;  %v1179_v7 = vld [vmem:[%s1475_s2 + $0x38] ss:$12 sps:$4 sm:$0xff] (!%p271_p2)   ;;  %v1183_v10 = vld [vmem:[%s1475_s2 + $0x50] ss:$12 sps:$4 sm:$0xff] (!%p271_p2)  }
   0x8   : > { %543 = vmatpush1.bf16.msra.mxu1 (!%p271_p2), %v1174_v1  ;;  %1097 = vmatpush3.bf16.msra.mxu0 (!%p271_p2), %v1178_v6  ;;  %v1182_v8 = vld [vmem:[%s1475_s2 + $0x18] ss:$12 sps:$4 sm:$0xff] (!%p271_p2)   ;;  %v1181_v9 = vld [vmem:[%s1475_s2 + $0x34] ss:$12 sps:$4 sm:$0xff] (!%p271_p2)   ;;  %v1186_v11 = vld [vmem:[%s1475_s2 + $0x30] ss:$12 sps:$4 sm:$0xff] (!%p271_p2)  }
   0x9   : > { %544 = vmatprep.subr.bf16.mxu1 (!%p271_p2), %v1175_v4  ;;  %1098 = vmatprep.subr.bf16.mxu0 (!%p271_p2), %v1230_v2  ;;  %p306_p3 = scmp.lt.s32.totalorder (!%p271_p2), %s1020_s28, 1  ;;  %v1185_v12 = vld [vmem:[%s1475_s2 + $0x4c] ss:$12 sps:$4 sm:$0xff] (!%p271_p2)   ;;  %v1187_v13 = vld [vmem:[%s1475_s2 + $0x68] ss:$12 sps:$4 sm:$0xff] (!%p271_p2)   ;;  %v453_v31 = vshrl.u32 (!%p271_p2), %v452_v30, 7 }
   0xa   : > { %v1190_v14 = vld [vmem:[%s1475_s2 + $0x48] ss:$12 sps:$4 sm:$0xff] (!%p271_p2)   ;;  %v1189_v15 = vld [vmem:[%s1475_s2 + $0x64] ss:$12 sps:$4 sm:$0xff] (!%p271_p2)   ;;  %v1191_v16 = vld [vmem:[%s1475_s2 + $0x80] ss:$12 sps:$4 sm:$0xff] (!%p271_p2)  }
   0xb   : > { %v1194_v17 = vld [vmem:[%s1475_s2 + $0x60] ss:$12 sps:$4 sm:$0xff] (!%p271_p2)   ;;  %v1193_v18 = vld [vmem:[%s1475_s2 + $0x7c] ss:$12 sps:$4 sm:$0xff] (!%p271_p2)   ;;  %v1195_v19 = vld [vmem:[%s1475_s2 + $0x98] ss:$12 sps:$4 sm:$0xff] (!%p271_p2)  }
   0xc   : > { %545 = vmatpush1.bf16.msra.mxu1 (!%p271_p2), %v1177_v5  ;;  %1099 = vmatpush3.bf16.msra.mxu0 (!%p271_p2), %v1182_v8  ;;  %v1198_v20 = vld [vmem:[%s1475_s2 + $0x78] ss:$12 sps:$4 sm:$0xff] (!%p271_p2)   ;;  %v1197_v21 = vld [vmem:[%s1475_s2 + $0x94] ss:$12 sps:$4 sm:$0xff] (!%p271_p2)   ;;  %v1199_v22 = vld [vmem:[%s1475_s2 + $0xb0] ss:$12 sps:$4 sm:$0xff] (!%p271_p2)  }
   0xd   : > { %546 = vmatprep.subr.bf16.mxu1 %v1179_v7  ;;  %1100 = vmatprep.subr.bf16.mxu0 %v1230_v2  ;;  %s1483_s28 = smov (!%p306_p3, %s1020_s28), 1  ;;  %v1202_v23 = vld [vmem:[%s1475_s2 + $0x90] ss:$12 sps:$4 sm:$0xff]   ;;  %v1201_v24 = vld [vmem:[%s1475_s2 + $0xac] ss:$12 sps:$4 sm:$0xff]   ;;  %v454_v32 = vsub.s32 0, %v453_v31 }
   0xe   : > { %s1345_s19 = sshll.u32 %s1483_s28, 3  ;;  %v1203_v26 = vld [vmem:[%s1475_s2 + $0xa8] ss:$12 sps:$4 sm:$0xff]   ;;  %v450_v33 = vld [vmem:[%s1476_s3 + $0x1] sm:$0x3]  ;;  %v458_v35 = vsub.s32 1, %v453_v31 }
   0xf   : > { %s313_s11 = scalar_lea.vmem %s1474_s1, %s1345_s19  ;;  %s309_s16 = scalar_lea.vmem %s1473_s0, %s1345_s19  ;;  %v455_v34 = vrot.slane %v450_v33, %v454_v32  ;;  %v1028_v37 = vld [vmem:[%s1476_s3] ss:$0 sm:$0xff]  ;;  %vm586_vm1 = vcmask 523264   ;;  %vm650_vm2 = vcmask 1043456   ;;  %vm634_vm3 = vcmask 64512   ;;  %v1205_v32 = vld [vmem:[%s1477_s4 + $0x8] sm:$0xff]  }
  0x10   : > { %547 = vmatpush1.bf16.msra.mxu1 %v1181_v9  ;;  %1101 = vmatpush3.bf16.msra.mxu0 %v1186_v11  ;;  %v321_v25 = vld [vmem:[%s313_s11] sm:$0xff]  ;;  %v459_v39 = vrot.slane %v450_v33, %v458_v35  ;;  %s1233_s28 = smov 64   ;;  %v1206_v33 = vld [vmem:[%s1477_s4 + $0x10] sm:$0xff]   ;;  %s317_s10 = scalar_lea.vmem %s1481_s8, %s1345_s19 }
  0x11   : > { %548 = vmatprep.subr.bf16.mxu1 %v1183_v10  ;;  %1102 = vmatprep.subr.bf16.mxu0 %v1230_v2  ;;  %v1382_v27 = vld [vmem:[%s309_s16] sm:$0xff]  ;;  %v322_v28 = vpack.c.bf16 %v321_v25, %v321_v25 }
  0x12   : > { %v320_v29 = vpack.c.bf16 %v1382_v27, %v1382_v27  ;;  %v1204_v31 = vld [vmem:[%s1477_s4] sm:$0xff]  }
  0x13   : > { %v1208_v35 = vld [vmem:[%s1477_s4 + $0x20] sm:$0xff]  }
  0x14   : > { %549 = vmatpush1.bf16.msra.mxu1 %v1185_v12  ;;  %1103 = vmatpush3.bf16.msra.mxu0 %v1190_v14 }
  0x15   : > { %550 = vmatprep.subr.bf16.mxu1 %v1187_v13  ;;  %1104 = vmatprep.subr.bf16.mxu0 %v1230_v2 }
  0x18   : > { %551 = vmatpush1.bf16.msra.mxu1 %v1189_v15  ;;  %1105 = vmatpush3.bf16.msra.mxu0 %v1194_v17 }
  0x19   : > { %552 = vmatprep.subr.bf16.mxu1 %v1191_v16  ;;  %1106 = vmatprep.subr.bf16.mxu0 %v1230_v2 }
  0x1c   : > { %553 = vmatpush1.bf16.msra.mxu1 %v1193_v18  ;;  %1107 = vmatpush3.bf16.msra.mxu0 %v1198_v20 }
  0x1d   : > { %554 = vmatprep.subr.bf16.mxu1 %v1195_v19  ;;  %1108 = vmatprep.subr.bf16.mxu0 %v1230_v2 }
  0x20   : > { %555 = vmatpush1.bf16.msra.mxu1 %v1197_v21  ;;  %1109 = vmatpush3.bf16.msra.mxu0 %v1202_v23 }
  0x21   : > { %556 = vmatprep.subr.bf16.mxu1 %v1199_v22  ;;  %1110 = vmatprep.subr.bf16.mxu0 %v1230_v2 }
  0x24   : > { %557 = vmatpush1.bf16.msra.mxu1 %v1201_v24  ;;  %1111 = vmatpush3.bf16.msra.mxu0 %v1203_v26 }
  0x25   : > { %1116 = vmatprep.subr.bf16.mxu1 %v1230_v2  ;;  %1140 = vmatprep.subr.bf16.mxu0 %v1230_v2 }
  0x27   : > { %575 = vmatmul.mubr.bf16.vlgmr.msra.gmra.mrb[0].mxu1 %v322_v28  ;;  %1113 = vmatmul.mubr.bf16.vlgmr.msra.gmra.mrb[0].mxu0 %v320_v29 }
  0x28   : > { %1118 = vmatprep.mubr.msk.bf16.mxu1 %vm1232_vm0, %v1230_v2  ;;  %1156 = vmatprep.mubr.msk.bf16.mxu0 %vm1232_vm0, %v1230_v2 }
  0x29   : > { %1141 = vmatpush3.bf16.msra.mxu0 %v1204_v31 }
  0x2a   : > { %1142 = vmatprep.subr.bf16.mxu0 %v1230_v2 }
  0x2d   : > { %1143 = vmatpush3.bf16.msra.mxu0 %v1205_v32 }
  0x2e   : > { %1144 = vmatprep.subr.bf16.mxu0 %v1230_v2 }
  0x31   : > { %1145 = vmatpush3.bf16.msra.mxu0 %v1206_v33 }
  0x32   : > { %1146 = vmatprep.subr.bf16.mxu0 %v1230_v2 }
  0xfa   : > { %v576_v36 = vpop.f32.mrb[0].mxu1  ;;  %v428_v42 = vpop.f32.mrb[0].mxu0 }
  0xfb   : > { %v577_v38 = vadd.f32 %v576_v36, %v455_v34  ;;  %v578_v40 = vpop.f32.mrb[1].mxu1  ;;  %v429_v45 = vadd.f32 %v1028_v37, %v428_v42  ;;  %v1114_v46 = vpop.f32.mrb[1].mxu0  ;;  %v1207_v34 = vld [vmem:[%s1477_s4 + $0x18] sm:$0xff]   ;;  %v1209_v36 = vld [vmem:[%s1477_s4 + $0x28] sm:$0xff]   ;;  %v1210_v37 = vld [vmem:[%s1477_s4 + $0x30] sm:$0xff]  }
  0xfc   : > { %v580_v41 = vpop.f32.mrb[2].mxu1  ;;  %v431_v47 = vpop.f32.mrb[2].mxu0  ;;  %v579_v49 = vadd.f32 %v578_v40, %v459_v39  ;;  %1147 = vmatpush3.bf16.msra.mxu0 %v1207_v34 }
  0xfd   : > { %v584_v43 = vpack.c.bf16 %v577_v38, %v577_v38  ;;  %v581_v44 = vpop.f32.mrb[3].mxu1  ;;  %v583_v50 = vpack.c.bf16 %v429_v45, %v429_v45  ;;  %v1115_v51 = vpop.f32.mrb[3].mxu0  ;;  %1148 = vmatprep.subr.bf16.mxu0 %v1230_v2  ;;  %v1211_v38 = vld [vmem:[%s1477_s4 + $0x38] sm:$0xff]  }
  0xfe   : > { %v585_v52 = vpack.c.bf16 %v579_v49, %v579_v49 }
  0xff   : > { %v591_v48 = vsel %vm586_vm1, %v584_v43, 0  ;;  %698 = vrot.lane.b32.xlu1 %v584_v43, %s1233_s28 }
 0x100   : > { %1117 = vmatpush3.bf16.xpose.msra.mxu1 %v591_v48  ;;  %v652_v53 = vsel %vm650_vm2, %v585_v52, 0  ;;  %1149 = vmatpush3.bf16.msra.mxu0 %v1208_v35 }
 0x101   : > { %1122 = vmatprep.subr.bf16.mxu1 %v1230_v2  ;;  %1150 = vmatprep.subr.bf16.mxu0 %v1230_v2 }
 0x103   : > { %695 = vrot.lane.b32.xlu1 %v583_v50, %s1233_s28 }
 0x104   : > { %1151 = vmatpush3.bf16.msra.mxu0 %v1209_v36 }
 0x105   : > { %1152 = vmatprep.subr.bf16.mxu0 %v1230_v2 }
 0x107   : > { %1119 = vmatmul.mubr.msk.bf16.vlgmr.msra.gmra.mrb[4].mxu1 %vm586_vm1, %v583_v50 }
 0x108   : > { %1123 = vmatpush3.bf16.msra.mxu1 %v652_v53  ;;  %1124 = vmatprep.mubr.msk.bf16.mxu1 %vm1232_vm0, %v1230_v2 }
 0x109   : > { %1128 = vmatprep.subr.bf16.mxu1 %v1230_v2  ;;  %1153 = vmatpush3.bf16.msra.mxu0 %v1210_v37 }
 0x10a   : > { %1154 = vmatprep.subr.bf16.mxu0 %v1230_v2 }
 0x10d   : > { %1155 = vmatpush3.bf16.msra.mxu0 %v1211_v38 }
 0x171   : > { %v699_v5 = vpop.permute.xlu1 %698 }
 0x172   : > { %v704_v7 = vsel %vm586_vm1, %v699_v5, 0 }
 0x175   : > { %v696_v8 = vpop.permute.xlu1 %695 }
 0x1da   : > { %v627_v54 = vpop.f32.mrb[4].mxu1 }
 0x1db   : > { %v633_v55 = vmul.f32 0.125, %v627_v54  ;;  %v1120_v56 = vpop.f32.mrb[5].mxu1 }
 0x1dc   : > { %v630_v57 = vpop.f32.mrb[6].mxu1 }
 0x1dd   : > { %v1121_v58 = vpop.f32.mrb[7].mxu1  ;;  %v635_v59 = vsel %vm634_vm3, %v633_v55, -inf }
 0x1de   : > { %636 = vmax.xlane.f32.xlu0 %v635_v59 }
 0x26b   : > { %v637_v60 = vpop.xlane.xlu0 %636 }
 0x26c   : > { %v638_v61 = vsub.f32 %v633_v55, %v637_v60  ;;  %v1066_v60 = vld [vmem:[%s1479_s6] ss:$0 sm:$0xff] }
 0x26e   : > { %v639_v62 = vmul.f32 1.442695, %v638_v61 }
 0x270   : > { %1212 = vpow2.f32 %v639_v62 }
 0x27a   : > { %v1213_v63 = vpop.eup %1212 }
 0x27b   : > { %v641_v0 = vsel %vm634_vm3, %v1213_v63, 0.0 }
 0x27c   : > { %642 = vadd.xlane.f32.xlu0 %v641_v0 }
 0x309   : > { %v643_v1 = vpop.xlane.xlu0 %642 }
 0x30a   : > { %1214 = vrcp.f32 %v643_v1 }
 0x314   : > { %v1215_v3 = vpop.eup %1214 }
 0x315   : > { %v645_v4 = vmul.f32 %v1215_v3, %v1213_v63 }
 0x317   : > { %v646_v6 = vpack.c.bf16 %v645_v4, %v645_v4 }
 0x319   : > { %1125 = vmatmul.mubr.msk.bf16.vlgmr.msra.gmra.mrb[8].mxu1 %vm634_vm3, %v646_v6 }
 0x31a   : > { %1129 = vmatpush3.bf16.xpose.msra.mxu1 %v704_v7  ;;  %1130 = vmatprep.mubr.msk.bf16.mxu1 %vm1232_vm0, %v1230_v2 }
 0x31b   : > { %1134 = vmatprep.subr.bf16.mxu1 %v1230_v2 }
 0x321   : > { %1131 = vmatmul.mubr.msk.bf16.vlgmr.msra.gmra.mrb[12].mxu1 %vm586_vm1, %v696_v8 }
 0x322   : > { %1136 = vmatprep.mubr.msk.bf16.mxu1 %vm1232_vm0, %v1230_v2  ;;  %v1057_v2 = vld [vmem:[%s1478_s5] ss:$0 sm:$0xff] }
 0x3ec   : > { %v688_v9 = vpop.f32.mrb[8].mxu1 }
 0x3ed   : > { %v1126_v10 = vpop.f32.mrb[9].mxu1 }
 0x3ee   : > { %v691_v11 = vpop.f32.mrb[10].mxu1 }
 0x3ef   : > { %v1127_v12 = vpop.f32.mrb[11].mxu1 }
 0x3f4   : > { %v740_v13 = vpop.f32.mrb[12].mxu1 }
 0x3f5   : > { %v746_v14 = vmul.f32 0.125, %v740_v13  ;;  %v1132_v15 = vpop.f32.mrb[13].mxu1 }
 0x3f6   : > { %v743_v16 = vpop.f32.mrb[14].mxu1 }
 0x3f7   : > { %v1133_v17 = vpop.f32.mrb[15].mxu1  ;;  %v747_v18 = vsel %vm634_vm3, %v746_v14, -inf }
 0x3f8   : > { %748 = vmax.xlane.f32.xlu0 %v747_v18 }
 0x40e   : > { %760 = vrot.lane.b32.xlu0 %v585_v52, %s1233_s28 }
 0x485   : > { %v749_v19 = vpop.xlane.xlu0 %748 }
 0x486   : > { %v750_v20 = vsub.f32 %v746_v14, %v749_v19 }
 0x488   : > { %v751_v21 = vmul.f32 1.442695, %v750_v20 }
 0x489   : > { %v761_v22 = vpop.permute.xlu0 %760 }
 0x48a   : > { %1216 = vpow2.f32 %v751_v21  ;;  %v766_v23 = vsel %vm650_vm2, %v761_v22, 0 }
 0x48b   : > { %1135 = vmatpush3.bf16.msra.mxu1 %v766_v23 }
 0x494   : > { %v1217_v24 = vpop.eup %1216 }
 0x495   : > { %v753_v25 = vsel %vm634_vm3, %v1217_v24, 0.0 }
 0x496   : > { %754 = vadd.xlane.f32.xlu1 %v753_v25 }
 0x523   : > { %v755_v26 = vpop.xlane.xlu1 %754 }
 0x524   : > { %1218 = vrcp.f32 %v755_v26 }
 0x52e   : > { %v1219_v28 = vpop.eup %1218 }
 0x52f   : > { %v757_v29 = vmul.f32 %v1219_v28, %v1217_v24 }
 0x531   : > { %v758_v30 = vpack.c.bf16 %v757_v29, %v757_v29 }
 0x533   : > { %1137 = vmatmul.mubr.msk.bf16.vlgmr.msra.gmra.mrb[16].mxu1 %vm634_vm3, %v758_v30 }
 0x606   : > { %v802_v39 = vpop.f32.mrb[16].mxu1 }
 0x607   : > { %809 = vrot.lane.b32.xlu0 %v802_v39, %s1233_s28  ;;  %v1138_v40 = vpop.f32.mrb[17].mxu1 }
 0x608   : > { %v805_v41 = vpop.f32.mrb[18].mxu1 }
 0x609   : > { %v1139_v42 = vpop.f32.mrb[19].mxu1 }
 0x679   : > { %v810_v43 = vpop.permute.xlu0 %809 }
 0x67a   : > { %v812_v44 = vsel %vm586_vm1, %v688_v9, %v810_v43 }
 0x67b   : > { %v813_v45 = vpack.c.bf16 %v812_v44, %v812_v44 }
 0x67d   : > { %1157 = vmatmul.mubr.bf16.vlgmr.msra.gmra.mrb[4].mxu0 %v813_v45 }
 0x750   : > { %v919_v46 = vpop.f32.mrb[4].mxu0 }
 0x751   : > { %v920_v47 = vadd.f32 %v1057_v2, %v919_v46  ;;  %v1158_v48 = vpop.f32.mrb[5].mxu0 }
 0x752   : > { %v922_v49 = vpop.f32.mrb[6].mxu0 }
 0x753   : > { %v1159_v50 = vpop.f32.mrb[7].mxu0  ;;  %v925_v51 = vadd.f32 %v920_v47, %v1382_v27  ;;  %v1067_v27 = vld [vmem:[%s1480_s7] ss:$0 sm:$0xff] }
 0x755   : > { %928 = vadd.xlane.f32.xlu0 %v925_v51 }
 0x7e2   : > { %v929_v52 = vpop.xlane.xlu0 %928 }
 0x7e3   : > { %v931_v53 = vmul.f32 0.0078125, %v929_v52 }
 0x7e5   : > { %v932_v54 = vsub.f32 %v925_v51, %v931_v53 }
 0x7e7   : > { %v933_v55 = vmul.f32 %v932_v54, %v932_v54 }
 0x7e9   : > { %934 = vadd.xlane.f32.xlu1 %v933_v55 }
 0x876   : > { %v935_v56 = vpop.xlane.xlu1 %934 }
 0x877   : > { %v936_v57 = vmul.f32 0.0078125, %v935_v56 }
 0x879   : > { %v937_v58 = vadd.f32 1e-05, %v936_v57 }
 0x87b   : > { %1220 = vrsqrt.f32 %v937_v58 }
 0x885   : > { %v1221_v59 = vpop.eup %1220 }
 0x886   : > { %v939_v61 = vmul.f32 %v1221_v59, %v932_v54 }
 0x888   : > { %v946_v62 = vmul.f32 %v1066_v60, %v939_v61 }
 0x88a   : > { %v953_v63 = vadd.f32 %v1067_v27, %v946_v62 }
 0x88c   : > { %954 = vst [vmem:[%s317_s10] sm:$0xff] %v953_v63 }
 0x88d PF: > { %s18_s27 = sadd.s32 1, %s1228_s27  }
 0x88e   : > { %p15_p4 = scmp.ge.s32.totalorder %s18_s27, 4  }
 0x890   :  { %17 = sbr.rel (!%p15_p4) target bundleno = 1 (0x1), region = 85 }

// kernel: _lambda_.25
= control target key start
LH: loop header
LB: loop body
LE: loop exit
PB: predicated region body
PF: predicated region fallthrough
CT: control target
= control target key end

     0   :  { %12 = vsyncpa [#allocation3], 0  ;;  %s1087_s0 = inlined_call_operand.vmem [shape: f32[16,128], index: 0, kind: input, shape index: {}]   ;;  %s1088_s1 = inlined_call_operand.vmem [shape: bf16[128,128], index: 1, kind: input, shape index: {}]   ;;  %s1089_s2 = inlined_call_operand.vmem [shape: f32[1,128], index: 2, kind: input, shape index: {}]   ;;  %s1090_s3 = inlined_call_operand.vmem [shape: f32[1,128], index: 3, kind: input, shape index: {}]   ;;  %s1091_s4 = inlined_call_operand.vmem [shape: f32[1,128], index: 4, kind: input, shape index: {}]   ;;  %s1092_s5 = inlined_call_operand.vmem [shape: f32[256,128], index: 5, kind: input, shape index: {}]   ;;  %s1093_s6 = inlined_call_operand.vmem [shape: f32[1,256], index: 6, kind: input, shape index: {}]   ;;  %s1094_s7 = inlined_call_operand.hbm [shape: f32[16,256], index: 7, kind: output, shape index: {}]  }
   0x1   :  { %14 = vsyncpa [#allocation3 + $0x1], 0  ;;  %s855_s24 = smov 0   ;;  %s857_s25 = smov 0  }
   0x2   :  { %s859_s26 = smov 0   ;;  %s861_s27 = smov 0  }
   0x3 LB: > { %s876_s28 = sadd.s32 4294967295, %s809_s27   ;;  %s621_s29 = sadd.s32 4294967294, %s809_s27   ;;  %s809_s27 = sphi %s861_s27, %s1100_s27   ;;  %s805_s26 = sphi %s859_s26, %s1099_s26   ;;  %s801_s25 = sphi %s857_s25, %s1098_s25   ;;  %s797_s24 = sphi %s855_s24, %s1097_s24  }
   0x4   : > { %s880_s30 = sadd.s32 1, %s809_s27   ;;  %s179_s8 = sadd.s32 1, %s805_s26 }
   0x5   : > { %s176_s9 = ssub.s32 %s809_s27, %s880_s30  ;;  %p189_p0 = scmp.ne.s32.totalorder %s805_s26, %s801_s25 }
   0x6   : > { %p177_p1 = scmp.eq.s32.totalorder %s176_s9, 0  ;;  %p190_p2 = scmp.eq.s32.totalorder %s876_s28, 1 }
   0x7   : > { %p195_p3 = scmp.ne.s32.totalorder %s801_s25, %s797_s24  ;;  %p196_p4 = scmp.eq.s32.totalorder %s621_s29, 1 }
   0x8   : > { %s891_s10 = scalar_select %p177_p1, %s805_s26, %s179_s8  }
   0x9   : > { %p893_p5 = por %p190_p2, %p189_p0  ;;  %p897_p6 = por %p196_p4, %p195_p3 }
   0xa   : > { %p624_p7 = scmp.ge.s32.totalorder %s809_s27, 1  ;;  %p239_p8 = scmp.lt.s32.totalorder %s809_s27, 3 }
   0xc   : > { %p240_p9 = pnand %p624_p7, %p239_p8 }
   0xd   : > { %v733_v0 = vld [vmem:[%s1088_s1] sm:$0xff] (!%p240_p9)   ;;  %v811_v1 = vmov (!%p240_p9), 0.0   ;;  %v734_v2 = vld [vmem:[%s1088_s1 + $0x8] sm:$0xff] (!%p240_p9)   ;;  %vm812_vm0 = vmmov (!%p240_p9), 0   ;;  %v735_v3 = vld [vmem:[%s1088_s1 + $0x10] sm:$0xff] (!%p240_p9)   ;;  %p270_p10 = scmp.lt.s32.totalorder (!%p240_p9), %s876_s28, 1 }
   0xe   : > { %243 = sbr.rel (%p240_p9) target bundleno = 852 (0x354), region = 48  ;;  %671 = vmatprep.subr.bf16.mxu0 (!%p240_p9), %v811_v1  ;;  %687 = vmatprep.mubr.msk.bf16.mxu0 (!%p240_p9), %vm812_vm0, %v811_v1  ;;  %v736_v4 = vld [vmem:[%s1088_s1 + $0x18] sm:$0xff] (!%p240_p9)   ;;  %v737_v5 = vld [vmem:[%s1088_s1 + $0x20] sm:$0xff] (!%p240_p9)   ;;  %v738_v6 = vld [vmem:[%s1088_s1 + $0x28] sm:$0xff] (!%p240_p9)   ;;  %v813_v18 = vmov (!%p240_p9), -1.0   ;;  %s267_s20 = sand.u32 (!%p240_p9), 1, %s801_s25  }
   0xf   : > { %672 = vmatpush3.bf16.msra.mxu0 (!%p240_p9), %v733_v0  ;;  %v739_v7 = vld [vmem:[%s1088_s1 + $0x30] sm:$0xff] (!%p240_p9)   ;;  %v740_v8 = vld [vmem:[%s1088_s1 + $0x38] sm:$0xff] (!%p240_p9)   ;;  %v627_v11 = vld [vmem:[%s1089_s2] ss:$0 sm:$0xff] (!%p240_p9)  ;;  %s625_s21 = sshll.u32 (!%p240_p9), %s267_s20, 4  ;;  %s643_s29 = sshll.u32 (!%p240_p9), %s876_s28, 8 }
  0x10   : > { %673 = vmatprep.subr.bf16.mxu0 (!%p240_p9), %v811_v1  ;;  %v460_v43 = vld [vmem:[%s1092_s5 + $0x80] sm:$0xff] (!%p240_p9)  ;;  %v461_v44 = vld [vmem:[%s1092_s5 + $0x88] sm:$0xff] (!%p240_p9)  ;;  %v462_v48 = vld [vmem:[%s1092_s5 + $0x90] sm:$0xff] (!%p240_p9)  ;;  %s269_s8 = scalar_lea.vmem (!%p240_p9), [#allocation2], %s625_s21  ;;  %s1045_s15 = scalar_lea.hbm (!%p240_p9), %s1094_s7, %s643_s29 }
  0x11   : > { %v444_v45 = vld [vmem:[%s1092_s5] sm:$0xff] (!%p240_p9)  ;;  %v484_v46 = vpack.c.bf16 (!%p240_p9), %v461_v44, %v460_v43  ;;  %v445_v47 = vld [vmem:[%s1092_s5 + $0x8] sm:$0xff] (!%p240_p9)  ;;  %v463_v49 = vld [vmem:[%s1092_s5 + $0x98] sm:$0xff] (!%p240_p9) }
  0x12   : > { %v476_v50 = vpack.c.bf16 (!%p240_p9), %v445_v47, %v444_v45  ;;  %v485_v51 = vpack.c.bf16 (!%p240_p9), %v463_v49, %v462_v48  ;;  %v446_v52 = vld [vmem:[%s1092_s5 + $0x10] sm:$0xff] (!%p240_p9)  ;;  %v447_v53 = vld [vmem:[%s1092_s5 + $0x18] sm:$0xff] (!%p240_p9)  ;;  %v464_v54 = vld [vmem:[%s1092_s5 + $0xa0] sm:$0xff] (!%p240_p9) }
  0x13   : > { %674 = vmatpush3.bf16.msra.mxu0 (!%p240_p9), %v734_v2  ;;  %653 = vmatprep.subr.bf16.mxu1 (!%p240_p9), %v484_v46  ;;  %v465_v55 = vld [vmem:[%s1092_s5 + $0xa8] sm:$0xff] (!%p240_p9)  ;;  %v477_v56 = vpack.c.bf16 (!%p240_p9), %v447_v53, %v446_v52  ;;  %v448_v58 = vld [vmem:[%s1092_s5 + $0x20] sm:$0xff] (!%p240_p9)  ;;  %v466_v60 = vld [vmem:[%s1092_s5 + $0xb0] sm:$0xff] (!%p240_p9) }
  0x14   : > { %675 = vmatprep.subr.bf16.mxu0 (!%p240_p9), %v811_v1  ;;  %654 = vmatpush3.bf16.xpose.msra.mxu1 (!%p240_p9), %v476_v50  ;;  %v486_v57 = vpack.c.bf16 (!%p240_p9), %v465_v55, %v464_v54  ;;  %v449_v59 = vld [vmem:[%s1092_s5 + $0x28] sm:$0xff] (!%p240_p9)  ;;  %v467_v61 = vld [vmem:[%s1092_s5 + $0xb8] sm:$0xff] (!%p240_p9)  ;;  %v450_v0 = vld [vmem:[%s1092_s5 + $0x30] sm:$0xff] (!%p240_p9) }
  0x15   : > { %s271_s23 = scalar_select %p270_p10, %s876_s28, 1  ;;  %655 = vmatprep.subr.bf16.mxu1 %v485_v51  ;;  %v478_v62 = vpack.c.bf16 %v449_v59, %v448_v58  ;;  %v487_v63 = vpack.c.bf16 %v467_v61, %v466_v60  ;;  %v468_v2 = vld [vmem:[%s1092_s5 + $0xc0] sm:$0xff] }
  0x16   : > { %v492_v44 = vld [vmem:[%s1093_s6] sm:$0x3]  ;;  %s548_s28 = scalar_lea.sflag [#allocation3], %s267_s20 }
  0x17   : > { %676 = vmatpush3.bf16.msra.mxu0 %v735_v3  ;;  %s626_s9 = sshll.u32 %s271_s23, 3  ;;  %v469_v3 = vld [vmem:[%s1092_s5 + $0xc8] sm:$0xff] }
  0x18   : > { %677 = vmatprep.subr.bf16.mxu0 %v811_v1  ;;  %s273_s17 = scalar_lea.vmem %s1087_s0, %s626_s9  ;;  %s562_s9 = sshll.u32 %s269_s8, 4  ;;  %s1047_s9 = int_to_ptr.vmem [resolvable:$true] %s562_s9 }
  0x19   : > { %v275_v9 = vld [vmem:[%s273_s17] sm:$0xff]  ;;  %s747_s16 = scalar_lea.vmem %s1047_s9, 256  ;;  %s814_s17 = smov [#allocation2]  }
  0x1a   : > { %v276_v10 = vpack.c.bf16 %v275_v9, %v275_v9  ;;  %p748_p11 = scmp.ne.s32.totalorder %s1047_s9, %s747_s16  ;;  %s751_s18 = sshll.u32 %s814_s17, 4  ;;  %s752_s18 = int_to_ptr.vmem [resolvable:$false] %s751_s18 }
  0x1b   : > { %678 = vmatpush3.bf16.msra.mxu0 %v736_v4  ;;  %s753_s19 = scalar_lea.vmem %s752_s18, 512  ;;  %p754_p0 = scmp.lt.s32.totalorder %s1047_s9, %s752_s18 }
  0x1c   : > { %679 = vmatprep.subr.bf16.mxu0 %v811_v1  ;;  %656 = vmatpush3.bf16.xpose.msra.mxu1 %v477_v56  ;;  %p749_p12 = pnand %p748_p11, %p893_p5  ;;  %p755_p1 = scmp.lt.s32.totalorder %s753_s19, %s747_s16 }
  0x1d   : > { %657 = vmatprep.subr.bf16.mxu1 %v486_v57 }
  0x1e   : > { %p750_p13 = pneg %p749_p12  ;;  %p756_p2 = por %p755_p1, %p754_p0 }
  0x1f   : > { %680 = vmatpush3.bf16.msra.mxu0 %v737_v5  ;;  %v488_v5 = vpack.c.bf16 %v469_v3, %v468_v2 }
  0x20   : > { %681 = vmatprep.subr.bf16.mxu0 %v811_v1  ;;  %p757_p3 = pnand %p756_p2, %p750_p13 }
  0x23   : > { %682 = vmatpush3.bf16.msra.mxu0 %v738_v6  ;;  %v452_v6 = vld [vmem:[%s1092_s5 + $0x40] sm:$0xff] }
  0x24   : > { %683 = vmatprep.subr.bf16.mxu0 %v811_v1  ;;  %658 = vmatpush3.bf16.xpose.msra.mxu1 %v478_v62 }
  0x25   : > { %659 = vmatprep.subr.bf16.mxu1 %v487_v63 }
  0x27   : > { %684 = vmatpush3.bf16.msra.mxu0 %v739_v7  ;;  %v453_v7 = vld [vmem:[%s1092_s5 + $0x48] sm:$0xff] }
  0x28   : > { %685 = vmatprep.subr.bf16.mxu0 %v811_v1  ;;  %v451_v1 = vld [vmem:[%s1092_s5 + $0x38] sm:$0xff] }
  0x29   : > { %v479_v4 = vpack.c.bf16 %v451_v1, %v450_v0 }
  0x2b   : > { %686 = vmatpush3.bf16.msra.mxu0 %v740_v8  ;;  %v480_v8 = vpack.c.bf16 %v453_v7, %v452_v6 }
  0x2c   : > { %660 = vmatpush3.bf16.xpose.msra.mxu1 %v479_v4 }
  0x2d   : > { %661 = vmatprep.subr.bf16.mxu1 %v488_v5 }
  0x2e   : > { %688 = vmatmul.mubr.bf16.vlgmr.msra.gmra.mrb[0].mxu0 %v276_v10 }
  0x34   : > { %662 = vmatpush3.bf16.xpose.msra.mxu1 %v480_v8 }
 0x101   : > { %v382_v12 = vpop.f32.mrb[0].mxu0 }
 0x102   : > { %v383_v13 = vadd.f32 %v627_v11, %v382_v12  ;;  %v689_v14 = vpop.f32.mrb[1].mxu0 }
 0x103   : > { %v385_v15 = vpop.f32.mrb[2].mxu0  ;;  %v471_v14 = vld [vmem:[%s1092_s5 + $0xd8] sm:$0xff] }
 0x104   : > { %v389_v16 = vmul.f32 0.70710677, %v383_v13  ;;  %v690_v17 = vpop.f32.mrb[3].mxu0  ;;  %v388_v40 = vmul.f32 0.5, %v383_v13  ;;  %v470_v13 = vld [vmem:[%s1092_s5 + $0xd0] sm:$0xff] }
 0x105   : > { %v489_v15 = vpack.c.bf16 %v471_v14, %v470_v13  ;;  %v455_v17 = vld [vmem:[%s1092_s5 + $0x58] sm:$0xff] }
 0x106   : > { %vm390_vm1 = vcmp.ge.f32.partialorder %v389_v16, 0.0 }
 0x107   : > { %v391_v19 = vsel %vm390_vm1, 1.0, %v813_v18  ;;  %663 = vmatprep.subr.bf16.mxu1 %v489_v15 }
 0x108   : > { %v392_v20 = vmul.f32 %v391_v19, %v389_v16  ;;  %v454_v16 = vld [vmem:[%s1092_s5 + $0x50] sm:$0xff] }
 0x109   : > { %v481_v18 = vpack.c.bf16 %v455_v17, %v454_v16 }
 0x10a   : > { %v393_v21 = vmul.f32 0.3275911, %v392_v20  ;;  %v406_v23 = vsub.f32 0.0, %v392_v20 }
 0x10b   : > { %664 = vmatpush3.bf16.xpose.msra.mxu1 %v481_v18 }
 0x10c   : > { %v394_v22 = vadd.f32 1.0, %v393_v21  ;;  %v407_v25 = vmul.f32 %v406_v23, %v392_v20  ;;  %v473_v20 = vld [vmem:[%s1092_s5 + $0xe8] sm:$0xff]  ;;  %v456_v21 = vld [vmem:[%s1092_s5 + $0x60] sm:$0xff] }
 0x10d   : > { %v457_v23 = vld [vmem:[%s1092_s5 + $0x68] sm:$0xff] }
 0x10e   : > { %741 = vrcp.f32 %v394_v22  ;;  %v408_v28 = vmul.f32 1.442695, %v407_v25  ;;  %v475_v25 = vld [vmem:[%s1092_s5 + $0xf8] sm:$0xff] }
 0x110   : > { %743 = vpow2.f32 %v408_v28  ;;  %v458_v28 = vld [vmem:[%s1092_s5 + $0x70] sm:$0xff] }
 0x118   : > { %v742_v24 = vpop.eup %741 }
 0x119   : > { %v397_v26 = vmul.f32 1.0614054, %v742_v24 }
 0x11a   : > { %v744_v36 = vpop.eup %743 }
 0x11b   : > { %v398_v27 = vadd.f32 -1.4531521, %v397_v26  ;;  %v482_v26 = vpack.c.bf16 %v457_v23, %v456_v21 }
 0x11d   : > { %v399_v29 = vmul.f32 %v742_v24, %v398_v27 }
 0x11f   : > { %v400_v30 = vadd.f32 1.4214138, %v399_v29  ;;  %v459_v29 = vld [vmem:[%s1092_s5 + $0x78] sm:$0xff] }
 0x121   : > { %v401_v31 = vmul.f32 %v742_v24, %v400_v30  ;;  %v483_v30 = vpack.c.bf16 %v459_v29, %v458_v28 }
 0x123   : > { %v402_v32 = vadd.f32 -0.28449672, %v401_v31 }
 0x125   : > { %v403_v33 = vmul.f32 %v742_v24, %v402_v32 }
 0x127   : > { %v404_v34 = vadd.f32 0.2548296, %v403_v33 }
 0x129   : > { %v405_v35 = vmul.f32 %v742_v24, %v404_v34  ;;  %v474_v24 = vld [vmem:[%s1092_s5 + $0xf0] sm:$0xff] }
 0x12a   : > { %v491_v27 = vpack.c.bf16 %v475_v25, %v474_v24 }
 0x12b   : > { %v410_v37 = vmul.f32 %v744_v36, %v405_v35  ;;  %v636_v35 = vld [vmem:[%s1090_s3] ss:$0 sm:$0xff] }
 0x12d   : > { %v411_v38 = vsub.f32 1.0, %v410_v37  ;;  %v637_v37 = vld [vmem:[%s1091_s4] ss:$0 sm:$0xff] }
 0x12f   : > { %v412_v39 = vmul.f32 %v411_v38, %v391_v19  ;;  %v472_v19 = vld [vmem:[%s1092_s5 + $0xe0] sm:$0xff] }
 0x130   : > { %v490_v22 = vpack.c.bf16 %v473_v20, %v472_v19 }
 0x131   : > { %v413_v41 = vadd.f32 1.0, %v412_v39 }
 0x132   : > { %665 = vmatprep.subr.bf16.mxu1 %v490_v22 }
 0x133   : > { %v414_v42 = vmul.f32 %v413_v41, %v388_v40  ;;  %666 = vmatpush3.bf16.xpose.msra.mxu1 %v482_v26  ;;  %v494_v41 = vlaneseq }
 0x134   : > { %667 = vmatprep.subr.bf16.mxu1 %v491_v27 }
 0x135   : > { %417 = vadd.xlane.f32.xlu0 %v414_v42 }
 0x13b   : > { %668 = vmatpush3.bf16.xpose.msra.mxu1 %v483_v30 }
 0x1c2   : > { %v418_v9 = vpop.xlane.xlu0 %417 }
 0x1c3   : > { %v420_v10 = vmul.f32 0.0078125, %v418_v9 }
 0x1c5   : > { %v421_v11 = vsub.f32 %v414_v42, %v420_v10  ;;  %v495_v42 = vshrl.u32 %v494_v41, 7 }
 0x1c7   : > { %v422_v12 = vmul.f32 %v421_v11, %v421_v11  ;;  %v496_v43 = vsub.s32 0, %v495_v42  ;;  %v500_v45 = vsub.s32 1, %v495_v42 }
 0x1c9   : > { %423 = vadd.xlane.f32.xlu0 %v422_v12  ;;  %v497_v46 = vrot.slane %v492_v44, %v496_v43  ;;  %v501_v47 = vrot.slane %v492_v44, %v500_v45 }
 0x256   : > { %v424_v31 = vpop.xlane.xlu0 %423 }
 0x257   : > { %v425_v32 = vmul.f32 0.0078125, %v424_v31 }
 0x259   : > { %v426_v33 = vadd.f32 1e-05, %v425_v32 }
 0x25b   : > { %745 = vrsqrt.f32 %v426_v33 }
 0x265   : > { %v746_v34 = vpop.eup %745 }
 0x266   : > { %v428_v36 = vmul.f32 %v746_v34, %v421_v11 }
 0x268   : > { %v435_v38 = vmul.f32 %v636_v35, %v428_v36 }
 0x26a   : > { %v442_v39 = vadd.f32 %v637_v37, %v435_v38 }
 0x26c   : > { %v443_v40 = vpack.c.bf16 %v442_v39, %v442_v39 }
 0x26e   : > { %669 = vmatprep.mubr.bf16.mxu1 %v443_v40 }
 0x26f   : > { %670 = vmatmul.mubr.bf16.vlgmr.msra.gmra.mrb[0].mxu1 %v443_v40 }
 0x342   : > { %v538_v48 = vpop.f32.mrb[0].mxu1 }
 0x343   : > { %v539_v49 = vadd.f32 %v538_v48, %v497_v46  ;;  %v540_v50 = vpop.f32.mrb[1].mxu1 }
 0x344   : > { %v541_v51 = vadd.f32 %v540_v50, %v501_v47  ;;  %v542_v52 = vpop.f32.mrb[2].mxu1 }
 0x345   : > { %545 = vst [vmem:[%s269_s8] sm:$0xff] %v539_v49  ;;  %v543_v53 = vpop.f32.mrb[3].mxu1 }
 0x346   : > { %546 = vst [vmem:[%s269_s8 + $0x8] sm:$0xff] %v541_v51 }
 0x347   : > { %760 = shalt.err (!%p757_p3)
}
 0x348   : > { %s761_s20 = scalar_lea.hbm %s1045_s15, 256  ;;  %s765_s23 = scalar_lea.hbm %s1094_s7, 512 }
 0x349   : > { %p762_p4 = scmp.ne.s32.totalorder %s1045_s15, %s761_s20  ;;  %p766_p9 = scmp.lt.u32.totalorder %s1045_s15, %s1094_s7 }
 0x34a   : > { %p767_p10 = scmp.lt.u32.totalorder %s765_s23, %s761_s20  ;;  %p769_p12 = scmp.lt.u32.totalorder %s761_s20, %s1045_s15 }
 0x34b   : > { %p763_p7 = pnand %p762_p4, %p893_p5 }
 0x34c   : > { %p768_p11 = por %p767_p10, %p766_p9 }
 0x34d   : > { %p764_p8 = pneg %p763_p7 }
 0x34e   : > { %p770_p13 = por %p769_p12, %p768_p11 }
 0x350   : > { %p771_p0 = pnand %p770_p13, %p764_p8 }
 0x352   : > { %774 = shalt.err (!%p771_p0)
}
 0x353   : > { %691 = dma.vmem_to_hbm [thread:$0]  (%p893_p5), %s1047_s9, 256, %s1045_s15, %s548_s28  }
 0x354 PF: > { %p697_p1 = scmp.ge.s32.totalorder %s809_s27, 2  ;;  %s574_s13 = sand.u32 1, %s797_s24  }
 0x355   : > { %s575_s14 = scalar_lea.sflag [#allocation3], %s574_s13 }
 0x356   : > { %p694_p2 = pnand %p697_p1, %p897_p6 }
 0x358   : > { %792 = dma.done.wait (!%p694_p2), %s575_s14, 256  }
 0x359   : > { %794 = vsyncadd (!%p694_p2), %s575_s14, 4294967040  ;;  %p17_p3 = scmp.ge.s32.totalorder %s880_s30, 4   ;;  %s1097_s24 = smov %s801_s25 }
 0x35a   : > { %s1098_s25 = smov %s805_s26  ;;  %s1099_s26 = smov %s891_s10 }
 0x35b   : > { %s1100_s27 = smov %s880_s30  ;;  %19 = sbr.rel (!%p17_p3) target bundleno = 3 (0x3), region = 83 }
 0x362   :  { %580 = vsyncpa [#allocation3], 1 }
 0x363   :  { %582 = vsyncpa [#allocation3 + $0x1], 1 }

</bundles_post_ra>
